<compile_context>
chip_gen: v5e
topology: v5e:2x2
jax: 0.10.0
libtpu: 0.0.40
codegen_flags: <defaults>
</compile_context>

<pallas_src>
import functools

import jax
import jax.numpy as jnp
from jax import lax
from jax.experimental import pallas as pl
from jax.experimental.pallas import tpu as pltpu

# ---------------------------------------------------------------------------
# Problem sizes (small, consistent with the module's expected inputs)
# ---------------------------------------------------------------------------
B, C_IN, H, W = 2, 4, 16, 16
HIDDEN = 32           # synthetic core output channels
N_NEURONS = 16        # synthetic readout width
KSIZE = 3

# Kernel-internal, lane/sublane-friendly sizes
HP = 128                                        # HIDDEN padded to 128 lanes
NP = 128                                        # N_NEURONS padded to 128 lanes
CP = 8                                          # input channels padded to 8 (GEMM K)
WP = W + 2                                      # zero-ring-padded image width
P2 = (H + 2) * (W + 2)                          # flattened padded-grid positions (324)
M_TILE = ((P2 + 7) // 8) * 8                    # sublane-aligned GEMM M (328)
MARGIN = WP + 1                                 # max |tap shift| (19)
L_PAD = ((2 * MARGIN + M_TILE + 7) // 8) * 8    # packed-x length (368)


# ---------------------------------------------------------------------------
# Fused kernel: conv3x3 (+bias, ELU) -> masked mean-pool -> linear -> softplus
# ---------------------------------------------------------------------------
def _encoder_kernel(x_ref, wt_ref, cb_ref, mask_ref, rw_ref, rb_ref, o_ref):
    """One batch element per grid step.

    x_ref    [1, L_PAD, CP]  f32   zero-padded, flattened, margin-padded image
    wt_ref   [9, CP, NP]     bf16  conv tap weights (lane-padded HIDDEN)
    cb_ref   [1, NP]         f32   conv bias
    mask_ref [M_TILE, 1]     f32   1.0 at valid (interior) pixels else 0.0
    rw_ref   [HP, NP]        f32   readout weight, pre-scaled by 1/(H*W)
    rb_ref   [1, NP]         f32   readout bias
    o_ref    [1, 1, NP]      f32   softplus(readout) for this batch element
    """
    acc = jnp.zeros((M_TILE, NP), jnp.float32)
    # 3x3 conv as 9 statically-shifted [M, CP] @ [CP, NP] MXU GEMMs (f32 acc).
    for kh in range(KSIZE):
        for kw in range(KSIZE):
            start = MARGIN + (kh - 1) * WP + (kw - 1)      # static, in [0, 2*MARGIN]
            xs = x_ref[0, start:start + M_TILE, :].astype(jnp.bfloat16)
            acc = acc + jnp.dot(xs, wt_ref[kh * KSIZE + kw],
                                preferred_element_type=jnp.float32)
    z = acc + cb_ref[...]                                   # + conv bias
    # ELU; negative branch kept finite even where unselected.
    feat = jnp.where(z > 0.0, z, jnp.exp(jnp.minimum(z, 0.0)) - 1.0)
    # Masked spatial sum-pool (the 1/(H*W) mean factor is folded into rw_ref).
    pooled = jnp.sum(feat * mask_ref[...], axis=0, keepdims=True)        # [1, NP]
    y = jnp.dot(pooled, rw_ref[...],
                preferred_element_type=jnp.float32) + rb_ref[...]        # [1, NP]
    # softplus with PyTorch threshold=20 semantics (linear pass-through above).
    o_ref[0] = jnp.where(y > 20.0, y,
                         jnp.log1p(jnp.exp(jnp.minimum(y, 20.0))))


def _encoder_pallas(xq, params, pool_mask):
    bsz = xq.shape[0]
    return pl.pallas_call(
        _encoder_kernel,
        out_shape=jax.ShapeDtypeStruct((bsz, 1, NP), jnp.float32),
        grid=(bsz,),
        in_specs=[
            pl.BlockSpec((1, L_PAD, CP), lambda b: (b, 0, 0)),            # per-batch image
            pl.BlockSpec((KSIZE * KSIZE, CP, NP), lambda b: (0, 0, 0)),   # conv taps (resident)
            pl.BlockSpec((1, NP), lambda b: (0, 0)),                      # conv bias
            pl.BlockSpec((M_TILE, 1), lambda b: (0, 0)),                  # pool mask
            pl.BlockSpec((HP, NP), lambda b: (0, 0)),                     # readout weight
            pl.BlockSpec((1, NP), lambda b: (0, 0)),                      # readout bias
        ],
        out_specs=pl.BlockSpec((1, 1, NP), lambda b: (b, 0, 0)),
        compiler_params=pltpu.CompilerParams(
            dimension_semantics=("parallel",),   # batch axis shards across TCs (v7x)
        ),
    )(xq, params["w_taps"], params["core_b"], pool_mask,
      params["ro_w"], params["ro_b"])


# ---------------------------------------------------------------------------
# Host-side packing (reads/copies x exactly once; no 9x im2col inflation)
# ---------------------------------------------------------------------------
def _pack_input(x):
    """NCHW -> zero-ring pad -> channels-last -> flatten -> margin pad."""
    bsz, cx, _, _ = x.shape
    xp = jnp.pad(x, ((0, 0), (0, 0), (1, 1), (1, 1)))           # [B, C, H+2, W+2]
    xp = jnp.transpose(xp, (0, 2, 3, 1)).reshape(bsz, P2, cx)   # [B, P2, C]
    xq = jnp.zeros((bsz, L_PAD, CP), jnp.float32)
    return xq.at[:, MARGIN:MARGIN + P2, :cx].set(xp.astype(jnp.float32))


def _pool_mask():
    pos = jnp.arange(M_TILE)
    hp_ = pos // WP
    wp_ = pos % WP
    valid = (pos < P2) & (hp_ >= 1) & (hp_ <= H) & (wp_ >= 1) & (wp_ <= W)
    return valid.astype(jnp.float32).reshape(M_TILE, 1)


@functools.partial(jax.jit, static_argnames=("repeat_channel_dim",))
def encoder_forward(x, params, repeat_channel_dim=None):
    # TODO(synk): `output_attn_weights=True` would return readout attention maps
    # (and softplus(x)+1); the synthetic mean-pool readout has no attention
    # weights, so only the default softplus path is implemented.
    if repeat_channel_dim is not None:
        # PyTorch: x = x.repeat(1, r, 1, 1); x[:, 1:, ...] = 0 -> only channel 0
        # carries data, so the conv reduces exactly to its channel-0 weight
        # slice applied to channel 0.  Keep channel 0 instead of tiling the
        # activations (saves r x input HBM traffic); the remaining weight
        # channels see zero activations in the packed layout and contribute 0.
        x = x[:, :1]
    xq = _pack_input(x)
    out = _encoder_pallas(xq, params, _pool_mask())             # [B, 1, NP]
    return out.reshape(x.shape[0], NP)[:, :N_NEURONS]


# ---------------------------------------------------------------------------
# Parameters (lane/sublane padded, bf16 conv taps) + pure-JAX reference
# ---------------------------------------------------------------------------
def init_params(key):
    k1, k2, k3, k4 = jax.random.split(key, 4)
    w_core = 0.1 * jax.random.normal(
        k1, (KSIZE * KSIZE, C_IN, HIDDEN), jnp.float32)
    w_taps = jnp.zeros((KSIZE * KSIZE, CP, NP), jnp.bfloat16)
    w_taps = w_taps.at[:, :C_IN, :HIDDEN].set(w_core.astype(jnp.bfloat16))

    core_b = jnp.zeros((1, NP), jnp.float32)
    core_b = core_b.at[0, :HIDDEN].set(
        0.1 * jax.random.normal(k2, (HIDDEN,), jnp.float32))

    ro_w = jnp.zeros((HP, NP), jnp.float32)
    ro_w = ro_w.at[:HIDDEN, :N_NEURONS].set(
        0.1 * jax.random.normal(k3, (HIDDEN, N_NEURONS), jnp.float32))

    ro_b = jnp.zeros((1, NP), jnp.float32)
    ro_b = ro_b.at[0, :N_NEURONS].set(
        0.1 * jax.random.normal(k4, (N_NEURONS,), jnp.float32))

    return {
        "w_taps": w_taps,               # [9, CP, NP] bf16 conv taps
        "core_b": core_b,               # [1, NP]
        "ro_w": ro_w / float(H * W),    # mean-pool factor folded in (exact /256)
        "ro_b": ro_b,                   # [1, NP]
    }


def reference_forward(x, params):
    """Pure-JAX reference: conv3x3(SAME)+bias -> ELU -> mean-pool -> linear -> softplus."""
    wt = params["w_taps"][:, :C_IN, :HIDDEN].astype(jnp.float32)           # [9, C, HID]
    w_conv = wt.reshape(KSIZE, KSIZE, C_IN, HIDDEN).transpose(3, 2, 0, 1)  # [O, I, kh, kw]
    y = lax.conv_general_dilated(
        x, w_conv, window_strides=(1, 1), padding="SAME",
        dimension_numbers=("NCHW", "OIHW", "NCHW"))
    y = y + params["core_b"][0, :HIDDEN].reshape(1, HIDDEN, 1, 1)
    y = jnp.where(y > 0.0, y, jnp.expm1(jnp.minimum(y, 0.0)))              # ELU
    pooled = y.mean(axis=(2, 3))                                           # [B, HID]
    ro_w = params["ro_w"][:HIDDEN, :N_NEURONS] * float(H * W)              # un-fold 1/(H*W)
    r = pooled @ ro_w + params["ro_b"][0, :N_NEURONS]
    return jax.nn.softplus(r)


if __name__ == "__main__":
    key = jax.random.PRNGKey(0)
    kp, kx = jax.random.split(key)
    params = init_params(kp)
    x = jax.random.normal(kx, (B, C_IN, H, W), jnp.float32)

    # Default path.
    out = jax.block_until_ready(encoder_forward(x, params))
    assert out.shape == (B, N_NEURONS)
    assert bool(jnp.all(jnp.isfinite(out)))
    ref = reference_forward(x, params)
    assert bool(jnp.allclose(out, ref, atol=2e-2, rtol=2e-2))

    # repeat_channel_dim path (== repeat channels then zero all but channel 0).
    x1 = x[:, :1]
    out_rep = jax.block_until_ready(
        encoder_forward(x1, params, repeat_channel_dim=C_IN))
    x_rep = jnp.concatenate(
        [x1, jnp.zeros((B, C_IN - 1, H, W), x.dtype)], axis=1)
    ref_rep = reference_forward(x_rep, params)
    assert out_rep.shape == (B, N_NEURONS)
    assert bool(jnp.allclose(out_rep, ref_rep, atol=2e-2, rtol=2e-2))

    print("KERNEL_OK")
</pallas_src>

<mosaic_0001>
module attributes {stable_mosaic.version = 11 : i64} {
  func.func @_encoder_kernel(%arg0: i32, %arg1: memref<1x368x8xf32, #tpu.memory_space<vmem>>, %arg2: memref<9x8x128xbf16, #tpu.memory_space<vmem>>, %arg3: memref<1x128xf32, #tpu.memory_space<vmem>>, %arg4: memref<328x1xf32, #tpu.memory_space<vmem>>, %arg5: memref<128x128xf32, #tpu.memory_space<vmem>>, %arg6: memref<1x128xf32, #tpu.memory_space<vmem>>, %arg7: memref<1x1x128xf32, #tpu.memory_space<vmem>>) attributes {dimension_semantics = [#tpu.dimension_semantics<parallel>], iteration_bounds = array<i64: 2>, scalar_prefetch = 0 : i64, scratch_operands = 0 : i64, tpu.core_type = #tpu.core_type<tc>, window_params = [{transform_indices = @transform_0, window_bounds = array<i64: 1, 368, 8>}, {pipeline_mode = #tpu.pipeline_mode<synchronous>, transform_indices = @transform_1, window_bounds = array<i64: 9, 8, 128>}, {pipeline_mode = #tpu.pipeline_mode<synchronous>, transform_indices = @transform_2, window_bounds = array<i64: 1, 128>}, {pipeline_mode = #tpu.pipeline_mode<synchronous>, transform_indices = @transform_3, window_bounds = array<i64: 328, 1>}, {pipeline_mode = #tpu.pipeline_mode<synchronous>, transform_indices = @transform_4, window_bounds = array<i64: 128, 128>}, {pipeline_mode = #tpu.pipeline_mode<synchronous>, transform_indices = @transform_5, window_bounds = array<i64: 1, 128>}, {transform_indices = @transform_6, window_bounds = array<i64: 1, 1, 128>}]} {
    %cst = arith.constant 0.000000e+00 : f32
    %0 = vector.broadcast %cst : f32 to vector<328x128xf32>
    %c0 = arith.constant 0 : index
    %c0_0 = arith.constant 0 : index
    %c0_1 = arith.constant 0 : index
    %1 = vector.load %arg1[%c0, %c0_0, %c0_1] : memref<1x368x8xf32, #tpu.memory_space<vmem>>, vector<1x328x8xf32>
    %2 = vector.shape_cast %1 : vector<1x328x8xf32> to vector<328x8xf32>
    %3 = arith.truncf %2 : vector<328x8xf32> to vector<328x8xbf16>
    %c0_2 = arith.constant 0 : index
    %c0_3 = arith.constant 0 : index
    %c0_4 = arith.constant 0 : index
    %4 = vector.load %arg2[%c0_2, %c0_3, %c0_4] : memref<9x8x128xbf16, #tpu.memory_space<vmem>>, vector<1x8x128xbf16>
    %5 = vector.shape_cast %4 : vector<1x8x128xbf16> to vector<8x128xbf16>
    %cst_5 = arith.constant dense<0.000000e+00> : vector<328x128xf32>
    %6 = tpu.matmul %3, %5, %cst_5 {dimension_numbers = #tpu.dot_dimension_numbers<[1], [0], [0], [1], [0, 0, 1, 1], [], []>} : vector<328x8xbf16>, vector<8x128xbf16>, vector<328x128xf32> -> vector<328x128xf32>
    %7 = arith.addf %0, %6 : vector<328x128xf32>
    %c0_6 = arith.constant 0 : index
    %c1 = arith.constant 1 : index
    %c0_7 = arith.constant 0 : index
    %8 = vector.load %arg1[%c0_6, %c1, %c0_7] : memref<1x368x8xf32, #tpu.memory_space<vmem>>, vector<1x328x8xf32>
    %9 = vector.shape_cast %8 : vector<1x328x8xf32> to vector<328x8xf32>
    %10 = arith.truncf %9 : vector<328x8xf32> to vector<328x8xbf16>
    %c1_8 = arith.constant 1 : index
    %c0_9 = arith.constant 0 : index
    %c0_10 = arith.constant 0 : index
    %11 = vector.load %arg2[%c1_8, %c0_9, %c0_10] : memref<9x8x128xbf16, #tpu.memory_space<vmem>>, vector<1x8x128xbf16>
    %12 = vector.shape_cast %11 : vector<1x8x128xbf16> to vector<8x128xbf16>
    %cst_11 = arith.constant dense<0.000000e+00> : vector<328x128xf32>
    %13 = tpu.matmul %10, %12, %cst_11 {dimension_numbers = #tpu.dot_dimension_numbers<[1], [0], [0], [1], [0, 0, 1, 1], [], []>} : vector<328x8xbf16>, vector<8x128xbf16>, vector<328x128xf32> -> vector<328x128xf32>
    %14 = arith.addf %7, %13 : vector<328x128xf32>
    %c0_12 = arith.constant 0 : index
    %c2 = arith.constant 2 : index
    %c0_13 = arith.constant 0 : index
    %15 = vector.load %arg1[%c0_12, %c2, %c0_13] : memref<1x368x8xf32, #tpu.memory_space<vmem>>, vector<1x328x8xf32>
    %16 = vector.shape_cast %15 : vector<1x328x8xf32> to vector<328x8xf32>
    %17 = arith.truncf %16 : vector<328x8xf32> to vector<328x8xbf16>
    %c2_14 = arith.constant 2 : index
    %c0_15 = arith.constant 0 : index
    %c0_16 = arith.constant 0 : index
    %18 = vector.load %arg2[%c2_14, %c0_15, %c0_16] : memref<9x8x128xbf16, #tpu.memory_space<vmem>>, vector<1x8x128xbf16>
    %19 = vector.shape_cast %18 : vector<1x8x128xbf16> to vector<8x128xbf16>
    %cst_17 = arith.constant dense<0.000000e+00> : vector<328x128xf32>
    %20 = tpu.matmul %17, %19, %cst_17 {dimension_numbers = #tpu.dot_dimension_numbers<[1], [0], [0], [1], [0, 0, 1, 1], [], []>} : vector<328x8xbf16>, vector<8x128xbf16>, vector<328x128xf32> -> vector<328x128xf32>
    %21 = arith.addf %14, %20 : vector<328x128xf32>
    %c0_18 = arith.constant 0 : index
    %c18 = arith.constant 18 : index
    %c0_19 = arith.constant 0 : index
    %22 = vector.load %arg1[%c0_18, %c18, %c0_19] : memref<1x368x8xf32, #tpu.memory_space<vmem>>, vector<1x328x8xf32>
    %23 = vector.shape_cast %22 : vector<1x328x8xf32> to vector<328x8xf32>
    %24 = arith.truncf %23 : vector<328x8xf32> to vector<328x8xbf16>
    %c3 = arith.constant 3 : index
    %c0_20 = arith.constant 0 : index
    %c0_21 = arith.constant 0 : index
    %25 = vector.load %arg2[%c3, %c0_20, %c0_21] : memref<9x8x128xbf16, #tpu.memory_space<vmem>>, vector<1x8x128xbf16>
    %26 = vector.shape_cast %25 : vector<1x8x128xbf16> to vector<8x128xbf16>
    %cst_22 = arith.constant dense<0.000000e+00> : vector<328x128xf32>
    %27 = tpu.matmul %24, %26, %cst_22 {dimension_numbers = #tpu.dot_dimension_numbers<[1], [0], [0], [1], [0, 0, 1, 1], [], []>} : vector<328x8xbf16>, vector<8x128xbf16>, vector<328x128xf32> -> vector<328x128xf32>
    %28 = arith.addf %21, %27 : vector<328x128xf32>
    %c0_23 = arith.constant 0 : index
    %c19 = arith.constant 19 : index
    %c0_24 = arith.constant 0 : index
    %29 = vector.load %arg1[%c0_23, %c19, %c0_24] : memref<1x368x8xf32, #tpu.memory_space<vmem>>, vector<1x328x8xf32>
    %30 = vector.shape_cast %29 : vector<1x328x8xf32> to vector<328x8xf32>
    %31 = arith.truncf %30 : vector<328x8xf32> to vector<328x8xbf16>
    %c4 = arith.constant 4 : index
    %c0_25 = arith.constant 0 : index
    %c0_26 = arith.constant 0 : index
    %32 = vector.load %arg2[%c4, %c0_25, %c0_26] : memref<9x8x128xbf16, #tpu.memory_space<vmem>>, vector<1x8x128xbf16>
    %33 = vector.shape_cast %32 : vector<1x8x128xbf16> to vector<8x128xbf16>
    %cst_27 = arith.constant dense<0.000000e+00> : vector<328x128xf32>
    %34 = tpu.matmul %31, %33, %cst_27 {dimension_numbers = #tpu.dot_dimension_numbers<[1], [0], [0], [1], [0, 0, 1, 1], [], []>} : vector<328x8xbf16>, vector<8x128xbf16>, vector<328x128xf32> -> vector<328x128xf32>
    %35 = arith.addf %28, %34 : vector<328x128xf32>
    %c0_28 = arith.constant 0 : index
    %c20 = arith.constant 20 : index
    %c0_29 = arith.constant 0 : index
    %36 = vector.load %arg1[%c0_28, %c20, %c0_29] : memref<1x368x8xf32, #tpu.memory_space<vmem>>, vector<1x328x8xf32>
    %37 = vector.shape_cast %36 : vector<1x328x8xf32> to vector<328x8xf32>
    %38 = arith.truncf %37 : vector<328x8xf32> to vector<328x8xbf16>
    %c5 = arith.constant 5 : index
    %c0_30 = arith.constant 0 : index
    %c0_31 = arith.constant 0 : index
    %39 = vector.load %arg2[%c5, %c0_30, %c0_31] : memref<9x8x128xbf16, #tpu.memory_space<vmem>>, vector<1x8x128xbf16>
    %40 = vector.shape_cast %39 : vector<1x8x128xbf16> to vector<8x128xbf16>
    %cst_32 = arith.constant dense<0.000000e+00> : vector<328x128xf32>
    %41 = tpu.matmul %38, %40, %cst_32 {dimension_numbers = #tpu.dot_dimension_numbers<[1], [0], [0], [1], [0, 0, 1, 1], [], []>} : vector<328x8xbf16>, vector<8x128xbf16>, vector<328x128xf32> -> vector<328x128xf32>
    %42 = arith.addf %35, %41 : vector<328x128xf32>
    %c0_33 = arith.constant 0 : index
    %c36 = arith.constant 36 : index
    %c0_34 = arith.constant 0 : index
    %43 = vector.load %arg1[%c0_33, %c36, %c0_34] : memref<1x368x8xf32, #tpu.memory_space<vmem>>, vector<1x328x8xf32>
    %44 = vector.shape_cast %43 : vector<1x328x8xf32> to vector<328x8xf32>
    %45 = arith.truncf %44 : vector<328x8xf32> to vector<328x8xbf16>
    %c6 = arith.constant 6 : index
    %c0_35 = arith.constant 0 : index
    %c0_36 = arith.constant 0 : index
    %46 = vector.load %arg2[%c6, %c0_35, %c0_36] : memref<9x8x128xbf16, #tpu.memory_space<vmem>>, vector<1x8x128xbf16>
    %47 = vector.shape_cast %46 : vector<1x8x128xbf16> to vector<8x128xbf16>
    %cst_37 = arith.constant dense<0.000000e+00> : vector<328x128xf32>
    %48 = tpu.matmul %45, %47, %cst_37 {dimension_numbers = #tpu.dot_dimension_numbers<[1], [0], [0], [1], [0, 0, 1, 1], [], []>} : vector<328x8xbf16>, vector<8x128xbf16>, vector<328x128xf32> -> vector<328x128xf32>
    %49 = arith.addf %42, %48 : vector<328x128xf32>
    %c0_38 = arith.constant 0 : index
    %c37 = arith.constant 37 : index
    %c0_39 = arith.constant 0 : index
    %50 = vector.load %arg1[%c0_38, %c37, %c0_39] : memref<1x368x8xf32, #tpu.memory_space<vmem>>, vector<1x328x8xf32>
    %51 = vector.shape_cast %50 : vector<1x328x8xf32> to vector<328x8xf32>
    %52 = arith.truncf %51 : vector<328x8xf32> to vector<328x8xbf16>
    %c7 = arith.constant 7 : index
    %c0_40 = arith.constant 0 : index
    %c0_41 = arith.constant 0 : index
    %53 = vector.load %arg2[%c7, %c0_40, %c0_41] : memref<9x8x128xbf16, #tpu.memory_space<vmem>>, vector<1x8x128xbf16>
    %54 = vector.shape_cast %53 : vector<1x8x128xbf16> to vector<8x128xbf16>
    %cst_42 = arith.constant dense<0.000000e+00> : vector<328x128xf32>
    %55 = tpu.matmul %52, %54, %cst_42 {dimension_numbers = #tpu.dot_dimension_numbers<[1], [0], [0], [1], [0, 0, 1, 1], [], []>} : vector<328x8xbf16>, vector<8x128xbf16>, vector<328x128xf32> -> vector<328x128xf32>
    %56 = arith.addf %49, %55 : vector<328x128xf32>
    %c0_43 = arith.constant 0 : index
    %c38 = arith.constant 38 : index
    %c0_44 = arith.constant 0 : index
    %57 = vector.load %arg1[%c0_43, %c38, %c0_44] : memref<1x368x8xf32, #tpu.memory_space<vmem>>, vector<1x328x8xf32>
    %58 = vector.shape_cast %57 : vector<1x328x8xf32> to vector<328x8xf32>
    %59 = arith.truncf %58 : vector<328x8xf32> to vector<328x8xbf16>
    %c8 = arith.constant 8 : index
    %c0_45 = arith.constant 0 : index
    %c0_46 = arith.constant 0 : index
    %60 = vector.load %arg2[%c8, %c0_45, %c0_46] : memref<9x8x128xbf16, #tpu.memory_space<vmem>>, vector<1x8x128xbf16>
    %61 = vector.shape_cast %60 : vector<1x8x128xbf16> to vector<8x128xbf16>
    %cst_47 = arith.constant dense<0.000000e+00> : vector<328x128xf32>
    %62 = tpu.matmul %59, %61, %cst_47 {dimension_numbers = #tpu.dot_dimension_numbers<[1], [0], [0], [1], [0, 0, 1, 1], [], []>} : vector<328x8xbf16>, vector<8x128xbf16>, vector<328x128xf32> -> vector<328x128xf32>
    %63 = arith.addf %56, %62 : vector<328x128xf32>
    %c0_48 = arith.constant 0 : index
    %c0_49 = arith.constant 0 : index
    %64 = vector.load %arg3[%c0_48, %c0_49] : memref<1x128xf32, #tpu.memory_space<vmem>>, vector<1x128xf32>
    %65 = vector.broadcast %64 : vector<1x128xf32> to vector<328x128xf32>
    %66 = arith.addf %63, %65 : vector<328x128xf32>
    %cst_50 = arith.constant 0.000000e+00 : f32
    %67 = vector.broadcast %cst_50 : f32 to vector<328x128xf32>
    %68 = arith.cmpf ogt, %66, %67 : vector<328x128xf32>
    %cst_51 = arith.constant 0.000000e+00 : f32
    %69 = vector.broadcast %cst_51 : f32 to vector<328x128xf32>
    %70 = arith.minimumf %66, %69 : vector<328x128xf32>
    %71 = math.exp %70 : vector<328x128xf32>
    %cst_52 = arith.constant 1.000000e+00 : f32
    %72 = vector.broadcast %cst_52 : f32 to vector<328x128xf32>
    %73 = arith.subf %71, %72 : vector<328x128xf32>
    %74 = arith.select %68, %66, %73 : vector<328x128xi1>, vector<328x128xf32>
    %c0_53 = arith.constant 0 : index
    %c0_54 = arith.constant 0 : index
    %75 = vector.load %arg4[%c0_53, %c0_54] : memref<328x1xf32, #tpu.memory_space<vmem>>, vector<328x1xf32>
    %76 = vector.broadcast %75 : vector<328x1xf32> to vector<328x128xf32>
    %77 = arith.mulf %74, %76 : vector<328x128xf32>
    %cst_55 = arith.constant dense<0.000000e+00> : vector<128xf32>
    %78 = vector.multi_reduction <add>, %77, %cst_55 [0] : vector<328x128xf32> to vector<128xf32>
    %79 = vector.shape_cast %78 : vector<128xf32> to vector<1x128xf32>
    %c0_56 = arith.constant 0 : index
    %c0_57 = arith.constant 0 : index
    %80 = vector.load %arg5[%c0_56, %c0_57] : memref<128x128xf32, #tpu.memory_space<vmem>>, vector<128x128xf32>
    %cst_58 = arith.constant dense<0.000000e+00> : vector<1x128xf32>
    %81 = tpu.matmul %79, %80, %cst_58 {dimension_numbers = #tpu.dot_dimension_numbers<[1], [0], [0], [1], [0, 0, 1, 1], [], []>} : vector<1x128xf32>, vector<128x128xf32>, vector<1x128xf32> -> vector<1x128xf32>
    %c0_59 = arith.constant 0 : index
    %c0_60 = arith.constant 0 : index
    %82 = vector.load %arg6[%c0_59, %c0_60] : memref<1x128xf32, #tpu.memory_space<vmem>>, vector<1x128xf32>
    %83 = arith.addf %81, %82 : vector<1x128xf32>
    %cst_61 = arith.constant 2.000000e+01 : f32
    %84 = vector.broadcast %cst_61 : f32 to vector<1x128xf32>
    %85 = arith.cmpf ogt, %83, %84 : vector<1x128xf32>
    %cst_62 = arith.constant 2.000000e+01 : f32
    %86 = vector.broadcast %cst_62 : f32 to vector<1x128xf32>
    %87 = arith.minimumf %83, %86 : vector<1x128xf32>
    %88 = math.exp %87 : vector<1x128xf32>
    %89 = math.log1p %88 : vector<1x128xf32>
    %90 = arith.select %85, %83, %89 : vector<1x128xi1>, vector<1x128xf32>
    %c0_63 = arith.constant 0 : index
    %c0_64 = arith.constant 0 : index
    %c0_65 = arith.constant 0 : index
    %91 = vector.load %arg7[%c0_63, %c0_64, %c0_65] : memref<1x1x128xf32, #tpu.memory_space<vmem>>, vector<1x1x128xf32>
    %92 = vector.shape_cast %91 : vector<1x1x128xf32> to vector<1x128xf32>
    %93 = vector.shape_cast %90 : vector<1x128xf32> to vector<1x1x128xf32>
    tpu.vector_store %arg7[%c0_63, %c0_64, %c0_65], %93 {strides = array<i32>} : memref<1x1x128xf32, #tpu.memory_space<vmem>>, vector<1x1x128xf32>,
    return
  }
  func.func @transform_0(%arg0: i32) -> (i32, i32, i32) {
    %c0_i32 = arith.constant 0 : i32
    %c0_i32_0 = arith.constant 0 : i32
    %c0_i32_1 = arith.constant 0 : i32
    return %arg0, %c0_i32, %c0_i32_0 : i32, i32, i32
  }
  func.func @transform_1(%arg0: i32) -> (i32, i32, i32) {
    %c0_i32 = arith.constant 0 : i32
    %c0_i32_0 = arith.constant 0 : i32
    %c0_i32_1 = arith.constant 0 : i32
    %c0_i32_2 = arith.constant 0 : i32
    return %c0_i32, %c0_i32_0, %c0_i32_1 : i32, i32, i32
  }
  func.func @transform_2(%arg0: i32) -> (i32, i32) {
    %c0_i32 = arith.constant 0 : i32
    %c0_i32_0 = arith.constant 0 : i32
    %c0_i32_1 = arith.constant 0 : i32
    return %c0_i32, %c0_i32_0 : i32, i32
  }
  func.func @transform_3(%arg0: i32) -> (i32, i32) {
    %c0_i32 = arith.constant 0 : i32
    %c0_i32_0 = arith.constant 0 : i32
    %c0_i32_1 = arith.constant 0 : i32
    return %c0_i32, %c0_i32_0 : i32, i32
  }
  func.func @transform_4(%arg0: i32) -> (i32, i32) {
    %c0_i32 = arith.constant 0 : i32
    %c0_i32_0 = arith.constant 0 : i32
    %c0_i32_1 = arith.constant 0 : i32
    return %c0_i32, %c0_i32_0 : i32, i32
  }
  func.func @transform_5(%arg0: i32) -> (i32, i32) {
    %c0_i32 = arith.constant 0 : i32
    %c0_i32_0 = arith.constant 0 : i32
    %c0_i32_1 = arith.constant 0 : i32
    return %c0_i32, %c0_i32_0 : i32, i32
  }
  func.func @transform_6(%arg0: i32) -> (i32, i32, i32) {
    %c0_i32 = arith.constant 0 : i32
    %c0_i32_0 = arith.constant 0 : i32
    %c0_i32_1 = arith.constant 0 : i32
    return %arg0, %c0_i32, %c0_i32_0 : i32, i32, i32
  }
}

</mosaic_0001>

<bundles_post_ra>
// kernel: encoder_forward.1
= control target key start
LH: loop header
LB: loop body
LE: loop exit
PB: predicated region body
PF: predicated region fallthrough
CT: control target
= control target key end

     0   :  { %11 = vsyncpa [#allocation3], 0  ;;  %s5352_s0 = inlined_call_operand.vmem [shape: f32[2,368,8], index: 0, kind: input, shape index: {}]   ;;  %s5353_s1 = inlined_call_operand.vmem [shape: bf16[9,8,128], index: 1, kind: input, shape index: {}]   ;;  %s5354_s2 = inlined_call_operand.vmem [shape: f32[1,128], index: 2, kind: input, shape index: {}]   ;;  %s5355_s3 = inlined_call_operand.vmem [shape: f32[328,1], index: 3, kind: input, shape index: {}]   ;;  %s5356_s4 = inlined_call_operand.vmem [shape: f32[128,128], index: 4, kind: input, shape index: {}]   ;;  %s5357_s5 = inlined_call_operand.vmem [shape: f32[1,128], index: 5, kind: input, shape index: {}]   ;;  %s5358_s6 = inlined_call_operand.hbm [shape: f32[2,1,128], index: 6, kind: output, shape index: {}]  }
   0x1   :  { %13 = vsyncpa [#allocation3 + $0x1], 0  ;;  %s3949_s21 = smov 0   ;;  %s3951_s22 = smov 0  }
   0x2   :  { %s3953_s23 = smov 0   ;;  %s3955_s24 = smov 0  }
   0x3 LB: > { %s3970_s25 = sadd.s32 4294967295, %s3911_s24   ;;  %s3469_s26 = sadd.s32 4294967294, %s3911_s24   ;;  %s3911_s24 = sphi %s3955_s24, %s5374_s24   ;;  %s3907_s23 = sphi %s3953_s23, %s5373_s23   ;;  %s3903_s22 = sphi %s3951_s22, %s5372_s22   ;;  %s3899_s21 = sphi %s3949_s21, %s5371_s21  }
   0x4   : > { %s3974_s27 = sadd.s32 1, %s3911_s24   ;;  %s157_s28 = sadd.s32 1, %s3907_s23 }
   0x5   : > { %s154_s29 = ssub.s32 %s3911_s24, %s3974_s27  ;;  %p167_p0 = scmp.ne.s32.totalorder %s3907_s23, %s3903_s22 }
   0x6   : > { %p155_p1 = scmp.eq.s32.totalorder %s154_s29, 0  ;;  %p168_p2 = scmp.eq.s32.totalorder %s3970_s25, 1 }
   0x7   : > { %p173_p3 = scmp.ne.s32.totalorder %s3903_s22, %s3899_s21  ;;  %p174_p4 = scmp.eq.s32.totalorder %s3469_s26, 1 }
   0x8   : > { %s3985_s30 = scalar_select %p155_p1, %s3907_s23, %s157_s28  }
   0x9   : > { %p3987_p5 = por %p168_p2, %p167_p0  ;;  %p3991_p6 = por %p174_p4, %p173_p3 }
   0xa   : > { %p3472_p7 = scmp.ge.s32.totalorder %s3911_s24, 1  ;;  %p215_p8 = scmp.lt.s32.totalorder %s3911_s24, 3 }
   0xc   : > { %p216_p9 = pnand %p3472_p7, %p215_p8 }
   0xe   : > { %219 = sbr.rel (%p216_p9) target bundleno = 1107 (0x453), region = 44 }
  0x13   : > { %v3474_v0 = vld [vmem:[%s5353_s1 + $0x4] sm:$0xf]  ;;  %vm441_vm0 = vcmask 1043456   ;;  %p244_p10 = scmp.lt.s32.totalorder %s3970_s25, 1  ;;  %v3517_v2 = vld [vmem:[%s5353_s1 + $0x8] sm:$0xf]  ;;  %s3410_s12 = scalar_lea.hbm %s5358_s6, %s3970_s25 }
  0x14   : > { %v443_v1 = vsel %vm441_vm0, %v3474_v0, 0  ;;  %v3539_v3 = vld [vmem:[%s5353_s1 + $0xc] sm:$0xf]  ;;  %v865_v4 = vsel %vm441_vm0, %v3517_v2, 0  ;;  %v3561_v6 = vld [vmem:[%s5353_s1 + $0x10] sm:$0xf] }
  0x15   : > { %3714 = vmatpush.bf16.msra.mxu1 %v443_v1  ;;  %3715 = vmatpush.bf16.msra.mxu2 %v443_v1  ;;  %s245_s15 = scalar_select %p244_p10, %s3970_s25, 1  ;;  %v1149_v5 = vsel %vm441_vm0, %v3539_v3, 0  ;;  %v1433_v7 = vsel %vm441_vm0, %v3561_v6, 0  ;;  %vm377_vm1 = vcmask 64512   ;;  %v312_v20 = vld [vmem:[%s5353_s1] sm:$0xf] }
  0x16   : > { %3716 = vmatpush.bf16.msra.mxu3 %v443_v1  ;;  %452 = vmatpush.bf16.msra.mxu0 %v443_v1  ;;  %v622_v21 = vsel %vm441_vm0, %v312_v20, 0  ;;  %v3605_v6 = vld [vmem:[%s5353_s1 + $0x18] sm:$0xf]  ;;  %s242_s9 = sand.u32 1, %s3903_s22   ;;  %s3869_s20 = scalar_lea.hbm %s5358_s6, 2 }
  0x17   : > { %s3717_s18 = smul.u32 368, %s245_s15  ;;  %s243_s13 = scalar_lea.vmem [#allocation2], %s242_s9 }
  0x18   : > { %s3412_s14 = sshll.u32 %s243_s13, 4  ;;  %s3414_s15 = sshll.u32 %s3410_s12, 4  ;;  %s3413_s14 = int_to_ptr.vmem [resolvable:$true] %s3412_s14  ;;  %s3415_s15 = int_to_ptr.hbm [resolvable:$true] %s3414_s15 }
  0x19   : > { %874 = vmatpush.bf16.msrb.mxu2 %v865_v4  ;;  %s4018_s26 = scalar_lea.vmem %s5352_s0, %s3717_s18  ;;  %631 = vmatpush.bf16.msrb.mxu1 %v622_v21  ;;  %s3402_s16 = scalar_lea.sflag [#allocation3], %s242_s9 }
  0x1a   : > { %1158 = vmatpush.bf16.msrb.mxu3 %v1149_v5  ;;  %1442 = vmatpush.bf16.msrb.mxu0 %v1433_v7  ;;  %v325_v8 = vld [vmem:[%s4018_s26 + $0x61] sm:$0xff]  ;;  %v326_v9 = vld [vmem:[%s4018_s26 + $0x69] sm:$0xff]  ;;  %v331_v10 = vld [vmem:[%s4018_s26 + $0x91] sm:$0xff]  ;;  %v2001_v7 = vsel %vm441_vm0, %v3605_v6, 0  ;;  %s3863_s17 = sshra.s32 %s3415_s15, 4  ;;  %s3864_s17 = int_to_ptr.hbm [resolvable:$true] %s3863_s17 }
  0x1b   : > { %v360_v11 = vpack.c.bf16 %v326_v9, %v325_v8  ;;  %v332_v12 = vld [vmem:[%s4018_s26 + $0x99] sm:$0xff]  ;;  %v343_v13 = vld [vmem:[%s4018_s26 + $0xf1] sm:$0xff]  ;;  %v313_v17 = vld [vmem:[%s4018_s26 + $0x1] sm:$0xff]  ;;  %s3865_s18 = scalar_lea.hbm %s3864_s17, 1  ;;  %p3870_p0 = scmp.lt.s32.totalorder %s3864_s17, %s5358_s6 }
  0x1c   : > { %v344_v14 = vld [vmem:[%s4018_s26 + $0xf9] sm:$0xff]  ;;  %v363_v15 = vpack.c.bf16 %v332_v12, %v331_v10  ;;  %v314_v18 = vld [vmem:[%s4018_s26 + $0x9] sm:$0xff]  ;;  %v327_v22 = vld [vmem:[%s4018_s26 + $0x71] sm:$0xff]  ;;  %p3866_p11 = scmp.ne.s32.totalorder %s3864_s17, %s3865_s18  ;;  %p3871_p1 = scmp.lt.s32.totalorder %s3869_s20, %s3865_s18 }
  0x1d   : > { %v369_v16 = vpack.c.bf16 %v344_v14, %v343_v13  ;;  %3481 = vmatmul.msk.bf16.vlgmr.msra.gmra.mxu1 %vm377_vm1, %v360_v11  ;;  %v354_v19 = vpack.c.bf16 %v314_v18, %v313_v17  ;;  %v328_v23 = vld [vmem:[%s4018_s26 + $0x79] sm:$0xff]  ;;  %v333_v24 = vld [vmem:[%s4018_s26 + $0xa1] sm:$0xff]  ;;  %v334_v25 = vld [vmem:[%s4018_s26 + $0xa9] sm:$0xff] }
  0x1e   : > { %3484 = vmatmul.msk.bf16.vlgmr.msra.gmra.mxu2 %vm377_vm1, %v363_v15  ;;  %v345_v26 = vld [vmem:[%s4018_s26 + $0x101] sm:$0xff]  ;;  %v346_v27 = vld [vmem:[%s4018_s26 + $0x109] sm:$0xff]  ;;  %v315_v28 = vld [vmem:[%s4018_s26 + $0x11] sm:$0xff]  ;;  %v361_v30 = vpack.c.bf16 %v328_v23, %v327_v22  ;;  %v364_v31 = vpack.c.bf16 %v334_v25, %v333_v24  ;;  %p3867_p12 = pnand %p3866_p11, %p3987_p5  ;;  %p3872_p2 = por %p3871_p1, %p3870_p0 }
  0x1f   : > { %3490 = vmatmul.msk.bf16.vlgmr.msra.gmra.mxu3 %vm377_vm1, %v369_v16  ;;  %3475 = vmatmul.msk.bf16.vlgmr.msra.gmra.mxu0 %vm377_vm1, %v354_v19  ;;  %v316_v29 = vld [vmem:[%s4018_s26 + $0x19] sm:$0xff]  ;;  %v370_v32 = vpack.c.bf16 %v346_v27, %v345_v26  ;;  %v329_v34 = vld [vmem:[%s4018_s26 + $0x81] sm:$0xff]  ;;  %v330_v35 = vld [vmem:[%s4018_s26 + $0x89] sm:$0xff] }
  0x20   : > { %v355_v33 = vpack.c.bf16 %v316_v29, %v315_v28  ;;  %v335_v36 = vld [vmem:[%s4018_s26 + $0xb1] sm:$0xff]  ;;  %v336_v37 = vld [vmem:[%s4018_s26 + $0xb9] sm:$0xff]  ;;  %v317_v40 = vld [vmem:[%s4018_s26 + $0x21] sm:$0xff]  ;;  %v362_v42 = vpack.c.bf16 %v330_v35, %v329_v34  ;;  %2010 = vmatpush.bf16.msra.mxu2 %v2001_v7  ;;  %p3868_p13 = pneg %p3867_p12 }
  0x21   : > { %v347_v38 = vld [vmem:[%s4018_s26 + $0x111] sm:$0xff]  ;;  %v348_v39 = vld [vmem:[%s4018_s26 + $0x119] sm:$0xff]  ;;  %v318_v41 = vld [vmem:[%s4018_s26 + $0x29] sm:$0xff]  ;;  %v365_v43 = vpack.c.bf16 %v336_v37, %v335_v36 }
  0x22   : > { %v371_v44 = vpack.c.bf16 %v348_v39, %v347_v38  ;;  %v356_v45 = vpack.c.bf16 %v318_v41, %v317_v40  ;;  %v337_v46 = vld [vmem:[%s4018_s26 + $0xc1] sm:$0xff]  ;;  %v338_v49 = vld [vmem:[%s4018_s26 + $0xc9] sm:$0xff]  ;;  %v319_v52 = vld [vmem:[%s4018_s26 + $0x31] sm:$0xff]  ;;  %p3873_p3 = pnand %p3872_p2, %p3868_p13 }
  0x23   : > { %v250_v47 = vld [vmem:[%s4018_s26] sm:$0xff]  ;;  %v251_v48 = vld [vmem:[%s4018_s26 + $0x8] sm:$0xff]  ;;  %v366_v55 = vpack.c.bf16 %v338_v49, %v337_v46  ;;  %v339_v58 = vld [vmem:[%s4018_s26 + $0xd1] sm:$0xff] }
  0x24   : > { %v349_v50 = vld [vmem:[%s4018_s26 + $0x121] sm:$0xff]  ;;  %v350_v51 = vld [vmem:[%s4018_s26 + $0x129] sm:$0xff]  ;;  %v320_v53 = vld [vmem:[%s4018_s26 + $0x39] sm:$0xff]  ;;  %v291_v54 = vpack.c.bf16 %v251_v48, %v250_v47 }
  0x25   : > { %v372_v56 = vpack.c.bf16 %v350_v51, %v349_v50  ;;  %v357_v57 = vpack.c.bf16 %v320_v53, %v319_v52  ;;  %v252_v59 = vld [vmem:[%s4018_s26 + $0x10] sm:$0xff]  ;;  %v253_v60 = vld [vmem:[%s4018_s26 + $0x18] sm:$0xff]  ;;  %v321_v0 = vld [vmem:[%s4018_s26 + $0x41] sm:$0xff] }
  0x26   : > { %v340_v61 = vld [vmem:[%s4018_s26 + $0xd9] sm:$0xff]  ;;  %v351_v62 = vld [vmem:[%s4018_s26 + $0x131] sm:$0xff]  ;;  %v322_v1 = vld [vmem:[%s4018_s26 + $0x49] sm:$0xff]  ;;  %v292_v2 = vpack.c.bf16 %v253_v60, %v252_v59 }
  0x27   : > { %v352_v63 = vld [vmem:[%s4018_s26 + $0x139] sm:$0xff]  ;;  %v367_v3 = vpack.c.bf16 %v340_v61, %v339_v58  ;;  %v358_v5 = vpack.c.bf16 %v322_v1, %v321_v0  ;;  %v3583_v9 = vld [vmem:[%s5353_s1 + $0x14] sm:$0xf]  ;;  %v255_v15 = vld [vmem:[%s4018_s26 + $0x28] sm:$0xff] }
  0x28   : > { %v373_v4 = vpack.c.bf16 %v352_v63, %v351_v62  ;;  %v3627_v8 = vld [vmem:[%s5353_s1 + $0x1c] sm:$0xf]  ;;  %v1717_v11 = vsel %vm441_vm0, %v3583_v9, 0  ;;  %v3649_v12 = vld [vmem:[%s5353_s1 + $0x20] sm:$0xf]  ;;  %v342_v17 = vld [vmem:[%s4018_s26 + $0xe9] sm:$0xff] }
  0x29   : > { %v2285_v10 = vsel %vm441_vm0, %v3627_v8, 0  ;;  %1726 = vmatpush.bf16.msra.mxu1 %v1717_v11  ;;  %v2569_v13 = vsel %vm441_vm0, %v3649_v12, 0  ;;  %v254_v14 = vld [vmem:[%s4018_s26 + $0x20] sm:$0xff]  ;;  %v323_v19 = vld [vmem:[%s4018_s26 + $0x51] sm:$0xff]  ;;  %v259_v38 = vld [vmem:[%s4018_s26 + $0x48] sm:$0xff] }
  0x2a   : > { %2294 = vmatpush.bf16.msra.mxu3 %v2285_v10  ;;  %2578 = vmatpush.bf16.msra.mxu0 %v2569_v13  ;;  %v341_v16 = vld [vmem:[%s4018_s26 + $0xe1] sm:$0xff]  ;;  %v324_v20 = vld [vmem:[%s4018_s26 + $0x59] sm:$0xff]  ;;  %v293_v21 = vpack.c.bf16 %v255_v15, %v254_v14  ;;  %v256_v25 = vld [vmem:[%s4018_s26 + $0x30] sm:$0xff] }
  0x2b   : > { %v353_v18 = vld [vmem:[%s4018_s26 + $0x141] sm:$0xff]  ;;  %v368_v22 = vpack.c.bf16 %v342_v17, %v341_v16  ;;  %v359_v24 = vpack.c.bf16 %v324_v20, %v323_v19  ;;  %v257_v26 = vld [vmem:[%s4018_s26 + $0x38] sm:$0xff]  ;;  %v738_v28 = vld [vmem:[%s4018_s26 + $0xa] sm:$0xff] }
  0x2c   : > { %v374_v23 = vpack.c.bf16 %v353_v18, %v353_v18  ;;  %v737_v27 = vld [vmem:[%s4018_s26 + $0x2] sm:$0xff]  ;;  %v1021_v29 = vld [vmem:[%s4018_s26 + $0x12] sm:$0xff]  ;;  %v1024_v40 = vld [vmem:[%s4018_s26 + $0x2a] sm:$0xff] }
  0x2d   : > { %3482 = vmatmul.msk.bf16.gmra.mxu1 %vm377_vm1, %v361_v30  ;;  %v1022_v30 = vld [vmem:[%s4018_s26 + $0x1a] sm:$0xff]  ;;  %v778_v34 = vpack.c.bf16 %v738_v28, %v737_v27  ;;  %v1023_v39 = vld [vmem:[%s4018_s26 + $0x22] sm:$0xff]  ;;  %v260_v46 = vld [vmem:[%s4018_s26 + $0x50] sm:$0xff] }
  0x2e   : > { %3485 = vmatmul.msk.bf16.gmra.mxu2 %vm377_vm1, %v364_v31  ;;  %v1305_v31 = vld [vmem:[%s4018_s26 + $0x13] sm:$0xff]  ;;  %v1062_v35 = vpack.c.bf16 %v1022_v30, %v1021_v29  ;;  %v258_v37 = vld [vmem:[%s4018_s26 + $0x40] sm:$0xff]  ;;  %v263_v62 = vld [vmem:[%s4018_s26 + $0x68] sm:$0xff] }
  0x2f   : > { %3491 = vmatmul.msk.bf16.gmra.mxu3 %vm377_vm1, %v370_v32  ;;  %3476 = vmatmul.msk.bf16.gmra.mxu0 %vm377_vm1, %v355_v33  ;;  %v1306_v32 = vld [vmem:[%s4018_s26 + $0x1b] sm:$0xff]  ;;  %v294_v33 = vpack.c.bf16 %v257_v26, %v256_v25  ;;  %v1307_v41 = vld [vmem:[%s4018_s26 + $0x23] sm:$0xff]  ;;  %v1025_v48 = vld [vmem:[%s4018_s26 + $0x32] sm:$0xff] }
  0x30   : > { %v1346_v36 = vpack.c.bf16 %v1306_v32, %v1305_v31  ;;  %v261_v47 = vld [vmem:[%s4018_s26 + $0x58] sm:$0xff]  ;;  %v262_v61 = vld [vmem:[%s4018_s26 + $0x60] sm:$0xff]  ;;  %v1028_v0 = vld [vmem:[%s4018_s26 + $0x4a] sm:$0xff] }
  0x31   : > { %v1026_v49 = vld [vmem:[%s4018_s26 + $0x3a] sm:$0xff]  ;;  %v296_v52 = vpack.c.bf16 %v261_v47, %v260_v46  ;;  %v1027_v63 = vld [vmem:[%s4018_s26 + $0x42] sm:$0xff]  ;;  %v264_v14 = vld [vmem:[%s4018_s26 + $0x70] sm:$0xff] }
  0x32   : > { %v1309_v50 = vld [vmem:[%s4018_s26 + $0x33] sm:$0xff]  ;;  %v1310_v51 = vld [vmem:[%s4018_s26 + $0x3b] sm:$0xff]  ;;  %v1311_v1 = vld [vmem:[%s4018_s26 + $0x43] sm:$0xff]  ;;  %v1065_v7 = vpack.c.bf16 %v1028_v0, %v1027_v63 }
  0x33   : > { %v265_v15 = vld [vmem:[%s4018_s26 + $0x78] sm:$0xff]  ;;  %v266_v31 = vld [vmem:[%s4018_s26 + $0x80] sm:$0xff]  ;;  %v267_v32 = vld [vmem:[%s4018_s26 + $0x88] sm:$0xff] }
  0x34   : > { %v1029_v16 = vld [vmem:[%s4018_s26 + $0x52] sm:$0xff]  ;;  %v1030_v17 = vld [vmem:[%s4018_s26 + $0x5a] sm:$0xff] }
  0x35   : > { %v1313_v18 = vld [vmem:[%s4018_s26 + $0x53] sm:$0xff]  ;;  %v1314_v19 = vld [vmem:[%s4018_s26 + $0x5b] sm:$0xff] }
  0x36   : > { %v1350_v25 = vpack.c.bf16 %v1314_v19, %v1313_v18  ;;  %v1035_v18 = vld [vmem:[%s4018_s26 + $0x82] sm:$0xff]  ;;  %v1036_v19 = vld [vmem:[%s4018_s26 + $0x8a] sm:$0xff] }
  0x3d   : > { %3483 = vmatmul.msk.bf16.gmra.mxu1 %vm377_vm1, %v362_v42  ;;  %v1308_v42 = vld [vmem:[%s4018_s26 + $0x2b] sm:$0xff] }
  0x3e   : > { %3486 = vmatmul.msk.bf16.gmra.mxu2 %vm377_vm1, %v365_v43  ;;  %v295_v43 = vpack.c.bf16 %v259_v38, %v258_v37 }
  0x3f   : > { %3492 = vmatmul.msk.bf16.gmra.mxu3 %vm377_vm1, %v371_v44  ;;  %3477 = vmatmul.msk.bf16.gmra.mxu0 %vm377_vm1, %v356_v45  ;;  %v1063_v44 = vpack.c.bf16 %v1024_v40, %v1023_v39  ;;  %v1347_v45 = vpack.c.bf16 %v1308_v42, %v1307_v41  ;;  %v299_v39 = vpack.c.bf16 %v267_v32, %v266_v31 }
  0x4d   : > { %3496 = vmatmul.msk.bf16.vlgmr.msrb.gmra.mxu1 %vm377_vm1, %v291_v54  ;;  %v1064_v54 = vpack.c.bf16 %v1026_v49, %v1025_v48 }
  0x4e   : > { %3487 = vmatmul.msk.bf16.gmra.mxu2 %vm377_vm1, %v366_v55  ;;  %v1348_v55 = vpack.c.bf16 %v1310_v51, %v1309_v50  ;;  %v268_v50 = vld [vmem:[%s4018_s26 + $0x90] sm:$0xff]  ;;  %v269_v51 = vld [vmem:[%s4018_s26 + $0x98] sm:$0xff] }
  0x4f   : > { %3493 = vmatmul.msk.bf16.gmra.mxu3 %vm377_vm1, %v372_v56  ;;  %3478 = vmatmul.msk.bf16.gmra.mxu0 %vm377_vm1, %v357_v57  ;;  %v300_v63 = vpack.c.bf16 %v269_v51, %v268_v50  ;;  %v273_v50 = vld [vmem:[%s4018_s26 + $0xb8] sm:$0xff] }
  0x50   : > { %v1037_v51 = vld [vmem:[%s4018_s26 + $0x92] sm:$0xff] }
  0x5d   : > { %3497 = vmatmul.msk.bf16.gmra.mxu1 %vm377_vm1, %v292_v2  ;;  %v1312_v2 = vld [vmem:[%s4018_s26 + $0x4b] sm:$0xff] }
  0x5e   : > { %3488 = vmatmul.msk.bf16.gmra.mxu2 %vm377_vm1, %v367_v3  ;;  %v1349_v8 = vpack.c.bf16 %v1312_v2, %v1311_v1 }
  0x5f   : > { %3494 = vmatmul.msk.bf16.gmra.mxu3 %vm377_vm1, %v373_v4  ;;  %3479 = vmatmul.msk.bf16.gmra.mxu0 %vm377_vm1, %v358_v5  ;;  %v297_v5 = vpack.c.bf16 %v263_v62, %v262_v61 }
  0x6d   : > { %3498 = vmatmul.msk.bf16.gmra.mxu1 %vm377_vm1, %v293_v21 }
  0x6e   : > { %3489 = vmatmul.msk.bf16.gmra.mxu2 %vm377_vm1, %v368_v22  ;;  %v298_v22 = vpack.c.bf16 %v265_v15, %v264_v14 }
  0x6f   : > { %3495 = vmatmul.msk.bf16.gmra.mxu3 %vm377_vm1, %v374_v23  ;;  %3480 = vmatmul.msk.bf16.gmra.mxu0 %vm377_vm1, %v359_v24  ;;  %v1066_v24 = vpack.c.bf16 %v1030_v17, %v1029_v16  ;;  %v270_v16 = vld [vmem:[%s4018_s26 + $0xa0] sm:$0xff]  ;;  %v271_v17 = vld [vmem:[%s4018_s26 + $0xa8] sm:$0xff] }
  0x70   : > { %v301_v32 = vpack.c.bf16 %v271_v17, %v270_v16 }
  0x7d   : > { %3499 = vmatmul.msk.bf16.gmra.mxu1 %vm377_vm1, %v294_v33  ;;  %v1031_v33 = vld [vmem:[%s4018_s26 + $0x62] sm:$0xff] }
  0x7e   : > { %3518 = vmatmul.msk.bf16.vlgmr.msrb.gmra.mxu2 %vm377_vm1, %v778_v34  ;;  %v1032_v34 = vld [vmem:[%s4018_s26 + $0x6a] sm:$0xff] }
  0x7f   : > { %3540 = vmatmul.msk.bf16.vlgmr.msrb.gmra.mxu3 %vm377_vm1, %v1062_v35  ;;  %3562 = vmatmul.msk.bf16.vlgmr.msrb.gmra.mxu0 %vm377_vm1, %v1346_v36  ;;  %v1316_v36 = vld [vmem:[%s4018_s26 + $0x6b] sm:$0xff]  ;;  %v1067_v41 = vpack.c.bf16 %v1032_v34, %v1031_v33  ;;  %v1069_v34 = vpack.c.bf16 %v1036_v19, %v1035_v18 }
  0x8d   : > { %3500 = vmatmul.msk.bf16.gmra.mxu1 %vm377_vm1, %v295_v43 }
  0x8e   : > { %3519 = vmatmul.msk.bf16.gmra.mxu2 %vm377_vm1, %v1062_v35  ;;  %v1315_v35 = vld [vmem:[%s4018_s26 + $0x63] sm:$0xff] }
  0x8f   : > { %3541 = vmatmul.msk.bf16.gmra.mxu3 %vm377_vm1, %v1063_v44  ;;  %3563 = vmatmul.msk.bf16.gmra.mxu0 %vm377_vm1, %v1347_v45  ;;  %v1351_v43 = vpack.c.bf16 %v1316_v36, %v1315_v35 }
  0x9a   : > { %v4139_v53 = vpop.f32.mrf.mxu1 }
  0x9c   : > { %v454_v56 = vpop.f32.mrf.mxu0 }
  0x9d   : > { %3501 = vmatmul.msk.bf16.gmra.mxu1 %vm377_vm1, %v296_v52  ;;  %v1033_v52 = vld [vmem:[%s4018_s26 + $0x72] sm:$0xff] }
  0x9e   : > { %3520 = vmatmul.msk.bf16.gmra.mxu2 %vm377_vm1, %v1063_v44 }
  0x9f   : > { %3542 = vmatmul.msk.bf16.gmra.mxu3 %vm377_vm1, %v1064_v54  ;;  %3564 = vmatmul.msk.bf16.gmra.mxu0 %vm377_vm1, %v1348_v55  ;;  %v1317_v55 = vld [vmem:[%s4018_s26 + $0x73] sm:$0xff] }
  0xa1   : > { %v4145_v57 = vpop.f32.mrf.mxu2 }
  0xa2   : > { %v4147_v58 = vpop.f32.mrf.mxu3  ;;  %v4149_v59 = vpop.f32.mrf.mxu1 }
  0xa4   : > { %v4151_v60 = vpop.f32.mrf.mxu0 }
  0xa9   : > { %v4159_v3 = vpop.f32.mrf.mxu2 }
  0xaa   : > { %v4161_v4 = vpop.f32.mrf.mxu3  ;;  %v4163_v6 = vpop.f32.mrf.mxu1 }
  0xac   : > { %v4165_v9 = vpop.f32.mrf.mxu0 }
  0xad   : > { %3502 = vmatmul.msk.bf16.gmra.mxu1 %vm377_vm1, %v297_v5 }
  0xae   : > { %3521 = vmatmul.msk.bf16.gmra.mxu2 %vm377_vm1, %v1064_v54  ;;  %v1034_v54 = vld [vmem:[%s4018_s26 + $0x7a] sm:$0xff] }
  0xaf   : > { %3543 = vmatmul.msk.bf16.gmra.mxu3 %vm377_vm1, %v1065_v7  ;;  %3565 = vmatmul.msk.bf16.gmra.mxu0 %vm377_vm1, %v1349_v8  ;;  %v1068_v1 = vpack.c.bf16 %v1034_v54, %v1033_v52  ;;  %v1038_v52 = vld [vmem:[%s4018_s26 + $0x9a] sm:$0xff] }
  0xb0   : > { %v1321_v54 = vld [vmem:[%s4018_s26 + $0x93] sm:$0xff] }
  0xb1   : > { %v4171_v10 = vpop.f32.mrf.mxu2 }
  0xb2   : > { %v4173_v11 = vpop.f32.mrf.mxu3  ;;  %v4175_v12 = vpop.f32.mrf.mxu1 }
  0xb4   : > { %v4177_v13 = vpop.f32.mrf.mxu0 }
  0xb9   : > { %v4185_v20 = vpop.f32.mrf.mxu2 }
  0xba   : > { %v4187_v21 = vpop.f32.mrf.mxu3  ;;  %v4189_v23 = vpop.f32.mrf.mxu1 }
  0xbc   : > { %v4191_v26 = vpop.f32.mrf.mxu0 }
  0xbd   : > { %3503 = vmatmul.msk.bf16.gmra.mxu1 %vm377_vm1, %v298_v22  ;;  %v1319_v22 = vld [vmem:[%s4018_s26 + $0x83] sm:$0xff] }
  0xbe   : > { %3522 = vmatmul.msk.bf16.gmra.mxu2 %vm377_vm1, %v1065_v7 }
  0xbf   : > { %3544 = vmatmul.msk.bf16.gmra.mxu3 %vm377_vm1, %v1066_v24  ;;  %3566 = vmatmul.msk.bf16.gmra.mxu0 %vm377_vm1, %v1350_v25 }
  0xc1   : > { %v4197_v27 = vpop.f32.mrf.mxu2 }
  0xc2   : > { %v4199_v28 = vpop.f32.mrf.mxu3  ;;  %v4201_v29 = vpop.f32.mrf.mxu1 }
  0xc4   : > { %v4203_v30 = vpop.f32.mrf.mxu0 }
  0xc9   : > { %v4211_v37 = vpop.f32.mrf.mxu2 }
  0xca   : > { %v4213_v38 = vpop.f32.mrf.mxu3  ;;  %v633_v40 = vpop.f32.mrf.mxu1 }
  0xcb   : > { %v4215_v42 = vadd.f32 %v633_v40, %v454_v56  ;;  %v1318_v56 = vld [vmem:[%s4018_s26 + $0x7b] sm:$0xff] }
  0xcc   : > { %v4217_v44 = vpop.f32.mrf.mxu0  ;;  %v1352_v2 = vpack.c.bf16 %v1318_v56, %v1317_v55  ;;  %v1322_v55 = vld [vmem:[%s4018_s26 + $0x9b] sm:$0xff] }
  0xcd   : > { %3504 = vmatmul.msk.bf16.gmra.mxu1 %vm377_vm1, %v299_v39 }
  0xce   : > { %3523 = vmatmul.msk.bf16.gmra.mxu2 %vm377_vm1, %v1066_v24  ;;  %v1320_v24 = vld [vmem:[%s4018_s26 + $0x8b] sm:$0xff] }
  0xcf   : > { %3545 = vmatmul.msk.bf16.gmra.mxu3 %vm377_vm1, %v1067_v41  ;;  %3567 = vmatmul.msk.bf16.gmra.mxu0 %vm377_vm1, %v1351_v43  ;;  %v1353_v35 = vpack.c.bf16 %v1320_v24, %v1319_v22 }
  0xd1   : > { %v4223_v45 = vpop.f32.mrf.mxu2 }
  0xd2   : > { %v4225_v46 = vpop.f32.mrf.mxu3  ;;  %v635_v47 = vpop.f32.mrf.mxu1 }
  0xd3   : > { %v4228_v48 = vadd.f32 %v635_v47, %v4151_v60  ;;  %v272_v47 = vld [vmem:[%s4018_s26 + $0xb0] sm:$0xff] }
  0xd4   : > { %v4230_v49 = vpop.f32.mrf.mxu0 }
  0xd9   : > { %v4238_v61 = vpop.f32.mrf.mxu2 }
  0xda   : > { %v4240_v62 = vpop.f32.mrf.mxu3  ;;  %v638_v0 = vpop.f32.mrf.mxu1 }
  0xdb   : > { %v4243_v60 = vadd.f32 %v638_v0, %v4165_v9  ;;  %v302_v0 = vpack.c.bf16 %v273_v50, %v272_v47  ;;  %v1040_v47 = vld [vmem:[%s4018_s26 + $0xaa] sm:$0xff] }
  0xdc   : > { %v4245_v5 = vpop.f32.mrf.mxu0  ;;  %v1323_v50 = vld [vmem:[%s4018_s26 + $0xa3] sm:$0xff] }
  0xdd   : > { %3505 = vmatmul.msk.bf16.gmra.mxu1 %vm377_vm1, %v300_v63 }
  0xde   : > { %3524 = vmatmul.msk.bf16.gmra.mxu2 %vm377_vm1, %v1067_v41 }
  0xdf   : > { %3546 = vmatmul.msk.bf16.gmra.mxu3 %vm377_vm1, %v1068_v1  ;;  %3568 = vmatmul.msk.bf16.gmra.mxu0 %vm377_vm1, %v1352_v2  ;;  %v1070_v2 = vpack.c.bf16 %v1038_v52, %v1037_v51  ;;  %v1324_v51 = vld [vmem:[%s4018_s26 + $0xab] sm:$0xff] }
  0xe1   : > { %v4251_v7 = vpop.f32.mrf.mxu2 }
  0xe2   : > { %v4253_v8 = vpop.f32.mrf.mxu3  ;;  %v640_v14 = vpop.f32.mrf.mxu1 }
  0xe3   : > { %v4256_v9 = vadd.f32 %v640_v14, %v4177_v13 }
  0xe4   : > { %v4258_v15 = vpop.f32.mrf.mxu0 }
  0xe9   : > { %v4266_v25 = vpop.f32.mrf.mxu2 }
  0xea   : > { %v4268_v31 = vpop.f32.mrf.mxu3  ;;  %v643_v33 = vpop.f32.mrf.mxu1 }
  0xeb   : > { %v4271_v13 = vadd.f32 %v643_v33, %v4191_v26  ;;  %v274_v33 = vld [vmem:[%s4018_s26 + $0xc0] sm:$0xff] }
  0xec   : > { %v4273_v36 = vpop.f32.mrf.mxu0 }
  0xed   : > { %3506 = vmatmul.msk.bf16.gmra.mxu1 %vm377_vm1, %v301_v32 }
  0xee   : > { %3525 = vmatmul.msk.bf16.gmra.mxu2 %vm377_vm1, %v1068_v1 }
  0xef   : > { %3547 = vmatmul.msk.bf16.gmra.mxu3 %vm377_vm1, %v1069_v34  ;;  %3569 = vmatmul.msk.bf16.gmra.mxu0 %vm377_vm1, %v1353_v35  ;;  %v275_v35 = vld [vmem:[%s4018_s26 + $0xc8] sm:$0xff] }
  0xf1   : > { %v4279_v39 = vpop.f32.mrf.mxu2 }
  0xf2   : > { %v4281_v40 = vpop.f32.mrf.mxu3  ;;  %v645_v41 = vpop.f32.mrf.mxu1 }
  0xf3   : > { %v4284_v26 = vadd.f32 %v645_v41, %v4203_v30  ;;  %v1354_v30 = vpack.c.bf16 %v1322_v55, %v1321_v54  ;;  %v303_v55 = vpack.c.bf16 %v275_v35, %v274_v33  ;;  %v276_v35 = vld [vmem:[%s4018_s26 + $0xd0] sm:$0xff] }
  0xf4   : > { %v4286_v43 = vpop.f32.mrf.mxu0 }
  0xf9   : > { %v4294_v56 = vpop.f32.mrf.mxu2 }
  0xfa   : > { %v556_v63 = vpop.f32.mrf.mxu3  ;;  %v648_v1 = vpop.f32.mrf.mxu1 }
  0xfb   : > { %v4297_v14 = vadd.f32 %v648_v1, %v4217_v44  ;;  %v1355_v1 = vpack.c.bf16 %v1324_v51, %v1323_v50  ;;  %v1042_v50 = vld [vmem:[%s4018_s26 + $0xba] sm:$0xff] }
  0xfc   : > { %v1444_v16 = vpop.f32.mrf.mxu0  ;;  %v1326_v51 = vld [vmem:[%s4018_s26 + $0xbb] sm:$0xff] }
  0xfd   : > { %3507 = vmatmul.msk.bf16.gmra.mxu1 %vm377_vm1, %v302_v0 }
  0xfe   : > { %3526 = vmatmul.msk.bf16.gmra.mxu2 %vm377_vm1, %v1069_v34  ;;  %v1039_v34 = vld [vmem:[%s4018_s26 + $0xa2] sm:$0xff] }
  0xff   : > { %3548 = vmatmul.msk.bf16.gmra.mxu3 %vm377_vm1, %v1070_v2  ;;  %3570 = vmatmul.msk.bf16.gmra.mxu0 %vm377_vm1, %v1354_v30  ;;  %v1071_v0 = vpack.c.bf16 %v1040_v47, %v1039_v34  ;;  %v1041_v47 = vld [vmem:[%s4018_s26 + $0xb2] sm:$0xff] }
 0x101   : > { %v876_v17 = vpop.f32.mrf.mxu2 }
 0x102   : > { %v1160_v18 = vpop.f32.mrf.mxu3  ;;  %v980_v19 = vadd.f32 %v876_v17, %v4215_v42  ;;  %v650_v44 = vpop.f32.mrf.mxu1 }
 0x103   : > { %v4305_v22 = vadd.f32 %v650_v44, %v4230_v49 }
 0x104   : > { %v1264_v24 = vadd.f32 %v1160_v18, %v980_v19  ;;  %v1446_v32 = vpop.f32.mrf.mxu0 }
 0x106   : > { %v4309_v41 = vadd.f32 %v1444_v16, %v1264_v24 }
 0x109   : > { %v878_v52 = vpop.f32.mrf.mxu2 }
 0x10a   : > { %v1162_v54 = vpop.f32.mrf.mxu3  ;;  %v981_v63 = vadd.f32 %v878_v52, %v4228_v48  ;;  %v653_v42 = vpop.f32.mrf.mxu1 }
 0x10b   : > { %v4317_v49 = vadd.f32 %v653_v42, %v4245_v5  ;;  %v1072_v42 = vpack.c.bf16 %v1042_v50, %v1041_v47  ;;  %v1043_v50 = vld [vmem:[%s4018_s26 + $0xc2] sm:$0xff] }
 0x10c   : > { %v1265_v30 = vadd.f32 %v1162_v54, %v981_v63  ;;  %v1449_v16 = vpop.f32.mrf.mxu0 }
 0x10d   : > { %3508 = vmatmul.msk.bf16.gmra.mxu1 %vm377_vm1, %v303_v55 }
 0x10e   : > { %3527 = vmatmul.msk.bf16.gmra.mxu2 %vm377_vm1, %v1070_v2  ;;  %v4322_v48 = vadd.f32 %v1446_v32, %v1265_v30  ;;  %v277_v2 = vld [vmem:[%s4018_s26 + $0xd8] sm:$0xff] }
 0x10f   : > { %3549 = vmatmul.msk.bf16.gmra.mxu3 %vm377_vm1, %v1071_v0  ;;  %3571 = vmatmul.msk.bf16.gmra.mxu0 %vm377_vm1, %v1355_v1  ;;  %v1325_v32 = vld [vmem:[%s4018_s26 + $0xb3] sm:$0xff]  ;;  %v304_v55 = vpack.c.bf16 %v277_v2, %v276_v35  ;;  %v278_v2 = vld [vmem:[%s4018_s26 + $0xe0] sm:$0xff] }
 0x110   : > { %v1356_v1 = vpack.c.bf16 %v1326_v51, %v1325_v32  ;;  %v1044_v32 = vld [vmem:[%s4018_s26 + $0xca] sm:$0xff] }
 0x111   : > { %v881_v5 = vpop.f32.mrf.mxu2  ;;  %v1328_v51 = vld [vmem:[%s4018_s26 + $0xcb] sm:$0xff] }
 0x112   : > { %v1165_v17 = vpop.f32.mrf.mxu3  ;;  %v982_v18 = vadd.f32 %v881_v5, %v4243_v60  ;;  %v655_v19 = vpop.f32.mrf.mxu1 }
 0x113   : > { %v4327_v44 = vadd.f32 %v655_v19, %v4258_v15 }
 0x114   : > { %v1266_v24 = vadd.f32 %v1165_v17, %v982_v18  ;;  %v1451_v33 = vpop.f32.mrf.mxu0 }
 0x116   : > { %v4331_v34 = vadd.f32 %v1449_v16, %v1266_v24 }
 0x119   : > { %v883_v52 = vpop.f32.mrf.mxu2 }
 0x11a   : > { %v1167_v54 = vpop.f32.mrf.mxu3  ;;  %v983_v63 = vadd.f32 %v883_v52, %v4256_v9  ;;  %v658_v60 = vpop.f32.mrf.mxu1 }
 0x11b   : > { %v4339_v15 = vadd.f32 %v658_v60, %v4273_v36 }
 0x11c   : > { %v1267_v30 = vadd.f32 %v1167_v54, %v983_v63  ;;  %v1454_v16 = vpop.f32.mrf.mxu0 }
 0x11d   : > { %3509 = vmatmul.msk.bf16.gmra.mxu1 %vm377_vm1, %v304_v55 }
 0x11e   : > { %3528 = vmatmul.msk.bf16.gmra.mxu2 %vm377_vm1, %v1071_v0  ;;  %v4344_v9 = vadd.f32 %v1451_v33, %v1267_v30  ;;  %v279_v0 = vld [vmem:[%s4018_s26 + $0xe8] sm:$0xff] }
 0x11f   : > { %3550 = vmatmul.msk.bf16.gmra.mxu3 %vm377_vm1, %v1072_v42  ;;  %3572 = vmatmul.msk.bf16.gmra.mxu0 %vm377_vm1, %v1356_v1  ;;  %v1327_v33 = vld [vmem:[%s4018_s26 + $0xc3] sm:$0xff]  ;;  %v305_v55 = vpack.c.bf16 %v279_v0, %v278_v2  ;;  %v280_v2 = vld [vmem:[%s4018_s26 + $0xf0] sm:$0xff]  ;;  %v281_v0 = vld [vmem:[%s4018_s26 + $0xf8] sm:$0xff] }
 0x120   : > { %v1357_v60 = vpack.c.bf16 %v1328_v51, %v1327_v33  ;;  %v1329_v33 = vld [vmem:[%s4018_s26 + $0xd3] sm:$0xff]  ;;  %v1330_v51 = vld [vmem:[%s4018_s26 + $0xdb] sm:$0xff] }
 0x121   : > { %v886_v36 = vpop.f32.mrf.mxu2 }
 0x122   : > { %v1170_v5 = vpop.f32.mrf.mxu3  ;;  %v984_v17 = vadd.f32 %v886_v36, %v4271_v13  ;;  %v660_v18 = vpop.f32.mrf.mxu1 }
 0x123   : > { %v4349_v19 = vadd.f32 %v660_v18, %v4286_v43  ;;  %v1073_v43 = vpack.c.bf16 %v1044_v32, %v1043_v50  ;;  %v1046_v32 = vld [vmem:[%s4018_s26 + $0xda] sm:$0xff] }
 0x124   : > { %v1268_v24 = vadd.f32 %v1170_v5, %v984_v17  ;;  %v1456_v35 = vpop.f32.mrf.mxu0 }
 0x126   : > { %v4353_v47 = vadd.f32 %v1454_v16, %v1268_v24 }
 0x129   : > { %v888_v52 = vpop.f32.mrf.mxu2 }
 0x12a   : > { %v1172_v54 = vpop.f32.mrf.mxu3  ;;  %v985_v63 = vadd.f32 %v888_v52, %v4284_v26  ;;  %v4360_v13 = vpop.f32.mrf.mxu1 }
 0x12c   : > { %v1269_v1 = vadd.f32 %v1172_v54, %v985_v63  ;;  %v1459_v30 = vpop.f32.mrf.mxu0  ;;  %v306_v54 = vpack.c.bf16 %v281_v0, %v280_v2 }
 0x12d   : > { %3510 = vmatmul.msk.bf16.gmra.mxu1 %vm377_vm1, %v305_v55 }
 0x12e   : > { %3529 = vmatmul.msk.bf16.gmra.mxu2 %vm377_vm1, %v1072_v42  ;;  %v4365_v16 = vadd.f32 %v1456_v35, %v1269_v1  ;;  %v1045_v42 = vld [vmem:[%s4018_s26 + $0xd2] sm:$0xff] }
 0x12f   : > { %3551 = vmatmul.msk.bf16.gmra.mxu3 %vm377_vm1, %v1073_v43  ;;  %3573 = vmatmul.msk.bf16.gmra.mxu0 %vm377_vm1, %v1357_v60  ;;  %v1358_v60 = vpack.c.bf16 %v1330_v51, %v1329_v33  ;;  %v1048_v51 = vld [vmem:[%s4018_s26 + $0xea] sm:$0xff] }
 0x131   : > { %v891_v26 = vpop.f32.mrf.mxu2 }
 0x132   : > { %v1175_v36 = vpop.f32.mrf.mxu3  ;;  %v986_v5 = vadd.f32 %v891_v26, %v4297_v14  ;;  %v4369_v17 = vpop.f32.mrf.mxu1  ;;  %v1074_v14 = vpack.c.bf16 %v1046_v32, %v1045_v42  ;;  %v282_v42 = vld [vmem:[%s4018_s26 + $0x100] sm:$0xff]  ;;  %v283_v32 = vld [vmem:[%s4018_s26 + $0x108] sm:$0xff] }
 0x134   : > { %v1270_v18 = vadd.f32 %v1175_v36, %v986_v5  ;;  %v1461_v24 = vpop.f32.mrf.mxu0 }
 0x136   : > { %v4373_v50 = vadd.f32 %v1459_v30, %v1270_v18 }
 0x139   : > { %v893_v35 = vpop.f32.mrf.mxu2 }
 0x13a   : > { %v1177_v52 = vpop.f32.mrf.mxu3  ;;  %v987_v55 = vadd.f32 %v893_v35, %v4305_v22  ;;  %v4380_v63 = vpop.f32.mrf.mxu1  ;;  %v1331_v35 = vld [vmem:[%s4018_s26 + $0xe3] sm:$0xff] }
 0x13c   : > { %v1271_v1 = vadd.f32 %v1177_v52, %v987_v55  ;;  %v1464_v26 = vpop.f32.mrf.mxu0  ;;  %v1332_v52 = vld [vmem:[%s4018_s26 + $0xeb] sm:$0xff]  ;;  %v307_v55 = vpack.c.bf16 %v283_v32, %v282_v42 }
 0x13d   : > { %3511 = vmatmul.msk.bf16.gmra.mxu1 %vm377_vm1, %v306_v54 }
 0x13e   : > { %3530 = vmatmul.msk.bf16.gmra.mxu2 %vm377_vm1, %v1073_v43  ;;  %v4385_v30 = vadd.f32 %v1461_v24, %v1271_v1  ;;  %v1047_v43 = vld [vmem:[%s4018_s26 + $0xe2] sm:$0xff] }
 0x13f   : > { %3552 = vmatmul.msk.bf16.gmra.mxu3 %vm377_vm1, %v1074_v14  ;;  %3574 = vmatmul.msk.bf16.gmra.mxu0 %vm377_vm1, %v1358_v60 }
 0x141   : > { %v896_v22 = vpop.f32.mrf.mxu2 }
 0x142   : > { %v1180_v36 = vpop.f32.mrf.mxu3  ;;  %v988_v5 = vadd.f32 %v896_v22, %v4317_v49  ;;  %v4389_v18 = vpop.f32.mrf.mxu1  ;;  %v1075_v49 = vpack.c.bf16 %v1048_v51, %v1047_v43  ;;  %v1359_v22 = vpack.c.bf16 %v1332_v52, %v1331_v35  ;;  %v284_v35 = vld [vmem:[%s4018_s26 + $0x110] sm:$0xff]  ;;  %v285_v52 = vld [vmem:[%s4018_s26 + $0x118] sm:$0xff] }
 0x144   : > { %v1272_v2 = vadd.f32 %v1180_v36, %v988_v5  ;;  %v1466_v0 = vpop.f32.mrf.mxu0 }
 0x146   : > { %v4393_v33 = vadd.f32 %v1464_v26, %v1272_v2 }
 0x148   : > { %5361 = vst [vmem:[#allocation5_spill] sm:$0xff] %v4393_v33 }
 0x149   : > { %v898_v24 = vpop.f32.mrf.mxu2 }
 0x14a   : > { %v1182_v54 = vpop.f32.mrf.mxu3  ;;  %v989_v60 = vadd.f32 %v898_v24, %v4327_v44  ;;  %v4400_v1 = vpop.f32.mrf.mxu1 }
 0x14c   : > { %v1273_v36 = vadd.f32 %v1182_v54, %v989_v60  ;;  %v1469_v5 = vpop.f32.mrf.mxu0  ;;  %v1050_v54 = vld [vmem:[%s4018_s26 + $0xfa] sm:$0xff] }
 0x14d   : > { %3512 = vmatmul.msk.bf16.gmra.mxu1 %vm377_vm1, %v307_v55  ;;  %v1333_v55 = vld [vmem:[%s4018_s26 + $0xf3] sm:$0xff]  ;;  %v1334_v60 = vld [vmem:[%s4018_s26 + $0xfb] sm:$0xff] }
 0x14e   : > { %3531 = vmatmul.msk.bf16.gmra.mxu2 %vm377_vm1, %v1074_v14  ;;  %v4405_v26 = vadd.f32 %v1466_v0, %v1273_v36  ;;  %v1049_v14 = vld [vmem:[%s4018_s26 + $0xf2] sm:$0xff] }
 0x14f   : > { %3553 = vmatmul.msk.bf16.gmra.mxu3 %vm377_vm1, %v1075_v49  ;;  %3575 = vmatmul.msk.bf16.gmra.mxu0 %vm377_vm1, %v1359_v22 }
 0x150   : > { %5362 = vst [vmem:[#allocation6_spill] sm:$0xff] %v4405_v26  ;;  %v308_v26 = vpack.c.bf16 %v285_v52, %v284_v35 }
 0x151   : > { %v901_v44 = vpop.f32.mrf.mxu2 }
 0x152   : > { %v1185_v2 = vpop.f32.mrf.mxu3  ;;  %v990_v42 = vadd.f32 %v901_v44, %v4339_v15  ;;  %v4409_v32 = vpop.f32.mrf.mxu1  ;;  %v1076_v15 = vpack.c.bf16 %v1050_v54, %v1049_v14  ;;  %v1360_v44 = vpack.c.bf16 %v1334_v60, %v1333_v55  ;;  %v286_v55 = vld [vmem:[%s4018_s26 + $0x120] sm:$0xff] }
 0x154   : > { %v1274_v43 = vadd.f32 %v1185_v2, %v990_v42  ;;  %v1471_v51 = vpop.f32.mrf.mxu0 }
 0x156   : > { %v4413_v24 = vadd.f32 %v1469_v5, %v1274_v43 }
 0x159   : > { %v903_v0 = vpop.f32.mrf.mxu2 }
 0x15a   : > { %v1187_v36 = vpop.f32.mrf.mxu3  ;;  %v991_v22 = vadd.f32 %v903_v0, %v4349_v19  ;;  %v4420_v33 = vpop.f32.mrf.mxu1  ;;  %v664_v19 = vadd.f32 %v4360_v13, %v4139_v53  ;;  %v1051_v0 = vld [vmem:[%s4018_s26 + $0x102] sm:$0xff] }
 0x15c   : > { %v1275_v2 = vadd.f32 %v1187_v36, %v991_v22  ;;  %v1474_v42 = vpop.f32.mrf.mxu0  ;;  %v666_v36 = vadd.f32 %v4369_v17, %v4149_v59  ;;  %v1335_v22 = vld [vmem:[%s4018_s26 + $0x103] sm:$0xff]  ;;  %v669_v17 = vadd.f32 %v4380_v63, %v4163_v6 }
 0x15d   : > { %3513 = vmatmul.msk.bf16.gmra.mxu1 %vm377_vm1, %v308_v26 }
 0x15e   : > { %3532 = vmatmul.msk.bf16.gmra.mxu2 %vm377_vm1, %v1075_v49  ;;  %v4425_v5 = vadd.f32 %v1471_v51, %v1275_v2  ;;  %v287_v49 = vld [vmem:[%s4018_s26 + $0x128] sm:$0xff] }
 0x15f   : > { %3554 = vmatmul.msk.bf16.gmra.mxu3 %vm377_vm1, %v1076_v15  ;;  %3576 = vmatmul.msk.bf16.gmra.mxu0 %vm377_vm1, %v1360_v44  ;;  %v1052_v51 = vld [vmem:[%s4018_s26 + $0x10a] sm:$0xff]  ;;  %v309_v13 = vpack.c.bf16 %v287_v49, %v286_v55 }
 0x160   : > { %5363 = vst [vmem:[#allocation7_spill] sm:$0xff] %v4425_v5  ;;  %v1336_v44 = vld [vmem:[%s4018_s26 + $0x10b] sm:$0xff] }
 0x161   : > { %v906_v43 = vpop.f32.mrf.mxu2 }
 0x162   : > { %v1190_v35 = vpop.f32.mrf.mxu3  ;;  %v992_v52 = vadd.f32 %v906_v43, %v664_v19  ;;  %v4430_v14 = vpop.f32.mrf.mxu1  ;;  %v1077_v43 = vpack.c.bf16 %v1052_v51, %v1051_v0 }
 0x164   : > { %v1276_v26 = vadd.f32 %v1190_v35, %v992_v52  ;;  %v1476_v54 = vpop.f32.mrf.mxu0  ;;  %v1361_v35 = vpack.c.bf16 %v1336_v44, %v1335_v22  ;;  %v1053_v44 = vld [vmem:[%s4018_s26 + $0x112] sm:$0xff] }
 0x166   : > { %v4434_v60 = vadd.f32 %v1474_v42, %v1276_v26 }
 0x169   : > { %v908_v2 = vpop.f32.mrf.mxu2 }
 0x16a   : > { %v1192_v53 = vpop.f32.mrf.mxu3  ;;  %v993_v5 = vadd.f32 %v908_v2, %v666_v36  ;;  %v4442_v19 = vpop.f32.mrf.mxu1  ;;  %v288_v36 = vld [vmem:[%s4018_s26 + $0x130] sm:$0xff]  ;;  %v671_v2 = vadd.f32 %v4389_v18, %v4175_v12  ;;  %v674_v18 = vadd.f32 %v4400_v1, %v4189_v23 }
 0x16c   : > { %v1277_v52 = vadd.f32 %v1192_v53, %v993_v5  ;;  %v1479_v42 = vpop.f32.mrf.mxu0  ;;  %v1337_v53 = vld [vmem:[%s4018_s26 + $0x113] sm:$0xff] }
 0x16d   : > { %3514 = vmatmul.msk.bf16.gmra.mxu1 %vm377_vm1, %v309_v13  ;;  %v1338_v13 = vld [vmem:[%s4018_s26 + $0x11b] sm:$0xff] }
 0x16e   : > { %3533 = vmatmul.msk.bf16.gmra.mxu2 %vm377_vm1, %v1076_v15  ;;  %v4447_v59 = vadd.f32 %v1476_v54, %v1277_v52  ;;  %v289_v15 = vld [vmem:[%s4018_s26 + $0x138] sm:$0xff] }
 0x16f   : > { %3555 = vmatmul.msk.bf16.gmra.mxu3 %vm377_vm1, %v1077_v43  ;;  %3577 = vmatmul.msk.bf16.gmra.mxu0 %vm377_vm1, %v1361_v35  ;;  %v1054_v54 = vld [vmem:[%s4018_s26 + $0x11a] sm:$0xff]  ;;  %v310_v63 = vpack.c.bf16 %v289_v15, %v288_v36 }
 0x171   : > { %v911_v26 = vpop.f32.mrf.mxu2 }
 0x172   : > { %v1195_v5 = vpop.f32.mrf.mxu3  ;;  %v994_v55 = vadd.f32 %v911_v26, %v669_v17  ;;  %v4452_v49 = vpop.f32.mrf.mxu1  ;;  %v1078_v26 = vpack.c.bf16 %v1054_v54, %v1053_v44 }
 0x174   : > { %v1278_v0 = vadd.f32 %v1195_v5, %v994_v55  ;;  %v1481_v51 = vpop.f32.mrf.mxu0  ;;  %v1362_v5 = vpack.c.bf16 %v1338_v13, %v1337_v53  ;;  %v290_v53 = vld [vmem:[%s4018_s26 + $0x140] sm:$0xff] }
 0x175   : > { %v1055_v13 = vld [vmem:[%s4018_s26 + $0x122] sm:$0xff]  ;;  %v311_v23 = vpack.c.bf16 %v290_v53, %v290_v53 }
 0x176   : > { %v4456_v22 = vadd.f32 %v1479_v42, %v1278_v0 }
 0x179   : > { %v913_v35 = vpop.f32.mrf.mxu2 }
 0x17a   : > { %v1197_v6 = vpop.f32.mrf.mxu3  ;;  %v995_v52 = vadd.f32 %v913_v35, %v671_v2  ;;  %v4464_v17 = vpop.f32.mrf.mxu1  ;;  %v1056_v35 = vld [vmem:[%s4018_s26 + $0x12a] sm:$0xff] }
 0x17c   : > { %v1279_v55 = vadd.f32 %v1197_v6, %v995_v52  ;;  %v1484_v42 = vpop.f32.mrf.mxu0  ;;  %v1339_v6 = vld [vmem:[%s4018_s26 + $0x123] sm:$0xff] }
 0x17d   : > { %3515 = vmatmul.msk.bf16.gmra.mxu1 %vm377_vm1, %v310_v63  ;;  %v1340_v63 = vld [vmem:[%s4018_s26 + $0x12b] sm:$0xff] }
 0x17e   : > { %3534 = vmatmul.msk.bf16.gmra.mxu2 %vm377_vm1, %v1077_v43  ;;  %v4469_v12 = vadd.f32 %v1481_v51, %v1279_v55  ;;  %v676_v51 = vadd.f32 %v4409_v32, %v4201_v29  ;;  %v679_v32 = vadd.f32 %v4420_v33, %v4145_v57 }
 0x17f   : > { %3556 = vmatmul.msk.bf16.gmra.mxu3 %vm377_vm1, %v1078_v26  ;;  %3578 = vmatmul.msk.bf16.gmra.mxu0 %vm377_vm1, %v1362_v5 }
 0x181   : > { %v916_v0 = vpop.f32.mrf.mxu2 }
 0x182   : > { %v1200_v36 = vpop.f32.mrf.mxu3  ;;  %v996_v15 = vadd.f32 %v916_v0, %v674_v18  ;;  %v4474_v44 = vpop.f32.mrf.mxu1  ;;  %v1079_v18 = vpack.c.bf16 %v1056_v35, %v1055_v13  ;;  %v1363_v0 = vpack.c.bf16 %v1340_v63, %v1339_v6  ;;  %v1590_v63 = vld [vmem:[%s4018_s26 + $0x1c] sm:$0xff] }
 0x184   : > { %v1280_v54 = vadd.f32 %v1200_v36, %v996_v15  ;;  %v1486_v2 = vpop.f32.mrf.mxu0 }
 0x186   : > { %v4477_v43 = vadd.f32 %v1484_v42, %v1280_v54 }
 0x189   : > { %v918_v52 = vpop.f32.mrf.mxu2 }
 0x18a   : > { %v1202_v5 = vpop.f32.mrf.mxu3  ;;  %v997_v1 = vadd.f32 %v918_v52, %v676_v51  ;;  %v4485_v55 = vpop.f32.mrf.mxu1  ;;  %v1057_v52 = vld [vmem:[%s4018_s26 + $0x132] sm:$0xff] }
 0x18c   : > { %v1281_v36 = vadd.f32 %v1202_v5, %v997_v1  ;;  %v1489_v42 = vpop.f32.mrf.mxu0  ;;  %v681_v5 = vadd.f32 %v4430_v14, %v4159_v3  ;;  %v1342_v1 = vld [vmem:[%s4018_s26 + $0x13b] sm:$0xff]  ;;  %v684_v14 = vadd.f32 %v4442_v19, %v4171_v10 }
 0x18d   : > { %3516 = vmatmul.msk.bf16.gmra.mxu1 %vm377_vm1, %v311_v23  ;;  %v1341_v23 = vld [vmem:[%s4018_s26 + $0x133] sm:$0xff] }
 0x18e   : > { %3535 = vmatmul.msk.bf16.gmra.mxu2 %vm377_vm1, %v1078_v26  ;;  %v4490_v29 = vadd.f32 %v1486_v2, %v1281_v36  ;;  %v1589_v26 = vld [vmem:[%s4018_s26 + $0x14] sm:$0xff] }
 0x18f   : > { %3557 = vmatmul.msk.bf16.gmra.mxu3 %vm377_vm1, %v1079_v18  ;;  %3579 = vmatmul.msk.bf16.gmra.mxu0 %vm377_vm1, %v1363_v0  ;;  %v1058_v2 = vld [vmem:[%s4018_s26 + $0x13a] sm:$0xff]  ;;  %v1630_v33 = vpack.c.bf16 %v1590_v63, %v1589_v26 }
 0x191   : > { %v921_v15 = vpop.f32.mrf.mxu2 }
 0x192   : > { %v1205_v54 = vpop.f32.mrf.mxu3  ;;  %v998_v53 = vadd.f32 %v921_v15, %v679_v32  ;;  %v4495_v13 = vpop.f32.mrf.mxu1  ;;  %v1080_v15 = vpack.c.bf16 %v1058_v2, %v1057_v52 }
 0x194   : > { %v1282_v35 = vadd.f32 %v1205_v54, %v998_v53  ;;  %v1491_v51 = vpop.f32.mrf.mxu0  ;;  %v1364_v54 = vpack.c.bf16 %v1342_v1, %v1341_v23  ;;  %v1591_v23 = vld [vmem:[%s4018_s26 + $0x24] sm:$0xff] }
 0x196   : > { %v4497_v6 = vadd.f32 %v1489_v42, %v1282_v35 }
 0x198   : > { %5364 = vst [vmem:[#allocation8_spill] sm:$0xff] %v4497_v6 }
 0x199   : > { %v923_v0 = vpop.f32.mrf.mxu2 }
 0x19a   : > { %v1207_v57 = vpop.f32.mrf.mxu3  ;;  %v999_v36 = vadd.f32 %v923_v0, %v681_v5  ;;  %v4507_v32 = vpop.f32.mrf.mxu1  ;;  %v1059_v0 = vld [vmem:[%s4018_s26 + $0x142] sm:$0xff] }
 0x19c   : > { %v1283_v42 = vadd.f32 %v1207_v57, %v999_v36  ;;  %v1494_v53 = vpop.f32.mrf.mxu0  ;;  %v686_v57 = vadd.f32 %v4452_v49, %v4185_v20  ;;  %v1344_v36 = vld [vmem:[%s4018_s26 + $0x14b] sm:$0xff]  ;;  %v689_v49 = vadd.f32 %v4464_v17, %v4197_v27 }
 0x19d   : > { %3584 = vmatmul.msk.bf16.vlgmr.msra.gmra.mxu1 %vm377_vm1, %v1630_v33  ;;  %v1343_v33 = vld [vmem:[%s4018_s26 + $0x143] sm:$0xff] }
 0x19e   : > { %3536 = vmatmul.msk.bf16.gmra.mxu2 %vm377_vm1, %v1079_v18  ;;  %v4512_v3 = vadd.f32 %v1491_v51, %v1283_v42  ;;  %v1592_v18 = vld [vmem:[%s4018_s26 + $0x2c] sm:$0xff] }
 0x19f   : > { %3558 = vmatmul.msk.bf16.gmra.mxu3 %vm377_vm1, %v1080_v15  ;;  %3580 = vmatmul.msk.bf16.gmra.mxu0 %vm377_vm1, %v1364_v54  ;;  %v1060_v51 = vld [vmem:[%s4018_s26 + $0x14a] sm:$0xff]  ;;  %v4529_v19 = vpack.c.bf16 %v1592_v18, %v1591_v23 }
 0x1a1   : > { %v926_v35 = vpop.f32.mrf.mxu2 }
 0x1a2   : > { %v1210_v26 = vpop.f32.mrf.mxu3  ;;  %v1000_v63 = vadd.f32 %v926_v35, %v684_v14  ;;  %v4517_v52 = vpop.f32.mrf.mxu1  ;;  %v1081_v35 = vpack.c.bf16 %v1060_v51, %v1059_v0 }
 0x1a4   : > { %v1284_v2 = vadd.f32 %v1210_v26, %v1000_v63  ;;  %v1496_v5 = vpop.f32.mrf.mxu0  ;;  %v1365_v26 = vpack.c.bf16 %v1344_v36, %v1343_v33  ;;  %v1593_v36 = vld [vmem:[%s4018_s26 + $0x34] sm:$0xff] }
 0x1a6   : > { %v4521_v1 = vadd.f32 %v1494_v53, %v1284_v2 }
 0x1a9   : > { %v928_v54 = vpop.f32.mrf.mxu2 }
 0x1aa   : > { %v1212_v10 = vpop.f32.mrf.mxu3  ;;  %v1001_v42 = vadd.f32 %v928_v54, %v686_v57  ;;  %v4531_v14 = vpop.f32.mrf.mxu1  ;;  %v1594_v54 = vld [vmem:[%s4018_s26 + $0x3c] sm:$0xff] }
 0x1ac   : > { %v1285_v53 = vadd.f32 %v1212_v10, %v1001_v42  ;;  %v1499_v63 = vpop.f32.mrf.mxu0  ;;  %v1061_v10 = vld [vmem:[%s4018_s26 + $0x152] sm:$0xff] }
 0x1ad   : > { %3585 = vmatmul.msk.bf16.gmra.mxu1 %vm377_vm1, %v4529_v19  ;;  %v1345_v42 = vld [vmem:[%s4018_s26 + $0x153] sm:$0xff] }
 0x1ae   : > { %3537 = vmatmul.msk.bf16.gmra.mxu2 %vm377_vm1, %v1080_v15  ;;  %v4537_v20 = vadd.f32 %v1496_v5, %v1285_v53  ;;  %v691_v5 = vadd.f32 %v4474_v44, %v4211_v37  ;;  %v4552_v53 = vpack.c.bf16 %v1594_v54, %v1593_v36  ;;  %v694_v44 = vadd.f32 %v4485_v55, %v4223_v45 }
 0x1af   : > { %3559 = vmatmul.msk.bf16.gmra.mxu3 %vm377_vm1, %v1081_v35  ;;  %3581 = vmatmul.msk.bf16.gmra.mxu0 %vm377_vm1, %v1365_v26 }
 0x1b1   : > { %v931_v2 = vpop.f32.mrf.mxu2 }
 0x1b2   : > { %v1215_v23 = vpop.f32.mrf.mxu3  ;;  %v1002_v18 = vadd.f32 %v931_v2, %v689_v49  ;;  %v4542_v51 = vpop.f32.mrf.mxu1  ;;  %v798_v49 = vpack.c.bf16 %v1059_v0, %v1059_v0  ;;  %v1082_v2 = vpack.c.bf16 %v1061_v10, %v1061_v10 }
 0x1b4   : > { %v1286_v57 = vadd.f32 %v1215_v23, %v1002_v18  ;;  %v1501_v33 = vpop.f32.mrf.mxu0  ;;  %v1366_v23 = vpack.c.bf16 %v1345_v42, %v1345_v42  ;;  %v1595_v42 = vld [vmem:[%s4018_s26 + $0x44] sm:$0xff] }
 0x1b6   : > { %v4546_v15 = vadd.f32 %v1499_v63, %v1286_v57 }
 0x1b9   : > { %v933_v35 = vpop.f32.mrf.mxu2 }
 0x1ba   : > { %v1217_v26 = vpop.f32.mrf.mxu3  ;;  %v1003_v27 = vadd.f32 %v933_v35, %v691_v5  ;;  %v4554_v17 = vpop.f32.mrf.mxu1  ;;  %v1596_v35 = vld [vmem:[%s4018_s26 + $0x4c] sm:$0xff] }
 0x1bb   : > { %v4577_v55 = vpack.c.bf16 %v1596_v35, %v1595_v42 }
 0x1bc   : > { %v1287_v18 = vadd.f32 %v1217_v26, %v1003_v27  ;;  %v1504_v63 = vpop.f32.mrf.mxu0  ;;  %v2157_v27 = vld [vmem:[%s4018_s26 + $0x25] sm:$0xff] }
 0x1bd   : > { %3586 = vmatmul.msk.bf16.gmra.mxu1 %vm377_vm1, %v4552_v53 }
 0x1be   : > { %3538 = vmatmul.msk.bf16.gmra.mxu2 %vm377_vm1, %v798_v49  ;;  %v4560_v37 = vadd.f32 %v1501_v33, %v1287_v18  ;;  %v2158_v33 = vld [vmem:[%s4018_s26 + $0x2d] sm:$0xff]  ;;  %v696_v49 = vadd.f32 %v4495_v13, %v4238_v61  ;;  %v699_v13 = vadd.f32 %v4507_v32, %v4251_v7  ;;  %v1598_v32 = vld [vmem:[%s4018_s26 + $0x5c] sm:$0xff] }
 0x1bf   : > { %3560 = vmatmul.msk.bf16.gmra.mxu3 %vm377_vm1, %v1082_v2  ;;  %3582 = vmatmul.msk.bf16.gmra.mxu0 %vm377_vm1, %v1366_v23  ;;  %v2441_v2 = vld [vmem:[%s4018_s26 + $0x26] sm:$0xff]  ;;  %v2442_v23 = vld [vmem:[%s4018_s26 + $0x2e] sm:$0xff] }
 0x1c0   : > { %5365 = vst [vmem:[#allocation9_spill] sm:$0xff] %v4560_v37  ;;  %v1597_v7 = vld [vmem:[%s4018_s26 + $0x54] sm:$0xff] }
 0x1c1   : > { %v936_v0 = vpop.f32.mrf.mxu2 }
 0x1c2   : > { %v1220_v57 = vpop.f32.mrf.mxu3  ;;  %v1004_v36 = vadd.f32 %v936_v0, %v694_v44  ;;  %v4565_v54 = vpop.f32.mrf.mxu1 }
 0x1c4   : > { %v1288_v10 = vadd.f32 %v1220_v57, %v1004_v36  ;;  %v1506_v5 = vpop.f32.mrf.mxu0  ;;  %v2198_v57 = vpack.c.bf16 %v2158_v33, %v2157_v27  ;;  %v2482_v36 = vpack.c.bf16 %v2442_v23, %v2441_v2  ;;  %v3913_v33 = vmov 0   ;;  %v2160_v2 = vld [vmem:[%s4018_s26 + $0x3d] sm:$0xff] }
 0x1c5   : > { %3758 = vset.pattern.permute.xlu0 %v3913_v33  ;;  %3759 = vset.pattern.permute.xlu1 %v3913_v33  ;;  %v701_v23 = vadd.f32 %v4517_v52, %v4266_v25  ;;  %v704_v52 = vadd.f32 %v4531_v14, %v4279_v39  ;;  %v706_v39 = vadd.f32 %v4542_v51, %v4294_v56  ;;  %v2445_v14 = vld [vmem:[%s4018_s26 + $0x46] sm:$0xff] }
 0x1c6   : > { %v4569_v26 = vadd.f32 %v1504_v63, %v1288_v10  ;;  %3760 = vset.pattern.permute.xlu2 %v3913_v33  ;;  %v709_v51 = vadd.f32 %v4554_v17, %v4147_v58 }
 0x1c9   : > { %v938_v18 = vpop.f32.mrf.mxu2 }
 0x1ca   : > { %v1222_v45 = vpop.f32.mrf.mxu3  ;;  %v1005_v44 = vadd.f32 %v938_v18, %v696_v49  ;;  %v4579_v0 = vpop.f32.mrf.mxu1  ;;  %v2159_v49 = vld [vmem:[%s4018_s26 + $0x35] sm:$0xff] }
 0x1cb   : > { %v2443_v18 = vld [vmem:[%s4018_s26 + $0x36] sm:$0xff] }
 0x1cc   : > { %v1289_v6 = vadd.f32 %v1222_v45, %v1005_v44  ;;  %v1509_v37 = vpop.f32.mrf.mxu0  ;;  %v2444_v45 = vld [vmem:[%s4018_s26 + $0x3e] sm:$0xff] }
 0x1cd   : > { %3587 = vmatmul.msk.bf16.gmra.mxu1 %vm377_vm1, %v4577_v55 }
 0x1ce   : > { %3606 = vmatmul.msk.bf16.vlgmr.msra.gmra.mxu2 %vm377_vm1, %v4529_v19  ;;  %v4586_v61 = vadd.f32 %v1506_v5, %v1289_v6  ;;  %v3016_v6 = vld [vmem:[%s5355_s3] sm:$0xff] }
 0x1cf   : > { %3628 = vmatmul.msk.bf16.vlgmr.msra.gmra.mxu3 %vm377_vm1, %v2198_v57  ;;  %3650 = vmatmul.msk.bf16.vlgmr.msra.gmra.mxu0 %vm377_vm1, %v2482_v36  ;;  %v4606_v36 = vpack.c.bf16 %v1598_v32, %v1597_v7 }
 0x1d0   : > { %3059 = vperm.xlu0 %3758, %v3016_v6  }
 0x1d1   : > { %v941_v63 = vpop.f32.mrf.mxu2 }
 0x1d2   : > { %v1225_v10 = vpop.f32.mrf.mxu3  ;;  %v1006_v42 = vadd.f32 %v941_v63, %v699_v13  ;;  %v4591_v35 = vpop.f32.mrf.mxu1 }
 0x1d4   : > { %v1290_v19 = vadd.f32 %v1225_v10, %v1006_v42  ;;  %v1511_v27 = vpop.f32.mrf.mxu0  ;;  %v2199_v10 = vpack.c.bf16 %v2160_v2, %v2159_v49  ;;  %v2483_v42 = vpack.c.bf16 %v2444_v45, %v2443_v18  ;;  %v1600_v18 = vld [vmem:[%s4018_s26 + $0x6c] sm:$0xff] }
 0x1d6   : > { %v4598_v5 = vadd.f32 %v1509_v37, %v1290_v19  ;;  %v3017_v37 = vld [vmem:[%s5355_s3 + $0x8] sm:$0xff] }
 0x1d8   : > { %3064 = vperm.xlu0 %3758, %v3017_v37  }
 0x1d9   : > { %v943_v44 = vpop.f32.mrf.mxu2 }
 0x1da   : > { %v1227_v57 = vpop.f32.mrf.mxu3  ;;  %v1007_v13 = vadd.f32 %v943_v44, %v701_v23  ;;  %v4608_v63 = vpop.f32.mrf.mxu1  ;;  %v3018_v23 = vld [vmem:[%s5355_s3 + $0x10] sm:$0xff]  ;;  %v2161_v44 = vld [vmem:[%s4018_s26 + $0x45] sm:$0xff] }
 0x1db   : > { %3069 = vperm.xlu1 %3759, %v3018_v23  }
 0x1dc   : > { %v1291_v33 = vadd.f32 %v1227_v57, %v1007_v13  ;;  %v1514_v6 = vpop.f32.mrf.mxu0  ;;  %v2162_v57 = vld [vmem:[%s4018_s26 + $0x4d] sm:$0xff] }
 0x1dd   : > { %3588 = vmatmul.msk.bf16.gmra.mxu1 %vm377_vm1, %v4606_v36  ;;  %v2446_v13 = vld [vmem:[%s4018_s26 + $0x4e] sm:$0xff] }
 0x1de   : > { %3607 = vmatmul.msk.bf16.gmra.mxu2 %vm377_vm1, %v4552_v53  ;;  %v4618_v25 = vadd.f32 %v1511_v27, %v1291_v33  ;;  %v1599_v27 = vld [vmem:[%s4018_s26 + $0x64] sm:$0xff] }
 0x1df   : > { %3629 = vmatmul.msk.bf16.gmra.mxu3 %vm377_vm1, %v2199_v10  ;;  %3651 = vmatmul.msk.bf16.gmra.mxu0 %vm377_vm1, %v2483_v42  ;;  %v4638_v33 = vpack.c.bf16 %v1600_v18, %v1599_v27 }
 0x1e1   : > { %v946_v19 = vpop.f32.mrf.mxu2 }
 0x1e2   : > { %v1230_v7 = vpop.f32.mrf.mxu3  ;;  %v1008_v32 = vadd.f32 %v946_v19, %v704_v52  ;;  %v4623_v49 = vpop.f32.mrf.mxu1  ;;  %v2200_v19 = vpack.c.bf16 %v2162_v57, %v2161_v44 }
 0x1e4   : > { %v1292_v2 = vadd.f32 %v1230_v7, %v1008_v32  ;;  %v1516_v53 = vpop.f32.mrf.mxu0  ;;  %v2484_v7 = vpack.c.bf16 %v2446_v13, %v2445_v14  ;;  %v1601_v14 = vld [vmem:[%s4018_s26 + $0x74] sm:$0xff] }
 0x1e6   : > { %v4630_v45 = vadd.f32 %v1514_v6, %v1292_v2  ;;  %v3019_v2 = vld [vmem:[%s5355_s3 + $0x18] sm:$0xff] }
 0x1e7   : > { %3074 = vperm.xlu1 %3759, %v3019_v2  }
 0x1e9   : > { %v948_v10 = vpop.f32.mrf.mxu2 }
 0x1ea   : > { %v1232_v42 = vpop.f32.mrf.mxu3  ;;  %v1009_v37 = vadd.f32 %v948_v10, %v706_v39  ;;  %v4640_v52 = vpop.f32.mrf.mxu1  ;;  %v2163_v10 = vld [vmem:[%s4018_s26 + $0x55] sm:$0xff] }
 0x1ec   : > { %v1293_v32 = vadd.f32 %v1232_v42, %v1009_v37  ;;  %v1519_v6 = vpop.f32.mrf.mxu0  ;;  %v711_v42 = vadd.f32 %v4565_v54, %v4161_v4  ;;  %v2447_v37 = vld [vmem:[%s4018_s26 + $0x56] sm:$0xff]  ;;  %v714_v54 = vadd.f32 %v4579_v0, %v4173_v11  ;;  %v716_v11 = vadd.f32 %v4591_v35, %v4187_v21  ;;  %v2449_v0 = vld [vmem:[%s4018_s26 + $0x66] sm:$0xff] }
 0x1ed   : > { %3589 = vmatmul.msk.bf16.gmra.mxu1 %vm377_vm1, %v4638_v33  ;;  %v3023_v21 = vld [vmem:[%s5355_s3 + $0x38] sm:$0xff] }
 0x1ee   : > { %3608 = vmatmul.msk.bf16.gmra.mxu2 %vm377_vm1, %v4577_v55  ;;  %v4650_v56 = vadd.f32 %v1516_v53, %v1293_v32  ;;  %v1602_v55 = vld [vmem:[%s4018_s26 + $0x7c] sm:$0xff] }
 0x1ef   : > { %3630 = vmatmul.msk.bf16.gmra.mxu3 %vm377_vm1, %v2200_v19  ;;  %3652 = vmatmul.msk.bf16.gmra.mxu0 %vm377_vm1, %v2484_v7  ;;  %v2164_v53 = vld [vmem:[%s4018_s26 + $0x5d] sm:$0xff]  ;;  %v4667_v17 = vpack.c.bf16 %v1602_v55, %v1601_v14 }
 0x1f0   : > { %v2448_v19 = vld [vmem:[%s4018_s26 + $0x5e] sm:$0xff]  ;;  %3094 = vperm.xlu1 %3759, %v3023_v21  }
 0x1f1   : > { %v951_v23 = vpop.f32.mrf.mxu2 }
 0x1f2   : > { %v1235_v27 = vpop.f32.mrf.mxu3  ;;  %v1010_v18 = vadd.f32 %v951_v23, %v709_v51  ;;  %v4655_v44 = vpop.f32.mrf.mxu1  ;;  %v2201_v51 = vpack.c.bf16 %v2164_v53, %v2163_v10  ;;  %v2485_v23 = vpack.c.bf16 %v2448_v19, %v2447_v37  ;;  %v3022_v53 = vld [vmem:[%s5355_s3 + $0x30] sm:$0xff]  ;;  %v2165_v19 = vld [vmem:[%s4018_s26 + $0x65] sm:$0xff] }
 0x1f3   : > { %3089 = vperm.xlu0 %3758, %v3022_v53  }
 0x1f4   : > { %v1294_v57 = vadd.f32 %v1235_v27, %v1010_v18  ;;  %v1521_v39 = vpop.f32.mrf.mxu0 }
 0x1f6   : > { %v4659_v13 = vadd.f32 %v1519_v6, %v1294_v57 }
 0x1f9   : > { %v953_v7 = vpop.f32.mrf.mxu2 }
 0x1fa   : > { %v1237_v58 = vpop.f32.mrf.mxu3  ;;  %v1011_v32 = vadd.f32 %v953_v7, %v711_v42  ;;  %v4669_v2 = vpop.f32.mrf.mxu1  ;;  %v1604_v42 = vld [vmem:[%s4018_s26 + $0x8c] sm:$0xff] }
 0x1fb   : > { %v2166_v7 = vld [vmem:[%s4018_s26 + $0x6d] sm:$0xff] }
 0x1fc   : > { %v1295_v27 = vadd.f32 %v1237_v58, %v1011_v32  ;;  %v1524_v6 = vpop.f32.mrf.mxu0  ;;  %v2450_v58 = vld [vmem:[%s4018_s26 + $0x6e] sm:$0xff] }
 0x1fd   : > { %3590 = vmatmul.msk.bf16.gmra.mxu1 %vm377_vm1, %v4667_v17 }
 0x1fe   : > { %3609 = vmatmul.msk.bf16.gmra.mxu2 %vm377_vm1, %v4606_v36  ;;  %v4676_v4 = vadd.f32 %v1521_v39, %v1295_v27  ;;  %v1603_v39 = vld [vmem:[%s4018_s26 + $0x84] sm:$0xff] }
 0x1ff   : > { %3631 = vmatmul.msk.bf16.gmra.mxu3 %vm377_vm1, %v2201_v51  ;;  %3653 = vmatmul.msk.bf16.gmra.mxu0 %vm377_vm1, %v2485_v23  ;;  %v4696_v23 = vpack.c.bf16 %v1604_v42, %v1603_v39 }
 0x201   : > { %v956_v18 = vpop.f32.mrf.mxu2 }
 0x202   : > { %v1240_v57 = vpop.f32.mrf.mxu3  ;;  %v1012_v14 = vadd.f32 %v956_v18, %v714_v54  ;;  %v4681_v55 = vpop.f32.mrf.mxu1  ;;  %v2202_v18 = vpack.c.bf16 %v2166_v7, %v2165_v19 }
 0x204   : > { %v1296_v10 = vadd.f32 %v1240_v57, %v1012_v14  ;;  %v1526_v36 = vpop.f32.mrf.mxu0  ;;  %v2486_v57 = vpack.c.bf16 %v2450_v58, %v2449_v0  ;;  %v1605_v0 = vld [vmem:[%s4018_s26 + $0x94] sm:$0xff]  ;;  %v1606_v58 = vld [vmem:[%s4018_s26 + $0x9c] sm:$0xff] }
 0x206   : > { %v4688_v37 = vadd.f32 %v1524_v6, %v1296_v10  ;;  %v3020_v6 = vld [vmem:[%s5355_s3 + $0x20] sm:$0xff]  ;;  %v719_v10 = vadd.f32 %v4608_v63, %v4199_v28  ;;  %v721_v28 = vadd.f32 %v4623_v49, %v4213_v38  ;;  %v2451_v63 = vld [vmem:[%s4018_s26 + $0x76] sm:$0xff] }
 0x207   : > { %3079 = vperm.xlu2 %3760, %v3020_v6   ;;  %v4729_v6 = vpack.c.bf16 %v1606_v58, %v1605_v0 }
 0x209   : > { %v958_v32 = vpop.f32.mrf.mxu2 }
 0x20a   : > { %v1242_v51 = vpop.f32.mrf.mxu3  ;;  %v1013_v27 = vadd.f32 %v958_v32, %v716_v11  ;;  %v4698_v54 = vpop.f32.mrf.mxu1 }
 0x20c   : > { %v1297_v14 = vadd.f32 %v1242_v51, %v1013_v27  ;;  %v1529_v53 = vpop.f32.mrf.mxu0  ;;  %v2167_v51 = vld [vmem:[%s4018_s26 + $0x75] sm:$0xff]  ;;  %v2168_v27 = vld [vmem:[%s4018_s26 + $0x7d] sm:$0xff] }
 0x20d   : > { %3591 = vmatmul.msk.bf16.gmra.mxu1 %vm377_vm1, %v4696_v23 }
 0x20e   : > { %3610 = vmatmul.msk.bf16.gmra.mxu2 %vm377_vm1, %v4638_v33  ;;  %v4711_v35 = vadd.f32 %v1526_v36, %v1297_v14  ;;  %v3021_v36 = vld [vmem:[%s5355_s3 + $0x28] sm:$0xff] }
 0x20f   : > { %3632 = vmatmul.msk.bf16.gmra.mxu3 %vm377_vm1, %v2202_v18  ;;  %3654 = vmatmul.msk.bf16.gmra.mxu0 %vm377_vm1, %v2486_v57  ;;  %v2452_v18 = vld [vmem:[%s4018_s26 + $0x7e] sm:$0xff] }
 0x210   : > { %3084 = vperm.xlu2 %3760, %v3021_v36  }
 0x211   : > { %v961_v39 = vpop.f32.mrf.mxu2 }
 0x212   : > { %v1245_v42 = vpop.f32.mrf.mxu3  ;;  %v1014_v19 = vadd.f32 %v961_v39, %v719_v10  ;;  %v735_v7 = vpop.f32.mrf.mxu1  ;;  %v2203_v39 = vpack.c.bf16 %v2168_v27, %v2167_v51 }
 0x214   : > { %v1298_v11 = vadd.f32 %v1245_v42, %v1014_v19  ;;  %v1531_v33 = vpop.f32.mrf.mxu0  ;;  %v2487_v19 = vpack.c.bf16 %v2452_v18, %v2451_v63  ;;  %v1608_v63 = vld [vmem:[%s4018_s26 + $0xac] sm:$0xff] }
 0x216   : > { %v4721_v32 = vadd.f32 %v1529_v53, %v1298_v11  ;;  %v3025_v11 = vld [vmem:[%s5355_s3 + $0x48] sm:$0xff] }
 0x217   : > { %3104 = vperm.xlu0 %3758, %v3025_v11  }
 0x219   : > { %v963_v57 = vpop.f32.mrf.mxu2 }
 0x21a   : > { %v1247_v14 = vpop.f32.mrf.mxu3  ;;  %v1015_v21 = vadd.f32 %v963_v57, %v721_v28  ;;  %v1728_v10 = vpop.f32.mrf.mxu1  ;;  %v1607_v28 = vld [vmem:[%s4018_s26 + $0xa4] sm:$0xff]  ;;  %v726_v57 = vadd.f32 %v4655_v44, %v4240_v62 }
 0x21b   : > { %v4732_v42 = vadd.f32 %v1728_v10, %v4309_v41  ;;  %v724_v41 = vadd.f32 %v4640_v52, %v4225_v46  ;;  %v2169_v46 = vld [vmem:[%s4018_s26 + $0x85] sm:$0xff]  ;;  %v2170_v52 = vld [vmem:[%s4018_s26 + $0x8d] sm:$0xff] }
 0x21c   : > { %v1299_v53 = vadd.f32 %v1247_v14, %v1015_v21  ;;  %v1534_v7 = vpop.f32.mrf.mxu0  ;;  %v2453_v14 = vld [vmem:[%s4018_s26 + $0x86] sm:$0xff]  ;;  %v2454_v21 = vld [vmem:[%s4018_s26 + $0x8e] sm:$0xff]  ;;  %v2204_v11 = vpack.c.bf16 %v2170_v52, %v2169_v46  ;;  %v1610_v52 = vld [vmem:[%s4018_s26 + $0xbc] sm:$0xff] }
 0x21d   : > { %3592 = vmatmul.msk.bf16.gmra.mxu1 %vm377_vm1, %v4729_v6  ;;  %v1609_v46 = vld [vmem:[%s4018_s26 + $0xb4] sm:$0xff] }
 0x21e   : > { %3611 = vmatmul.msk.bf16.gmra.mxu2 %vm377_vm1, %v4667_v17  ;;  %v4742_v38 = vadd.f32 %v1531_v33, %v1299_v53  ;;  %v3026_v33 = vld [vmem:[%s5355_s3 + $0x50] sm:$0xff] }
 0x21f   : > { %3633 = vmatmul.msk.bf16.gmra.mxu3 %vm377_vm1, %v2203_v39  ;;  %3655 = vmatmul.msk.bf16.gmra.mxu0 %vm377_vm1, %v2487_v19  ;;  %v4763_v39 = vpack.c.bf16 %v1608_v63, %v1607_v28 }
 0x220   : > { %3109 = vperm.xlu1 %3759, %v3026_v33  }
 0x221   : > { %v966_v49 = vpop.f32.mrf.mxu2 }
 0x222   : > { %v1250_v36 = vpop.f32.mrf.mxu3  ;;  %v1016_v0 = vadd.f32 %v966_v49, %v724_v41  ;;  %v1730_v58 = vpop.f32.mrf.mxu1  ;;  %v2488_v49 = vpack.c.bf16 %v2454_v21, %v2453_v14  ;;  %v731_v14 = vadd.f32 %v4681_v55, %v4268_v31  ;;  %v2455_v21 = vld [vmem:[%s4018_s26 + $0x96] sm:$0xff] }
 0x223   : > { %v4748_v51 = vadd.f32 %v1730_v58, %v4322_v48 }
 0x224   : > { %v1300_v17 = vadd.f32 %v1250_v36, %v1016_v0  ;;  %v1536_v27 = vpop.f32.mrf.mxu0 }
 0x226   : > { %v4755_v18 = vadd.f32 %v1534_v7, %v1300_v17  ;;  %v3024_v7 = vld [vmem:[%s5355_s3 + $0x40] sm:$0xff] }
 0x227   : > { %3099 = vperm.xlu2 %3760, %v3024_v7  }
 0x229   : > { %v968_v48 = vpop.f32.mrf.mxu2 }
 0x22a   : > { %v1252_v10 = vpop.f32.mrf.mxu3  ;;  %v1017_v19 = vadd.f32 %v968_v48, %v726_v57  ;;  %v1733_v53 = vpop.f32.mrf.mxu1  ;;  %v2456_v48 = vld [vmem:[%s4018_s26 + $0x9e] sm:$0xff] }
 0x22b   : > { %v4766_v41 = vadd.f32 %v1733_v53, %v4331_v34  ;;  %v729_v34 = vadd.f32 %v4669_v2, %v4253_v8  ;;  %v2171_v8 = vld [vmem:[%s4018_s26 + $0x95] sm:$0xff]  ;;  %v2172_v2 = vld [vmem:[%s4018_s26 + $0x9d] sm:$0xff] }
 0x22c   : > { %v1301_v36 = vadd.f32 %v1252_v10, %v1017_v19  ;;  %v1539_v0 = vpop.f32.mrf.mxu0  ;;  %v4797_v19 = vpack.c.bf16 %v1610_v52, %v1609_v46  ;;  %v1611_v46 = vld [vmem:[%s4018_s26 + $0xc4] sm:$0xff]  ;;  %v1612_v52 = vld [vmem:[%s4018_s26 + $0xcc] sm:$0xff] }
 0x22d   : > { %3593 = vmatmul.msk.bf16.gmra.mxu1 %vm377_vm1, %v4763_v39 }
 0x22e   : > { %3612 = vmatmul.msk.bf16.gmra.mxu2 %vm377_vm1, %v4696_v23  ;;  %v4776_v62 = vadd.f32 %v1536_v27, %v1301_v36  ;;  %v3028_v27 = vld [vmem:[%s5355_s3 + $0x60] sm:$0xff]  ;;  %v2489_v36 = vpack.c.bf16 %v2456_v48, %v2455_v21 }
 0x22f   : > { %3634 = vmatmul.msk.bf16.gmra.mxu3 %vm377_vm1, %v2204_v11  ;;  %3656 = vmatmul.msk.bf16.gmra.mxu0 %vm377_vm1, %v2488_v49  ;;  %v2205_v49 = vpack.c.bf16 %v2172_v2, %v2171_v8  ;;  %v2457_v2 = vld [vmem:[%s4018_s26 + $0xa6] sm:$0xff] }
 0x230   : > { %3119 = vperm.xlu0 %3758, %v3028_v27  }
 0x231   : > { %v971_v44 = vpop.f32.mrf.mxu2 }
 0x232   : > { %v1255_v58 = vpop.f32.mrf.mxu3  ;;  %v1018_v17 = vadd.f32 %v971_v44, %v729_v34  ;;  %v1735_v33 = vpop.f32.mrf.mxu1  ;;  %v3029_v44 = vld [vmem:[%s5355_s3 + $0x68] sm:$0xff] }
 0x233   : > { %v4782_v28 = vadd.f32 %v1735_v33, %v4344_v9  ;;  %3124 = vperm.xlu1 %3759, %v3029_v44  }
 0x234   : > { %v1302_v23 = vadd.f32 %v1255_v58, %v1018_v17  ;;  %v1541_v63 = vpop.f32.mrf.mxu0 }
 0x236   : > { %v4789_v57 = vadd.f32 %v1539_v0, %v1302_v23 }
 0x239   : > { %v973_v9 = vpop.f32.mrf.mxu2 }
 0x23a   : > { %v1257_v10 = vpop.f32.mrf.mxu3  ;;  %v1019_v53 = vadd.f32 %v973_v9, %v731_v14  ;;  %v1738_v11 = vpop.f32.mrf.mxu1  ;;  %v2458_v14 = vld [vmem:[%s4018_s26 + $0xae] sm:$0xff]  ;;  %v4832_v9 = vpack.c.bf16 %v1612_v52, %v1611_v46  ;;  %v2176_v46 = vld [vmem:[%s4018_s26 + $0xbd] sm:$0xff] }
 0x23b   : > { %v4800_v7 = vadd.f32 %v1738_v11, %v4353_v47  ;;  %v734_v47 = vadd.f32 %v4698_v54, %v4281_v40  ;;  %v2173_v40 = vld [vmem:[%s4018_s26 + $0xa5] sm:$0xff]  ;;  %v2174_v54 = vld [vmem:[%s4018_s26 + $0xad] sm:$0xff]  ;;  %v2459_v52 = vld [vmem:[%s4018_s26 + $0xb6] sm:$0xff] }
 0x23c   : > { %v1303_v0 = vadd.f32 %v1257_v10, %v1019_v53  ;;  %v1544_v34 = vpop.f32.mrf.mxu0  ;;  %v2206_v53 = vpack.c.bf16 %v2174_v54, %v2173_v40  ;;  %v2460_v40 = vld [vmem:[%s4018_s26 + $0xbe] sm:$0xff] }
 0x23d   : > { %3594 = vmatmul.msk.bf16.gmra.mxu1 %vm377_vm1, %v4797_v19 }
 0x23e   : > { %3613 = vmatmul.msk.bf16.gmra.mxu2 %vm377_vm1, %v4729_v6  ;;  %v4810_v31 = vadd.f32 %v1541_v63, %v1303_v0  ;;  %v3027_v63 = vld [vmem:[%s5355_s3 + $0x58] sm:$0xff] }
 0x23f   : > { %3635 = vmatmul.msk.bf16.gmra.mxu3 %vm377_vm1, %v2205_v49  ;;  %3657 = vmatmul.msk.bf16.gmra.mxu0 %vm377_vm1, %v2489_v36  ;;  %v2490_v49 = vpack.c.bf16 %v2458_v14, %v2457_v2  ;;  %v3031_v0 = vld [vmem:[%s5355_s3 + $0x78] sm:$0xff] }
 0x240   : > { %3114 = vperm.xlu2 %3760, %v3027_v63   ;;  %3134 = vperm.xlu0 %3758, %v3031_v0   ;;  %v1614_v63 = vld [vmem:[%s4018_s26 + $0xdc] sm:$0xff] }
 0x241   : > { %v976_v55 = vpop.f32.mrf.mxu2 }
 0x242   : > { %v1260_v58 = vpop.f32.mrf.mxu3  ;;  %v1020_v17 = vadd.f32 %v976_v55, %v734_v47  ;;  %v1740_v33 = vpop.f32.mrf.mxu1 }
 0x243   : > { %v4816_v23 = vadd.f32 %v1740_v33, %v4365_v16  ;;  %v3364_v16 = vld [vmem:[%s5356_s4 + $0x78] sm:$0xff]  ;;  %v3032_v33 = vld [vmem:[%s5355_s3 + $0x80] sm:$0xff] }
 0x244   : > { %v1304_v6 = vadd.f32 %v1260_v58, %v1020_v17  ;;  %v1546_v27 = vpop.f32.mrf.mxu0  ;;  %3366 = vmatpush.msrb.mxu1 %v3364_v16  ;;  %3139 = vperm.xlu1 %3759, %v3032_v33  }
 0x245   : > { %v1613_v27 = vld [vmem:[%s4018_s26 + $0xd4] sm:$0xff] }
 0x246   : > { %v4823_v8 = vadd.f32 %v1544_v34, %v1304_v6  ;;  %v4867_v14 = vpack.c.bf16 %v1614_v63, %v1613_v27  ;;  %v5367_v63 = vld [vmem:[#allocation6_spill] sm:$0xff] }
 0x249   : > { %v978_v21 = vpop.f32.mrf.mxu2 }
 0x24a   : > { %v1262_v48 = vpop.f32.mrf.mxu3  ;;  %v1743_v10 = vpop.f32.mrf.mxu1 }
 0x24b   : > { %v4835_v11 = vadd.f32 %v1743_v10, %v4373_v50 }
 0x24c   : > { %v2580_v36 = vpop.f32.mrf.mxu0 }
 0x24d   : > { %3595 = vmatmul.msk.bf16.gmra.mxu1 %vm377_vm1, %v4832_v9 }
 0x24e   : > { %3614 = vmatmul.msk.bf16.gmra.mxu2 %vm377_vm1, %v4763_v39  ;;  %v4853_v39 = vld [vmem:[%s5354_s2] ss:$0 sm:$0xff] }
 0x24f   : > { %3636 = vmatmul.msk.bf16.gmra.mxu3 %vm377_vm1, %v2206_v53  ;;  %3658 = vmatmul.msk.bf16.gmra.mxu0 %vm377_vm1, %v2490_v49  ;;  %v5366_v53 = vld [vmem:[#allocation5_spill] sm:$0xff] }
 0x251   : > { %v2012_v50 = vpop.f32.mrf.mxu2 }
 0x252   : > { %v2296_v34 = vpop.f32.mrf.mxu3  ;;  %v2116_v44 = vadd.f32 %v2012_v50, %v4732_v42  ;;  %v1745_v47 = vpop.f32.mrf.mxu1  ;;  %v2175_v42 = vld [vmem:[%s4018_s26 + $0xb5] sm:$0xff] }
 0x253   : > { %v4848_v55 = vadd.f32 %v1745_v47, %v4385_v30  ;;  %v2207_v48 = vpack.c.bf16 %v2176_v46, %v2175_v42  ;;  %v3060_v46 = vpop.permute.xlu0 %3059 }
 0x254   : > { %v2400_v58 = vadd.f32 %v2296_v34, %v2116_v44  ;;  %v2582_v17 = vpop.f32.mrf.mxu0  ;;  %v3030_v44 = vld [vmem:[%s5355_s3 + $0x70] sm:$0xff] }
 0x255   : > { %3129 = vperm.xlu2 %3760, %v3030_v44  }
 0x256   : > { %v2684_v6 = vadd.f32 %v2580_v36, %v2400_v58  ;;  %v2491_v36 = vpack.c.bf16 %v2460_v40, %v2459_v52  ;;  %v3363_v58 = vld [vmem:[%s5356_s4 + $0x70] sm:$0xff] }
 0x257   : > { %3367 = vmatpush.msrb.mxu1 %v3363_v58 }
 0x258   : > { %v4863_v30 = vadd.f32 %v4853_v39, %v2684_v6 }
 0x259   : > { %v2014_v54 = vpop.f32.mrf.mxu2 }
 0x25a   : > { %v2298_v2 = vpop.f32.mrf.mxu3  ;;  %v2117_v16 = vadd.f32 %v2014_v54, %v4748_v51  ;;  %v1748_v21 = vpop.f32.mrf.mxu1  ;;  %v2811_v10 = vmin.f32 %v4863_v30, 0.0  ;;  %vm2770_vm2 = vcmp.gt.f32.partialorder %v4863_v30, 0.0 }
 0x25b   : > { %v4872_v49 = vadd.f32 %v1748_v21, %v5366_v53  ;;  %v2178_v53 = vld [vmem:[%s4018_s26 + $0xcd] sm:$0xff] }
 0x25c   : > { %v2401_v0 = vadd.f32 %v2298_v2, %v2117_v16  ;;  %v2585_v50 = vpop.f32.mrf.mxu0  ;;  %v2852_v34 = vmul.f32 1.442695, %v2811_v10  ;;  %v3034_v2 = vld [vmem:[%s5355_s3 + $0x90] sm:$0xff]  ;;  %v2177_v10 = vld [vmem:[%s4018_s26 + $0xc5] sm:$0xff] }
 0x25d   : > { %3596 = vmatmul.msk.bf16.gmra.mxu1 %vm377_vm1, %v4867_v14  ;;  %3149 = vperm.xlu0 %3758, %v3034_v2  }
 0x25e   : > { %v2685_v51 = vadd.f32 %v2582_v17, %v2401_v0  ;;  %3615 = vmatmul.msk.bf16.gmra.mxu2 %vm377_vm1, %v4797_v19  ;;  %3762 = vpow2.f32 %v2852_v34  ;;  %v2461_v0 = vld [vmem:[%s4018_s26 + $0xc6] sm:$0xff]  ;;  %v2462_v34 = vld [vmem:[%s4018_s26 + $0xce] sm:$0xff] }
 0x25f   : > { %3637 = vmatmul.msk.bf16.gmra.mxu3 %vm377_vm1, %v2207_v48  ;;  %3659 = vmatmul.msk.bf16.gmra.mxu0 %vm377_vm1, %v2491_v36  ;;  %v1616_v48 = vld [vmem:[%s4018_s26 + $0xec] sm:$0xff] }
 0x260   : > { %v2730_v47 = vadd.f32 %v4853_v39, %v2685_v51 }
 0x261   : > { %v2017_v33 = vpop.f32.mrf.mxu2 }
 0x262   : > { %v2301_v6 = vpop.f32.mrf.mxu3  ;;  %v2118_v17 = vadd.f32 %v2017_v33, %v4766_v41  ;;  %v1750_v19 = vpop.f32.mrf.mxu1  ;;  %v2812_v27 = vmin.f32 %v2730_v47, 0.0  ;;  %v1615_v41 = vld [vmem:[%s4018_s26 + $0xe4] sm:$0xff]  ;;  %vm2771_vm3 = vcmp.gt.f32.partialorder %v2730_v47, 0.0 }
 0x263   : > { %v4889_v42 = vadd.f32 %v1750_v19, %v5367_v63  ;;  %v4901_v33 = vpack.c.bf16 %v1616_v48, %v1615_v41  ;;  %v2208_v19 = vpack.c.bf16 %v2178_v53, %v2177_v10  ;;  %v2492_v63 = vpack.c.bf16 %v2462_v34, %v2461_v0 }
 0x264   : > { %v2402_v52 = vadd.f32 %v2301_v6, %v2118_v17  ;;  %v2587_v40 = vpop.f32.mrf.mxu0  ;;  %v2854_v54 = vmul.f32 1.442695, %v2812_v27  ;;  %v3763_v16 = vpop.eup %3762 }
 0x265   : > { %v3671_v44 = vadd.f32 -1.0, %v3763_v16  ;;  %v3035_v16 = vld [vmem:[%s5355_s3 + $0x98] sm:$0xff] }
 0x266   : > { %v2686_v21 = vadd.f32 %v2585_v50, %v2402_v52  ;;  %3764 = vpow2.f32 %v2854_v54  ;;  %3154 = vperm.xlu1 %3759, %v3035_v16   ;;  %v1618_v16 = vld [vmem:[%s4018_s26 + $0xfc] sm:$0xff] }
 0x267   : > { %v2975_v41 = vsel %vm2770_vm2, %v4863_v30, %v3671_v44 }
 0x268   : > { %v2731_v36 = vadd.f32 %v4853_v39, %v2686_v21  ;;  %v3262_v53 = vmul.f32 %v3060_v46, %v2975_v41 }
 0x269   : > { %v2019_v51 = vpop.f32.mrf.mxu2 }
 0x26a   : > { %v2303_v58 = vpop.f32.mrf.mxu3  ;;  %v2119_v6 = vadd.f32 %v2019_v51, %v4782_v28  ;;  %v1753_v17 = vpop.f32.mrf.mxu1  ;;  %v2813_v27 = vmin.f32 %v2731_v36, 0.0  ;;  %vm2772_vm4 = vcmp.gt.f32.partialorder %v2731_v36, 0.0 }
 0x26b   : > { %v4905_v50 = vadd.f32 %v1753_v17, %v4413_v24  ;;  %v3065_v28 = vpop.permute.xlu0 %3064 }
 0x26c   : > { %v3765_v52 = vpop.eup %3764  ;;  %v2403_v54 = vadd.f32 %v2303_v58, %v2119_v6  ;;  %v2590_v2 = vpop.f32.mrf.mxu0  ;;  %v2856_v21 = vmul.f32 1.442695, %v2813_v27  ;;  %v5368_v6 = vld [vmem:[#allocation7_spill] sm:$0xff] }
 0x26d   : > { %3597 = vmatmul.msk.bf16.gmra.mxu1 %vm377_vm1, %v4901_v33  ;;  %v3672_v48 = vadd.f32 -1.0, %v3765_v52  ;;  %v3033_v52 = vld [vmem:[%s5355_s3 + $0x88] sm:$0xff] }
 0x26e   : > { %v2687_v24 = vadd.f32 %v2587_v40, %v2403_v54  ;;  %3616 = vmatmul.msk.bf16.gmra.mxu2 %vm377_vm1, %v4832_v9  ;;  %3766 = vpow2.f32 %v2856_v21  ;;  %3144 = vperm.xlu2 %3760, %v3033_v52   ;;  %v1617_v21 = vld [vmem:[%s4018_s26 + $0xf4] sm:$0xff] }
 0x26f   : > { %3638 = vmatmul.msk.bf16.gmra.mxu3 %vm377_vm1, %v2208_v19  ;;  %v2976_v10 = vsel %vm2771_vm3, %v2730_v47, %v3672_v48  ;;  %3660 = vmatmul.msk.bf16.gmra.mxu0 %vm377_vm1, %v2492_v63  ;;  %v3070_v47 = vpop.permute.xlu1 %3069  ;;  %v2180_v48 = vld [vmem:[%s4018_s26 + $0xdd] sm:$0xff] }
 0x270   : > { %v2732_v30 = vadd.f32 %v4853_v39, %v2687_v24  ;;  %v3263_v0 = vmul.f32 %v3065_v28, %v2976_v10  ;;  %v2179_v28 = vld [vmem:[%s4018_s26 + $0xd5] sm:$0xff] }
 0x271   : > { %v2022_v34 = vpop.f32.mrf.mxu2 }
 0x272   : > { %v2306_v44 = vpop.f32.mrf.mxu3  ;;  %v3303_v51 = vadd.f32 %v3263_v0, %v3262_v53  ;;  %v2120_v40 = vadd.f32 %v2022_v34, %v4800_v7  ;;  %v1755_v58 = vpop.f32.mrf.mxu1  ;;  %v2814_v9 = vmin.f32 %v2732_v30, 0.0  ;;  %v2463_v53 = vld [vmem:[%s4018_s26 + $0xd6] sm:$0xff]  ;;  %v2464_v0 = vld [vmem:[%s4018_s26 + $0xde] sm:$0xff]  ;;  %v3362_v34 = vld [vmem:[%s5356_s4 + $0x68] sm:$0xff]  ;;  %vm2773_vm5 = vcmp.gt.f32.partialorder %v2732_v30, 0.0 }
 0x273   : > { %v4921_v17 = vadd.f32 %v1755_v58, %v5368_v6  ;;  %v4936_v58 = vpack.c.bf16 %v1618_v16, %v1617_v21  ;;  %3368 = vmatpush.msrb.mxu1 %v3362_v34  ;;  %v2209_v6 = vpack.c.bf16 %v2180_v48, %v2179_v28 }
 0x274   : > { %v3767_v19 = vpop.eup %3766  ;;  %v2404_v46 = vadd.f32 %v2306_v44, %v2120_v40  ;;  %v2592_v27 = vpop.f32.mrf.mxu0  ;;  %v2858_v63 = vmul.f32 1.442695, %v2814_v9 }
 0x275   : > { %v3673_v54 = vadd.f32 -1.0, %v3767_v19 }
 0x276   : > { %v2688_v7 = vadd.f32 %v2590_v2, %v2404_v46  ;;  %3768 = vpow2.f32 %v2858_v63  ;;  %v2493_v63 = vpack.c.bf16 %v2464_v0, %v2463_v53 }
 0x277   : > { %v2977_v41 = vsel %vm2772_vm4, %v2731_v36, %v3673_v54 }
 0x278   : > { %v2733_v24 = vadd.f32 %v4853_v39, %v2688_v7  ;;  %v3264_v10 = vmul.f32 %v3070_v47, %v2977_v41  ;;  %v3037_v47 = vld [vmem:[%s5355_s3 + $0xa8] sm:$0xff] }
 0x279   : > { %v2024_v44 = vpop.f32.mrf.mxu2  ;;  %3164 = vperm.xlu0 %3758, %v3037_v47  }
 0x27a   : > { %v2308_v40 = vpop.f32.mrf.mxu3  ;;  %v3304_v2 = vadd.f32 %v3303_v51, %v3264_v10  ;;  %v2121_v9 = vadd.f32 %v2024_v44, %v4816_v23  ;;  %v1758_v36 = vpop.f32.mrf.mxu1  ;;  %v2815_v19 = vmin.f32 %v2733_v24, 0.0  ;;  %v3038_v23 = vld [vmem:[%s5355_s3 + $0xb0] sm:$0xff]  ;;  %vm2774_vm6 = vcmp.gt.f32.partialorder %v2733_v24, 0.0 }
 0x27b   : > { %v4943_v46 = vadd.f32 %v1758_v36, %v4434_v60  ;;  %v3075_v51 = vpop.permute.xlu1 %3074  ;;  %3169 = vperm.xlu1 %3759, %v3038_v23  }
 0x27c   : > { %v3769_v52 = vpop.eup %3768  ;;  %v2405_v54 = vadd.f32 %v2308_v40, %v2121_v9  ;;  %v2595_v7 = vpop.f32.mrf.mxu0  ;;  %v2860_v21 = vmul.f32 1.442695, %v2815_v19 }
 0x27d   : > { %3598 = vmatmul.msk.bf16.gmra.mxu1 %vm377_vm1, %v4936_v58  ;;  %v3674_v16 = vadd.f32 -1.0, %v3769_v52  ;;  %v3080_v40 = vpop.permute.xlu2 %3079 }
 0x27e   : > { %v2689_v41 = vadd.f32 %v2592_v27, %v2405_v54  ;;  %3617 = vmatmul.msk.bf16.gmra.mxu2 %vm377_vm1, %v4867_v14  ;;  %3770 = vpow2.f32 %v2860_v21  ;;  %v3040_v14 = vld [vmem:[%s5355_s3 + $0xc0] sm:$0xff]  ;;  %v2182_v21 = vld [vmem:[%s4018_s26 + $0xed] sm:$0xff] }
 0x27f   : > { %3639 = vmatmul.msk.bf16.gmra.mxu3 %vm377_vm1, %v2209_v6  ;;  %v2978_v60 = vsel %vm2773_vm5, %v2732_v30, %v3674_v16  ;;  %3661 = vmatmul.msk.bf16.gmra.mxu0 %vm377_vm1, %v2493_v63  ;;  %v3041_v6 = vld [vmem:[%s5355_s3 + $0xc8] sm:$0xff] }
 0x280   : > { %v2734_v28 = vadd.f32 %v4853_v39, %v2689_v41  ;;  %v3265_v48 = vmul.f32 %v3075_v51, %v2978_v60  ;;  %v1620_v63 = vld [vmem:[%s4018_s26 + $0x10c] sm:$0xff] }
 0x281   : > { %v2027_v10 = vpop.f32.mrf.mxu2  ;;  %3179 = vperm.xlu0 %3758, %v3040_v14   ;;  %v2181_v54 = vld [vmem:[%s4018_s26 + $0xe5] sm:$0xff]  ;;  %v2466_v41 = vld [vmem:[%s4018_s26 + $0xee] sm:$0xff]  ;;  %v3043_v14 = vld [vmem:[%s5355_s3 + $0xd8] sm:$0xff] }
 0x282   : > { %v2311_v53 = vpop.f32.mrf.mxu3  ;;  %v3305_v0 = vadd.f32 %v3304_v2, %v3265_v48  ;;  %v2122_v34 = vadd.f32 %v2027_v10, %v4835_v11  ;;  %v1760_v27 = vpop.f32.mrf.mxu1  ;;  %v2816_v44 = vmin.f32 %v2734_v28, 0.0  ;;  %v2465_v16 = vld [vmem:[%s4018_s26 + $0xe6] sm:$0xff]  ;;  %vm2775_vm7 = vcmp.gt.f32.partialorder %v2734_v28, 0.0 }
 0x283   : > { %v4960_v30 = vadd.f32 %v1760_v27, %v4447_v59  ;;  %3184 = vperm.xlu1 %3759, %v3041_v6   ;;  %v1619_v59 = vld [vmem:[%s4018_s26 + $0x104] sm:$0xff]  ;;  %v2210_v27 = vpack.c.bf16 %v2182_v21, %v2181_v54 }
 0x284   : > { %v3771_v9 = vpop.eup %3770  ;;  %v2406_v36 = vadd.f32 %v2311_v53, %v2122_v34  ;;  %v2597_v2 = vpop.f32.mrf.mxu0  ;;  %v2862_v11 = vmul.f32 1.442695, %v2816_v44  ;;  %v4972_v10 = vpack.c.bf16 %v1620_v63, %v1619_v59  ;;  %v3036_v6 = vld [vmem:[%s5355_s3 + $0xa0] sm:$0xff] }
 0x285   : > { %v3675_v19 = vadd.f32 -1.0, %v3771_v9  ;;  %v2494_v9 = vpack.c.bf16 %v2466_v41, %v2465_v16  ;;  %3159 = vperm.xlu2 %3760, %v3036_v6  }
 0x286   : > { %v2690_v47 = vadd.f32 %v2595_v7, %v2406_v36  ;;  %3772 = vpow2.f32 %v2862_v11 }
 0x287   : > { %v2979_v52 = vsel %vm2774_vm6, %v2733_v24, %v3675_v19  ;;  %v3361_v24 = vld [vmem:[%s5356_s4 + $0x60] sm:$0xff] }
 0x288   : > { %v2735_v23 = vadd.f32 %v4853_v39, %v2690_v47  ;;  %v3266_v51 = vmul.f32 %v3080_v40, %v2979_v52  ;;  %3369 = vmatpush.msrb.mxu1 %v3361_v24  ;;  %v3044_v19 = vld [vmem:[%s5355_s3 + $0xe0] sm:$0xff] }
 0x289   : > { %v2029_v60 = vpop.f32.mrf.mxu2  ;;  %3194 = vperm.xlu0 %3758, %v3043_v14   ;;  %v1621_v14 = vld [vmem:[%s4018_s26 + $0x114] sm:$0xff] }
 0x28a   : > { %v2313_v48 = vpop.f32.mrf.mxu3  ;;  %v3306_v53 = vadd.f32 %v3305_v0, %v3266_v51  ;;  %v2123_v34 = vadd.f32 %v2029_v60, %v4848_v55  ;;  %v1763_v7 = vpop.f32.mrf.mxu1  ;;  %v2817_v44 = vmin.f32 %v2735_v23, 0.0  ;;  %v3046_v60 = vld [vmem:[%s5355_s3 + $0xf0] sm:$0xff]  ;;  %vm2776_vm8 = vcmp.gt.f32.partialorder %v2735_v23, 0.0 }
 0x28b   : > { %v4982_v40 = vadd.f32 %v1763_v7, %v4456_v22  ;;  %v3085_v22 = vpop.permute.xlu2 %3084  ;;  %3199 = vperm.xlu1 %3759, %v3044_v19   ;;  %v2467_v19 = vld [vmem:[%s4018_s26 + $0xf6] sm:$0xff] }
 0x28c   : > { %v3773_v0 = vpop.eup %3772  ;;  %v2407_v36 = vadd.f32 %v2313_v48, %v2123_v34  ;;  %v2600_v55 = vpop.f32.mrf.mxu0  ;;  %v2864_v11 = vmul.f32 1.442695, %v2817_v44 }
 0x28d   : > { %3599 = vmatmul.msk.bf16.gmra.mxu1 %vm377_vm1, %v4972_v10  ;;  %v3676_v47 = vadd.f32 -1.0, %v3773_v0  ;;  %v2183_v0 = vld [vmem:[%s4018_s26 + $0xf5] sm:$0xff] }
 0x28e   : > { %v2691_v59 = vadd.f32 %v2597_v2, %v2407_v36  ;;  %3618 = vmatmul.msk.bf16.gmra.mxu2 %vm377_vm1, %v4901_v33  ;;  %3774 = vpow2.f32 %v2864_v11  ;;  %v2184_v36 = vld [vmem:[%s4018_s26 + $0xfd] sm:$0xff] }
 0x28f   : > { %3640 = vmatmul.msk.bf16.gmra.mxu3 %vm377_vm1, %v2210_v27  ;;  %v2980_v63 = vsel %vm2775_vm7, %v2734_v28, %v3676_v47  ;;  %3662 = vmatmul.msk.bf16.gmra.mxu0 %vm377_vm1, %v2494_v9  ;;  %v3090_v27 = vpop.permute.xlu0 %3089  ;;  %v1622_v9 = vld [vmem:[%s4018_s26 + $0x11c] sm:$0xff] }
 0x290   : > { %v2736_v52 = vadd.f32 %v4853_v39, %v2691_v59  ;;  %v3267_v54 = vmul.f32 %v3085_v22, %v2980_v63  ;;  %v2468_v22 = vld [vmem:[%s4018_s26 + $0xfe] sm:$0xff]  ;;  %v5014_v63 = vpack.c.bf16 %v1622_v9, %v1621_v14 }
 0x291   : > { %v2032_v21 = vpop.f32.mrf.mxu2  ;;  %3209 = vperm.xlu0 %3758, %v3046_v60   ;;  %v3360_v14 = vld [vmem:[%s5356_s4 + $0x58] sm:$0xff] }
 0x292   : > { %v2316_v51 = vpop.f32.mrf.mxu3  ;;  %v3307_v16 = vadd.f32 %v3306_v53, %v3267_v54  ;;  %v2124_v2 = vadd.f32 %v2032_v21, %v4872_v49  ;;  %v1765_v41 = vpop.f32.mrf.mxu1  ;;  %v2818_v33 = vmin.f32 %v2736_v52, 0.0  ;;  %v3047_v49 = vld [vmem:[%s5355_s3 + $0xf8] sm:$0xff]  ;;  %vm2777_vm9 = vcmp.gt.f32.partialorder %v2736_v52, 0.0  ;;  %3370 = vmatpush.msrb.mxu1 %v3360_v14 }
 0x293   : > { %v5002_v28 = vadd.f32 %v1765_v41, %v4469_v12  ;;  %3214 = vperm.xlu1 %3759, %v3047_v49  }
 0x294   : > { %v3775_v48 = vpop.eup %3774  ;;  %v2408_v34 = vadd.f32 %v2316_v51, %v2124_v2  ;;  %v2602_v7 = vpop.f32.mrf.mxu0  ;;  %v2866_v53 = vmul.f32 1.442695, %v2818_v33  ;;  %v2211_v51 = vpack.c.bf16 %v2184_v36, %v2183_v0  ;;  %v2495_v33 = vpack.c.bf16 %v2468_v22, %v2467_v19 }
 0x295   : > { %v3677_v44 = vadd.f32 -1.0, %v3775_v48 }
 0x296   : > { %v2692_v24 = vadd.f32 %v2600_v55, %v2408_v34  ;;  %3776 = vpow2.f32 %v2866_v53 }
 0x297   : > { %v2981_v12 = vsel %vm2776_vm8, %v2735_v23, %v3677_v44  ;;  %v3049_v23 = vld [vmem:[%s5355_s3 + $0x108] sm:$0xff] }
 0x298   : > { %v2737_v11 = vadd.f32 %v4853_v39, %v2692_v24  ;;  %v3268_v6 = vmul.f32 %v3090_v27, %v2981_v12 }
 0x299   : > { %v2034_v47 = vpop.f32.mrf.mxu2  ;;  %3224 = vperm.xlu0 %3758, %v3049_v23   ;;  %v1624_v23 = vld [vmem:[%s4018_s26 + $0x12c] sm:$0xff] }
 0x29a   : > { %v2318_v59 = vpop.f32.mrf.mxu3  ;;  %v3308_v54 = vadd.f32 %v3307_v16, %v3268_v6  ;;  %v2125_v55 = vadd.f32 %v2034_v47, %v4889_v42  ;;  %v1768_v21 = vpop.f32.mrf.mxu1  ;;  %v2819_v2 = vmin.f32 %v2737_v11, 0.0  ;;  %v3050_v42 = vld [vmem:[%s5355_s3 + $0x110] sm:$0xff]  ;;  %v3052_v6 = vld [vmem:[%s5355_s3 + $0x120] sm:$0xff]  ;;  %vm2778_vm10 = vcmp.gt.f32.partialorder %v2737_v11, 0.0 }
 0x29b   : > { %v5021_v41 = vadd.f32 %v1768_v21, %v4477_v43  ;;  %v3095_v16 = vpop.permute.xlu1 %3094  ;;  %3229 = vperm.xlu1 %3759, %v3050_v42   ;;  %v2469_v42 = vld [vmem:[%s4018_s26 + $0x106] sm:$0xff] }
 0x29c   : > { %v3777_v60 = vpop.eup %3776  ;;  %v2409_v48 = vadd.f32 %v2318_v59, %v2125_v55  ;;  %v2605_v34 = vpop.f32.mrf.mxu0  ;;  %v2868_v53 = vmul.f32 1.442695, %v2819_v2  ;;  %v1623_v2 = vld [vmem:[%s4018_s26 + $0x124] sm:$0xff] }
 0x29d   : > { %3600 = vmatmul.msk.bf16.gmra.mxu1 %vm377_vm1, %v5014_v63  ;;  %v3678_v49 = vadd.f32 -1.0, %v3777_v60  ;;  %v3100_v55 = vpop.permute.xlu2 %3099  ;;  %v2186_v60 = vld [vmem:[%s4018_s26 + $0x10d] sm:$0xff] }
 0x29e   : > { %v2693_v27 = vadd.f32 %v2602_v7, %v2409_v48  ;;  %3619 = vmatmul.msk.bf16.gmra.mxu2 %vm377_vm1, %v4936_v58  ;;  %3778 = vpow2.f32 %v2868_v53  ;;  %v3039_v7 = vld [vmem:[%s5355_s3 + $0xb8] sm:$0xff] }
 0x29f   : > { %3641 = vmatmul.msk.bf16.gmra.mxu3 %vm377_vm1, %v2211_v51  ;;  %v2982_v43 = vsel %vm2777_vm9, %v2736_v52, %v3678_v49  ;;  %3663 = vmatmul.msk.bf16.gmra.mxu0 %vm377_vm1, %v2495_v33  ;;  %v2185_v33 = vld [vmem:[%s4018_s26 + $0x105] sm:$0xff]  ;;  %v3042_v49 = vld [vmem:[%s5355_s3 + $0xd0] sm:$0xff] }
 0x2a0   : > { %v2738_v44 = vadd.f32 %v4853_v39, %v2693_v27  ;;  %v3269_v24 = vmul.f32 %v3095_v16, %v2982_v43  ;;  %3174 = vperm.xlu2 %3760, %v3039_v7   ;;  %v2470_v16 = vld [vmem:[%s4018_s26 + $0x10e] sm:$0xff]  ;;  %v2212_v7 = vpack.c.bf16 %v2186_v60, %v2185_v33 }
 0x2a1   : > { %v2037_v58 = vpop.f32.mrf.mxu2  ;;  %3239 = vperm.xlu0 %3758, %v3052_v6  }
 0x2a2   : > { %v2321_v9 = vpop.f32.mrf.mxu3  ;;  %v3309_v12 = vadd.f32 %v3308_v54, %v3269_v24  ;;  %v2126_v52 = vadd.f32 %v2037_v58, %v4905_v50  ;;  %v1770_v0 = vpop.f32.mrf.mxu1  ;;  %v2820_v36 = vmin.f32 %v2738_v44, 0.0  ;;  %v3053_v50 = vld [vmem:[%s5355_s3 + $0x128] sm:$0xff]  ;;  %vm2779_vm11 = vcmp.gt.f32.partialorder %v2738_v44, 0.0 }
 0x2a3   : > { %v5044_v19 = vadd.f32 %v1770_v0, %v4490_v29  ;;  %3244 = vperm.xlu1 %3759, %v3053_v50  }
 0x2a4   : > { %v3779_v22 = vpop.eup %3778  ;;  %v2410_v47 = vadd.f32 %v2321_v9, %v2126_v52  ;;  %v2607_v59 = vpop.f32.mrf.mxu0  ;;  %v2870_v54 = vmul.f32 1.442695, %v2820_v36  ;;  %v3055_v9 = vld [vmem:[%s5355_s3 + $0x138] sm:$0xff]  ;;  %v2496_v52 = vpack.c.bf16 %v2470_v16, %v2469_v42 }
 0x2a5   : > { %v3679_v21 = vadd.f32 -1.0, %v3779_v22 }
 0x2a6   : > { %v2694_v51 = vadd.f32 %v2605_v34, %v2410_v47  ;;  %3780 = vpow2.f32 %v2870_v54  ;;  %v5059_v34 = vpack.c.bf16 %v1624_v23, %v1623_v2 }
 0x2a7   : > { %v2983_v29 = vsel %vm2778_vm10, %v2737_v11, %v3679_v21 }
 0x2a8   : > { %v2739_v48 = vadd.f32 %v4853_v39, %v2694_v51  ;;  %v3270_v53 = vmul.f32 %v3100_v55, %v2983_v29  ;;  %3189 = vperm.xlu2 %3760, %v3042_v49   ;;  %v3045_v51 = vld [vmem:[%s5355_s3 + $0xe8] sm:$0xff]  ;;  %v3110_v49 = vpop.permute.xlu1 %3109 }
 0x2a9   : > { %v2039_v27 = vpop.f32.mrf.mxu2  ;;  %3254 = vperm.xlu0 %3758, %v3055_v9   ;;  %v2471_v9 = vld [vmem:[%s4018_s26 + $0x116] sm:$0xff] }
 0x2aa   : > { %v2323_v43 = vpop.f32.mrf.mxu3  ;;  %v3310_v24 = vadd.f32 %v3309_v12, %v3270_v53  ;;  %v2127_v11 = vadd.f32 %v2039_v27, %v4921_v17  ;;  %v5062_v14 = vpop.f32.mrf.mxu1  ;;  %v2821_v58 = vmin.f32 %v2739_v48, 0.0  ;;  %v3056_v12 = vld [vmem:[%s5355_s3 + $0x140] sm:$0xff]  ;;  %vm2780_vm12 = vcmp.gt.f32.partialorder %v2739_v48, 0.0 }
 0x2ab   : > { %v3105_v17 = vpop.permute.xlu0 %3104  ;;  %3259 = vperm.xlu1 %3759, %v3056_v12  }
 0x2ac   : > { %v3781_v0 = vpop.eup %3780  ;;  %v2411_v36 = vadd.f32 %v2323_v43, %v2127_v11  ;;  %v2610_v6 = vpop.f32.mrf.mxu0  ;;  %v2872_v22 = vmul.f32 1.442695, %v2821_v58  ;;  %v1626_v11 = vld [vmem:[%s4018_s26 + $0x13c] sm:$0xff] }
 0x2ad   : > { %3601 = vmatmul.msk.bf16.gmra.mxu1 %vm377_vm1, %v5059_v34  ;;  %v3680_v47 = vadd.f32 -1.0, %v3781_v0  ;;  %v2188_v58 = vld [vmem:[%s4018_s26 + $0x11d] sm:$0xff] }
 0x2ae   : > { %v2695_v54 = vadd.f32 %v2607_v59, %v2411_v36  ;;  %3620 = vmatmul.msk.bf16.gmra.mxu2 %vm377_vm1, %v4972_v10  ;;  %3782 = vpow2.f32 %v2872_v22  ;;  %v2472_v0 = vld [vmem:[%s4018_s26 + $0x11e] sm:$0xff]  ;;  %v3359_v36 = vld [vmem:[%s5356_s4 + $0x50] sm:$0xff] }
 0x2af   : > { %3642 = vmatmul.msk.bf16.gmra.mxu3 %vm377_vm1, %v2212_v7  ;;  %v2984_v50 = vsel %vm2779_vm11, %v2738_v44, %v3680_v47  ;;  %3664 = vmatmul.msk.bf16.gmra.mxu0 %vm377_vm1, %v2496_v52  ;;  %v2187_v7 = vld [vmem:[%s4018_s26 + $0x115] sm:$0xff] }
 0x2b0   : > { %v2740_v55 = vadd.f32 %v4853_v39, %v2695_v54  ;;  %v3271_v21 = vmul.f32 %v3105_v17, %v2984_v50  ;;  %3204 = vperm.xlu2 %3760, %v3045_v51   ;;  %3371 = vmatpush.msrb.mxu1 %v3359_v36  ;;  %v2213_v50 = vpack.c.bf16 %v2188_v58, %v2187_v7 }
 0x2b1   : > { %v2042_v2 = vpop.f32.mrf.mxu2 }
 0x2b2   : > { %v2326_v59 = vpop.f32.mrf.mxu3  ;;  %v3311_v10 = vadd.f32 %v3310_v24, %v3271_v21  ;;  %v2128_v23 = vadd.f32 %v2042_v2, %v4943_v46  ;;  %v1775_v44 = vpop.f32.mrf.mxu1  ;;  %v2822_v29 = vmin.f32 %v2740_v55, 0.0  ;;  %v1625_v24 = vld [vmem:[%s4018_s26 + $0x134] sm:$0xff]  ;;  %v2497_v2 = vpack.c.bf16 %v2472_v0, %v2471_v9 }
 0x2b3   : > { %v5082_v33 = vadd.f32 %v1775_v44, %v4512_v3  ;;  %v5097_v17 = vpack.c.bf16 %v1626_v11, %v1625_v24  ;;  %vm2781_vm13 = vcmp.gt.f32.partialorder %v2740_v55, 0.0 }
 0x2b4   : > { %v3783_v60 = vpop.eup %3782  ;;  %v2412_v53 = vadd.f32 %v2326_v59, %v2128_v23  ;;  %v2612_v42 = vpop.f32.mrf.mxu0  ;;  %v2874_v16 = vmul.f32 1.442695, %v2822_v29 }
 0x2b5   : > { %v3681_v27 = vadd.f32 -1.0, %v3783_v60  ;;  %v3115_v60 = vpop.permute.xlu2 %3114 }
 0x2b6   : > { %v2696_v43 = vadd.f32 %v2610_v6, %v2412_v53  ;;  %3784 = vpow2.f32 %v2874_v16  ;;  %v3048_v6 = vld [vmem:[%s5355_s3 + $0x100] sm:$0xff] }
 0x2b7   : > { %v2985_v46 = vsel %vm2780_vm12, %v2739_v48, %v3681_v27 }
 0x2b8   : > { %v2741_v52 = vadd.f32 %v4853_v39, %v2696_v43  ;;  %v3272_v3 = vmul.f32 %v3110_v49, %v2985_v46  ;;  %3219 = vperm.xlu2 %3760, %v3048_v6   ;;  %v3051_v49 = vld [vmem:[%s5355_s3 + $0x118] sm:$0xff]  ;;  %v1627_v6 = vld [vmem:[%s4018_s26 + $0x144] sm:$0xff] }
 0x2b9   : > { %v2044_v22 = vpop.f32.mrf.mxu2 }
 0x2ba   : > { %v2328_v12 = vpop.f32.mrf.mxu3  ;;  %v3312_v48 = vadd.f32 %v3311_v10, %v3272_v3  ;;  %v2129_v47 = vadd.f32 %v2044_v22, %v4960_v30  ;;  %v1778_v54 = vpop.f32.mrf.mxu1  ;;  %v2823_v21 = vmin.f32 %v2741_v52, 0.0  ;;  %vm2782_vm14 = vcmp.gt.f32.partialorder %v2741_v52, 0.0  ;;  %v1628_v22 = vld [vmem:[%s4018_s26 + $0x14c] sm:$0xff] }
 0x2bb   : > { %v5101_v51 = vadd.f32 %v1778_v54, %v4521_v1  ;;  %v3120_v3 = vpop.permute.xlu0 %3119 }
 0x2bc   : > { %v3785_v59 = vpop.eup %3784  ;;  %v2413_v23 = vadd.f32 %v2328_v12, %v2129_v47  ;;  %v2615_v44 = vpop.f32.mrf.mxu0  ;;  %v2876_v29 = vmul.f32 1.442695, %v2823_v21  ;;  %v2189_v12 = vld [vmem:[%s4018_s26 + $0x125] sm:$0xff] }
 0x2bd   : > { %3602 = vmatmul.msk.bf16.gmra.mxu1 %vm377_vm1, %v5097_v17  ;;  %v3682_v53 = vadd.f32 -1.0, %v3785_v59  ;;  %v2473_v47 = vld [vmem:[%s4018_s26 + $0x126] sm:$0xff] }
 0x2be   : > { %v2697_v16 = vadd.f32 %v2612_v42, %v2413_v23  ;;  %3621 = vmatmul.msk.bf16.gmra.mxu2 %vm377_vm1, %v5014_v63  ;;  %3786 = vpow2.f32 %v2876_v29  ;;  %v3358_v21 = vld [vmem:[%s5356_s4 + $0x48] sm:$0xff] }
 0x2bf   : > { %3643 = vmatmul.msk.bf16.gmra.mxu3 %vm377_vm1, %v2213_v50  ;;  %v2986_v1 = vsel %vm2781_vm13, %v2740_v55, %v3682_v53  ;;  %3665 = vmatmul.msk.bf16.gmra.mxu0 %vm377_vm1, %v2497_v2  ;;  %v2474_v50 = vld [vmem:[%s4018_s26 + $0x12e] sm:$0xff] }
 0x2c0   : > { %v2742_v30 = vadd.f32 %v4853_v39, %v2697_v16  ;;  %v3273_v10 = vmul.f32 %v3115_v60, %v2986_v1  ;;  %3234 = vperm.xlu2 %3760, %v3051_v49   ;;  %v3054_v2 = vld [vmem:[%s5355_s3 + $0x130] sm:$0xff]  ;;  %3372 = vmatpush.msrb.mxu1 %v3358_v21 }
 0x2c1   : > { %v2047_v27 = vpop.f32.mrf.mxu2  ;;  %v2191_v21 = vld [vmem:[%s4018_s26 + $0x135] sm:$0xff] }
 0x2c2   : > { %v2331_v42 = vpop.f32.mrf.mxu3  ;;  %v3313_v63 = vadd.f32 %v3312_v48, %v3273_v10  ;;  %v2130_v43 = vadd.f32 %v2047_v27, %v4982_v40  ;;  %v1780_v24 = vpop.f32.mrf.mxu1  ;;  %v2824_v55 = vmin.f32 %v2742_v30, 0.0  ;;  %v2190_v48 = vld [vmem:[%s4018_s26 + $0x12d] sm:$0xff]  ;;  %v2498_v10 = vpack.c.bf16 %v2474_v50, %v2473_v47 }
 0x2c3   : > { %v5115_v11 = vadd.f32 %v1780_v24, %v4537_v20  ;;  %v2214_v53 = vpack.c.bf16 %v2190_v48, %v2189_v12  ;;  %v3125_v24 = vpop.permute.xlu1 %3124  ;;  %vm2783_vm15 = vcmp.gt.f32.partialorder %v2742_v30, 0.0  ;;  %v3130_v48 = vpop.permute.xlu2 %3129  ;;  %v5148_v50 = vld [vmem:[%s4018_s26 + $0x154] sm:$0xff] }
 0x2c4   : > { %v3787_v46 = vpop.eup %3786  ;;  %v2414_v7 = vadd.f32 %v2331_v42, %v2130_v43  ;;  %v2617_v58 = vpop.f32.mrf.mxu0  ;;  %v2878_v9 = vmul.f32 1.442695, %v2824_v55 }
 0x2c5   : > { %v3683_v0 = vadd.f32 -1.0, %v3787_v46 }
 0x2c6   : > { %v2698_v36 = vadd.f32 %v2615_v44, %v2414_v7  ;;  %3788 = vpow2.f32 %v2878_v9  ;;  %v5130_v44 = vpack.c.bf16 %v1628_v22, %v1627_v6 }
 0x2c7   : > { %v2987_v40 = vsel %vm2782_vm14, %v2741_v52, %v3683_v0 }
 0x2c8   : > { %v2743_v54 = vadd.f32 %v4853_v39, %v2698_v36  ;;  %v3274_v20 = vmul.f32 %v3120_v3, %v2987_v40  ;;  %3249 = vperm.xlu2 %3760, %v3054_v2   ;;  %v5369_v36 = vld [vmem:[#allocation9_spill] sm:$0xff] }
 0x2c9   : > { %v2049_v59 = vpop.f32.mrf.mxu2  ;;  %v2192_v2 = vld [vmem:[%s4018_s26 + $0x13d] sm:$0xff] }
 0x2ca   : > { %v2333_v23 = vpop.f32.mrf.mxu3  ;;  %v3314_v52 = vadd.f32 %v3313_v63, %v3274_v20  ;;  %v2131_v29 = vadd.f32 %v2049_v59, %v5002_v28  ;;  %v1783_v60 = vpop.f32.mrf.mxu1  ;;  %v2825_v16 = vmin.f32 %v2743_v54, 0.0  ;;  %vm2784_vm0 = vcmp.gt.f32.partialorder %v2743_v54, 0.0 }
 0x2cb   : > { %v5134_v1 = vadd.f32 %v1783_v60, %v4546_v15 }
 0x2cc   : > { %v3789_v49 = vpop.eup %3788  ;;  %v2415_v27 = vadd.f32 %v2333_v23, %v2131_v29  ;;  %v2620_v42 = vpop.f32.mrf.mxu0  ;;  %v2880_v43 = vmul.f32 1.442695, %v2825_v16  ;;  %v2476_v29 = vld [vmem:[%s4018_s26 + $0x13e] sm:$0xff]  ;;  %v1650_v16 = vpack.c.bf16 %v5148_v50, %v5148_v50 }
 0x2cd   : > { %3603 = vmatmul.msk.bf16.gmra.mxu1 %vm377_vm1, %v5130_v44  ;;  %v3684_v55 = vadd.f32 -1.0, %v3789_v49 }
 0x2ce   : > { %v2699_v46 = vadd.f32 %v2617_v58, %v2415_v27  ;;  %3622 = vmatmul.msk.bf16.gmra.mxu2 %vm377_vm1, %v5059_v34  ;;  %3790 = vpow2.f32 %v2880_v43 }
 0x2cf   : > { %3644 = vmatmul.msk.bf16.gmra.mxu3 %vm377_vm1, %v2214_v53  ;;  %v2988_v15 = vsel %vm2783_vm15, %v2742_v30, %v3684_v55  ;;  %3666 = vmatmul.msk.bf16.gmra.mxu0 %vm377_vm1, %v2498_v10 }
 0x2d0   : > { %v2744_v28 = vadd.f32 %v4853_v39, %v2699_v46  ;;  %v3275_v63 = vmul.f32 %v3125_v24, %v2988_v15 }
 0x2d1   : > { %v2052_v7 = vpop.f32.mrf.mxu2 }
 0x2d2   : > { %v2336_v9 = vpop.f32.mrf.mxu3  ;;  %v3315_v3 = vadd.f32 %v3314_v52, %v3275_v63  ;;  %v2132_v58 = vadd.f32 %v2052_v7, %v5021_v41  ;;  %v1785_v0 = vpop.f32.mrf.mxu1  ;;  %v2826_v34 = vmin.f32 %v2744_v28, 0.0  ;;  %v2475_v52 = vld [vmem:[%s4018_s26 + $0x136] sm:$0xff]  ;;  %vm2785_vm2 = vcmp.gt.f32.partialorder %v2744_v28, 0.0 }
 0x2d3   : > { %v5145_v6 = vadd.f32 %v1785_v0, %v5369_v36  ;;  %v2499_v24 = vpack.c.bf16 %v2476_v29, %v2475_v52  ;;  %v3135_v7 = vpop.permute.xlu0 %3134  ;;  %v3357_v36 = vld [vmem:[%s5356_s4 + $0x40] sm:$0xff]  ;;  %v2194_v29 = vld [vmem:[%s4018_s26 + $0x14d] sm:$0xff] }
 0x2d4   : > { %v3791_v30 = vpop.eup %3790  ;;  %v2416_v22 = vadd.f32 %v2336_v9, %v2132_v58  ;;  %v2622_v40 = vpop.f32.mrf.mxu0  ;;  %v2882_v12 = vmul.f32 1.442695, %v2826_v34  ;;  %3373 = vmatpush.msrb.mxu1 %v3357_v36  ;;  %v2193_v52 = vld [vmem:[%s4018_s26 + $0x145] sm:$0xff] }
 0x2d5   : > { %v3685_v47 = vadd.f32 -1.0, %v3791_v30 }
 0x2d6   : > { %v2700_v20 = vadd.f32 %v2620_v42, %v2416_v22  ;;  %3792 = vpow2.f32 %v2882_v12  ;;  %v2215_v42 = vpack.c.bf16 %v2192_v2, %v2191_v21 }
 0x2d7   : > { %v2989_v41 = vsel %vm2784_vm0, %v2743_v54, %v3685_v47 }
 0x2d8   : > { %v2745_v59 = vadd.f32 %v4853_v39, %v2700_v20  ;;  %v3276_v23 = vmul.f32 %v3130_v48, %v2989_v41  ;;  %v3140_v41 = vpop.permute.xlu1 %3139 }
 0x2d9   : > { %v2054_v60 = vpop.f32.mrf.mxu2 }
 0x2da   : > { %v2338_v53 = vpop.f32.mrf.mxu3  ;;  %v3316_v10 = vadd.f32 %v3315_v3, %v3276_v23  ;;  %v2133_v49 = vadd.f32 %v2054_v60, %v5044_v19  ;;  %v1788_v27 = vpop.f32.mrf.mxu1  ;;  %v2827_v43 = vmin.f32 %v2745_v59, 0.0  ;;  %vm2786_vm3 = vcmp.gt.f32.partialorder %v2745_v59, 0.0  ;;  %v5180_v60 = vld [vmem:[%s5354_s2] ss:$0 sm:$0xff] }
 0x2db   : > { %v5159_v54 = vadd.f32 %v1788_v27, %v4569_v26  ;;  %v5370_v26 = vld [vmem:[#allocation8_spill] sm:$0xff] }
 0x2dc   : > { %v3793_v55 = vpop.eup %3792  ;;  %v2417_v46 = vadd.f32 %v2338_v53, %v2133_v49  ;;  %v2625_v15 = vpop.f32.mrf.mxu0  ;;  %v2884_v63 = vmul.f32 1.442695, %v2827_v43  ;;  %v1850_v3 = vadd.f32 %v5062_v14, %v5370_v26 }
 0x2dd   : > { %3604 = vmatmul.msk.bf16.gmra.mxu1 %vm377_vm1, %v1650_v16  ;;  %v3686_v9 = vadd.f32 -1.0, %v3793_v55  ;;  %v2477_v16 = vld [vmem:[%s4018_s26 + $0x146] sm:$0xff]  ;;  %v2216_v55 = vpack.c.bf16 %v2194_v29, %v2193_v52 }
 0x2de   : > { %v2701_v58 = vadd.f32 %v2622_v40, %v2417_v46  ;;  %3623 = vmatmul.msk.bf16.gmra.mxu2 %vm377_vm1, %v5097_v17  ;;  %3794 = vpow2.f32 %v2884_v63 }
 0x2df   : > { %3645 = vmatmul.msk.bf16.gmra.mxu3 %vm377_vm1, %v2215_v42  ;;  %v2990_v19 = vsel %vm2785_vm2, %v2744_v28, %v3686_v9  ;;  %3667 = vmatmul.msk.bf16.gmra.mxu0 %vm377_vm1, %v2499_v24 }
 0x2e0   : > { %v2746_v0 = vadd.f32 %v4853_v39, %v2701_v58  ;;  %v3277_v34 = vmul.f32 %v3135_v7, %v2990_v19  ;;  %v3145_v19 = vpop.permute.xlu2 %3144 }
 0x2e1   : > { %v2057_v30 = vpop.f32.mrf.mxu2 }
 0x2e2   : > { %v2341_v22 = vpop.f32.mrf.mxu3  ;;  %v3317_v17 = vadd.f32 %v3316_v10, %v3277_v34  ;;  %v2134_v40 = vadd.f32 %v2057_v30, %v1850_v3  ;;  %v1790_v28 = vpop.f32.mrf.mxu1  ;;  %v2828_v12 = vmin.f32 %v2746_v0, 0.0  ;;  %v2478_v10 = vld [vmem:[%s4018_s26 + $0x14e] sm:$0xff]  ;;  %vm2787_vm4 = vcmp.gt.f32.partialorder %v2746_v0, 0.0 }
 0x2e3   : > { %v5173_v48 = vadd.f32 %v1790_v28, %v4586_v61 }
 0x2e4   : > { %v3795_v14 = vpop.eup %3794  ;;  %v2418_v39 = vadd.f32 %v2341_v22, %v2134_v40  ;;  %v2627_v47 = vpop.f32.mrf.mxu0  ;;  %v2886_v20 = vmul.f32 1.442695, %v2828_v12 }
 0x2e5   : > { %v3687_v21 = vadd.f32 -1.0, %v3795_v14 }
 0x2e6   : > { %v2702_v2 = vadd.f32 %v2625_v15, %v2418_v39  ;;  %3796 = vpow2.f32 %v2886_v20  ;;  %v2500_v15 = vpack.c.bf16 %v2478_v10, %v2477_v16 }
 0x2e7   : > { %v2991_v23 = vsel %vm2786_vm3, %v2745_v59, %v3687_v21  ;;  %v1912_v21 = vld [vmem:[%s4018_s26 + $0x15c] sm:$0xff] }
 0x2e8   : > { %v2747_v61 = vadd.f32 %v5180_v60, %v2702_v2  ;;  %v3278_v53 = vmul.f32 %v3140_v41, %v2991_v23  ;;  %v2196_v23 = vld [vmem:[%s4018_s26 + $0x15d] sm:$0xff] }
 0x2e9   : > { %v2059_v49 = vpop.f32.mrf.mxu2 }
 0x2ea   : > { %v2343_v27 = vpop.f32.mrf.mxu3  ;;  %v3318_v42 = vadd.f32 %v3317_v17, %v3278_v53  ;;  %v2135_v43 = vadd.f32 %v2059_v49, %v5082_v33  ;;  %v1793_v24 = vpop.f32.mrf.mxu1  ;;  %v2829_v59 = vmin.f32 %v2747_v61, 0.0  ;;  %vm2788_vm5 = vcmp.gt.f32.partialorder %v2747_v61, 0.0  ;;  %v2480_v53 = vld [vmem:[%s4018_s26 + $0x15e] sm:$0xff] }
 0x2eb   : > { %v5187_v46 = vadd.f32 %v1793_v24, %v4598_v5  ;;  %v1933_v49 = vpack.c.bf16 %v1912_v21, %v5148_v50  ;;  %v3155_v50 = vpop.permute.xlu1 %3154  ;;  %v2197_v21 = vld [vmem:[%s4018_s26 + $0x165] sm:$0xff] }
 0x2ec   : > { %v3797_v63 = vpop.eup %3796  ;;  %v2419_v7 = vadd.f32 %v2343_v27, %v2135_v43  ;;  %v2630_v9 = vpop.f32.mrf.mxu0  ;;  %v2888_v58 = vmul.f32 1.442695, %v2829_v59 }
 0x2ed   : > { %v3688_v26 = vadd.f32 -1.0, %v3797_v63 }
 0x2ee   : > { %v2703_v3 = vadd.f32 %v2627_v47, %v2419_v7  ;;  %3624 = vmatmul.msk.bf16.gmra.mxu2 %vm377_vm1, %v5130_v44  ;;  %3798 = vpow2.f32 %v2888_v58  ;;  %v3150_v47 = vpop.permute.xlu0 %3149 }
 0x2ef   : > { %3646 = vmatmul.msk.bf16.gmra.mxu3 %vm377_vm1, %v2216_v55  ;;  %v2992_v33 = vsel %vm2787_vm4, %v2746_v0, %v3688_v26  ;;  %3668 = vmatmul.msk.bf16.gmra.mxu0 %vm377_vm1, %v2500_v15 }
 0x2f0   : > { %v2748_v5 = vadd.f32 %v5180_v60, %v2703_v3  ;;  %v3279_v34 = vmul.f32 %v3145_v19, %v2992_v33 }
 0x2f1   : > { %v2062_v36 = vpop.f32.mrf.mxu2 }
 0x2f2   : > { %v2346_v30 = vpop.f32.mrf.mxu3  ;;  %v3319_v22 = vadd.f32 %v3318_v42, %v3279_v34  ;;  %v2136_v17 = vadd.f32 %v2062_v36, %v5101_v51  ;;  %v1795_v40 = vpop.f32.mrf.mxu1  ;;  %v2830_v44 = vmin.f32 %v2748_v5, 0.0  ;;  %v2195_v51 = vld [vmem:[%s4018_s26 + $0x155] sm:$0xff]  ;;  %vm2789_vm6 = vcmp.gt.f32.partialorder %v2748_v5, 0.0 }
 0x2f3   : > { %v5196_v28 = vadd.f32 %v1795_v40, %v4618_v25  ;;  %v2479_v25 = vld [vmem:[%s4018_s26 + $0x156] sm:$0xff]  ;;  %v2217_v24 = vpack.c.bf16 %v2196_v23, %v2195_v51  ;;  %v2481_v51 = vld [vmem:[%s4018_s26 + $0x166] sm:$0xff] }
 0x2f4   : > { %v3799_v0 = vpop.eup %3798  ;;  %v2420_v12 = vadd.f32 %v2346_v30, %v2136_v17  ;;  %v2632_v14 = vpop.f32.mrf.mxu0  ;;  %v2890_v39 = vmul.f32 1.442695, %v2830_v44  ;;  %v2501_v15 = vpack.c.bf16 %v2480_v53, %v2479_v25 }
 0x2f5   : > { %v3689_v20 = vadd.f32 -1.0, %v3799_v0 }
 0x2f6   : > { %v2704_v41 = vadd.f32 %v2630_v9, %v2420_v12  ;;  %3800 = vpow2.f32 %v2890_v39 }
 0x2f7   : > { %v2993_v2 = vsel %vm2788_vm5, %v2747_v61, %v3689_v20  ;;  %v3356_v61 = vld [vmem:[%s5356_s4 + $0x38] sm:$0xff]  ;;  %v1913_v20 = vld [vmem:[%s4018_s26 + $0x164] sm:$0xff] }
 0x2f8   : > { %v2749_v52 = vadd.f32 %v5180_v60, %v2704_v41  ;;  %v3280_v29 = vmul.f32 %v3150_v47, %v2993_v2  ;;  %3374 = vmatpush.msrb.mxu1 %v3356_v61 }
 0x2f9   : > { %v2064_v16 = vpop.f32.mrf.mxu2 }
 0x2fa   : > { %v2348_v10 = vpop.f32.mrf.mxu3  ;;  %v3320_v27 = vadd.f32 %v3319_v22, %v3280_v29  ;;  %v2137_v42 = vadd.f32 %v2064_v16, %v5115_v11  ;;  %v1798_v43 = vpop.f32.mrf.mxu1  ;;  %v2831_v55 = vmin.f32 %v2749_v52, 0.0  ;;  %vm2790_vm7 = vcmp.gt.f32.partialorder %v2749_v52, 0.0 }
 0x2fb   : > { %v5210_v59 = vadd.f32 %v1798_v43, %v4630_v45 }
 0x2fc   : > { %v3801_v63 = vpop.eup %3800  ;;  %v2421_v7 = vadd.f32 %v2348_v10, %v2137_v42  ;;  %v2635_v9 = vpop.f32.mrf.mxu0  ;;  %v2892_v58 = vmul.f32 1.442695, %v2831_v55  ;;  %v2218_v10 = vpack.c.bf16 %v2197_v21, %v2197_v21  ;;  %v2502_v42 = vpack.c.bf16 %v2481_v51, %v2481_v51 }
 0x2fd   : > { %v3690_v19 = vadd.f32 -1.0, %v3801_v63 }
 0x2fe   : > { %v2705_v26 = vadd.f32 %v2632_v14, %v2421_v7  ;;  %3625 = vmatmul.msk.bf16.gmra.mxu2 %vm377_vm1, %v1933_v49  ;;  %3802 = vpow2.f32 %v2892_v58  ;;  %v3160_v14 = vpop.permute.xlu2 %3159 }
 0x2ff   : > { %3647 = vmatmul.msk.bf16.gmra.mxu3 %vm377_vm1, %v2217_v24  ;;  %v2994_v11 = vsel %vm2789_vm6, %v2748_v5, %v3690_v19  ;;  %3669 = vmatmul.msk.bf16.gmra.mxu0 %vm377_vm1, %v2501_v15 }
 0x300   : > { %v2750_v45 = vadd.f32 %v5180_v60, %v2705_v26  ;;  %v3281_v3 = vmul.f32 %v3155_v50, %v2994_v11 }
 0x301   : > { %v2067_v33 = vpop.f32.mrf.mxu2 }
 0x302   : > { %v2351_v34 = vpop.f32.mrf.mxu3  ;;  %v3321_v36 = vadd.f32 %v3320_v27, %v3281_v3  ;;  %v2138_v30 = vadd.f32 %v2067_v33, %v5134_v1  ;;  %v1800_v22 = vpop.f32.mrf.mxu1  ;;  %v2832_v17 = vmin.f32 %v2750_v45, 0.0  ;;  %vm2791_vm8 = vcmp.gt.f32.partialorder %v2750_v45, 0.0 }
 0x303   : > { %v5218_v40 = vadd.f32 %v1800_v22, %v4650_v56  ;;  %v1934_v56 = vpack.c.bf16 %v1913_v20, %v1913_v20  ;;  %v3355_v20 = vld [vmem:[%s5356_s4 + $0x30] sm:$0xff] }
 0x304   : > { %v3803_v44 = vpop.eup %3802  ;;  %v2422_v5 = vadd.f32 %v2351_v34, %v2138_v30  ;;  %v2637_v0 = vpop.f32.mrf.mxu0  ;;  %v2894_v12 = vmul.f32 1.442695, %v2832_v17  ;;  %3375 = vmatpush.msrb.mxu1 %v3355_v20 }
 0x305   : > { %v3691_v39 = vadd.f32 -1.0, %v3803_v44  ;;  %v3170_v17 = vpop.permute.xlu1 %3169 }
 0x306   : > { %v2706_v47 = vadd.f32 %v2635_v9, %v2422_v5  ;;  %3804 = vpow2.f32 %v2894_v12 }
 0x307   : > { %v2995_v41 = vsel %vm2790_vm7, %v2749_v52, %v3691_v39 }
 0x308   : > { %v2751_v1 = vadd.f32 %v5180_v60, %v2706_v47  ;;  %v3282_v2 = vmul.f32 %v3160_v14, %v2995_v41 }
 0x309   : > { %v2069_v23 = vpop.f32.mrf.mxu2 }
 0x30a   : > { %v2353_v29 = vpop.f32.mrf.mxu3  ;;  %v3322_v25 = vadd.f32 %v3321_v36, %v3282_v2  ;;  %v2139_v53 = vadd.f32 %v2069_v23, %v5145_v6  ;;  %v1803_v16 = vpop.f32.mrf.mxu1  ;;  %v2833_v49 = vmin.f32 %v2751_v1, 0.0  ;;  %vm2792_vm9 = vcmp.gt.f32.partialorder %v2751_v1, 0.0 }
 0x30b   : > { %v5226_v27 = vadd.f32 %v1803_v16, %v4659_v13  ;;  %v3165_v6 = vpop.permute.xlu0 %3164 }
 0x30c   : > { %v3805_v43 = vpop.eup %3804  ;;  %v2423_v52 = vadd.f32 %v2353_v29, %v2139_v53  ;;  %v2640_v24 = vpop.f32.mrf.mxu0  ;;  %v2896_v55 = vmul.f32 1.442695, %v2833_v49 }
 0x30d   : > { %v3692_v61 = vadd.f32 -1.0, %v3805_v43 }
 0x30e   : > { %v2707_v15 = vadd.f32 %v2637_v0, %v2423_v52  ;;  %3626 = vmatmul.msk.bf16.gmra.mxu2 %vm377_vm1, %v1934_v56  ;;  %3806 = vpow2.f32 %v2896_v55  ;;  %v3175_v56 = vpop.permute.xlu2 %3174 }
 0x30f   : > { %3648 = vmatmul.msk.bf16.gmra.mxu3 %vm377_vm1, %v2218_v10  ;;  %v2996_v63 = vsel %vm2791_vm8, %v2750_v45, %v3692_v61  ;;  %3670 = vmatmul.msk.bf16.gmra.mxu0 %vm377_vm1, %v2502_v42 }
 0x310   : > { %v2752_v13 = vadd.f32 %v5180_v60, %v2707_v15  ;;  %v3283_v7 = vmul.f32 %v3165_v6, %v2996_v63 }
 0x311   : > { %v2072_v9 = vpop.f32.mrf.mxu2 }
 0x312   : > { %v2356_v58 = vpop.f32.mrf.mxu3  ;;  %v3323_v50 = vadd.f32 %v3322_v25, %v3283_v7  ;;  %v2140_v19 = vadd.f32 %v2072_v9, %v5159_v54  ;;  %v1805_v26 = vpop.f32.mrf.mxu1  ;;  %v2834_v11 = vmin.f32 %v2752_v13, 0.0  ;;  %vm2793_vm1 = vcmp.gt.f32.partialorder %v2752_v13, 0.0 }
 0x313   : > { %v5234_v3 = vadd.f32 %v1805_v26, %v4676_v4 }
 0x314   : > { %v3807_v33 = vpop.eup %3806  ;;  %v2424_v34 = vadd.f32 %v2356_v58, %v2140_v19  ;;  %v2642_v36 = vpop.f32.mrf.mxu0  ;;  %v2898_v30 = vmul.f32 1.442695, %v2834_v11 }
 0x315   : > { %v3693_v45 = vadd.f32 -1.0, %v3807_v33 }
 0x316   : > { %v2708_v22 = vadd.f32 %v2640_v24, %v2424_v34  ;;  %3808 = vpow2.f32 %v2898_v30 }
 0x317   : > { %v2997_v44 = vsel %vm2792_vm9, %v2751_v1, %v3693_v45 }
 0x318   : > { %v3284_v5 = vmul.f32 %v3170_v17, %v2997_v44  ;;  %v2753_v0 = vadd.f32 %v5180_v60, %v2708_v22  ;;  %v3185_v44 = vpop.permute.xlu1 %3184 }
 0x319   : > { %v2074_v12 = vpop.f32.mrf.mxu2 }
 0x31a   : > { %v2358_v54 = vpop.f32.mrf.mxu3  ;;  %v3324_v14 = vadd.f32 %v3323_v50, %v3284_v5  ;;  %v2835_v39 = vmin.f32 %v2753_v0, 0.0  ;;  %v2141_v4 = vadd.f32 %v2074_v12, %v5173_v48  ;;  %v1808_v47 = vpop.f32.mrf.mxu1  ;;  %vm2794_vm10 = vcmp.gt.f32.partialorder %v2753_v0, 0.0 }
 0x31b   : > { %v5242_v41 = vadd.f32 %v1808_v47, %v4688_v37  ;;  %v3354_v47 = vld [vmem:[%s5356_s4 + $0x28] sm:$0xff] }
 0x31c   : > { %v3809_v21 = vpop.eup %3808  ;;  %v2900_v1 = vmul.f32 1.442695, %v2835_v39  ;;  %v2425_v2 = vadd.f32 %v2358_v54, %v2141_v4  ;;  %v2645_v51 = vpop.f32.mrf.mxu0  ;;  %3376 = vmatpush.msrb.mxu1 %v3354_v47 }
 0x31d   : > { %v3694_v23 = vadd.f32 -1.0, %v3809_v21 }
 0x31e   : > { %3810 = vpow2.f32 %v2900_v1  ;;  %v2709_v29 = vadd.f32 %v2642_v36, %v2425_v2 }
 0x31f   : > { %v2998_v25 = vsel %vm2793_vm1, %v2752_v13, %v3694_v23  ;;  %v3180_v13 = vpop.permute.xlu0 %3179 }
 0x320   : > { %v2754_v48 = vadd.f32 %v5180_v60, %v2709_v29  ;;  %v3285_v53 = vmul.f32 %v3175_v56, %v2998_v25  ;;  %v3190_v56 = vpop.permute.xlu2 %3189 }
 0x321   : > { %v2077_v16 = vpop.f32.mrf.mxu2 }
 0x322   : > { %v2361_v10 = vpop.f32.mrf.mxu3  ;;  %v2836_v49 = vmin.f32 %v2754_v48, 0.0  ;;  %v3325_v42 = vadd.f32 %v3324_v14, %v3285_v53  ;;  %v2142_v37 = vadd.f32 %v2077_v16, %v5187_v46  ;;  %v1810_v43 = vpop.f32.mrf.mxu1  ;;  %vm2795_vm11 = vcmp.gt.f32.partialorder %v2754_v48, 0.0 }
 0x323   : > { %v5247_v52 = vadd.f32 %v1810_v43, %v4711_v35 }
 0x324   : > { %v3811_v24 = vpop.eup %3810  ;;  %v2902_v55 = vmul.f32 1.442695, %v2836_v49  ;;  %v2426_v61 = vadd.f32 %v2361_v10, %v2142_v37  ;;  %v2647_v15 = vpop.f32.mrf.mxu0 }
 0x325   : > { %v3695_v6 = vadd.f32 -1.0, %v3811_v24 }
 0x326   : > { %3812 = vpow2.f32 %v2902_v55  ;;  %v2710_v63 = vadd.f32 %v2645_v51, %v2426_v61 }
 0x327   : > { %v2999_v7 = vsel %vm2794_vm10, %v2753_v0, %v3695_v6 }
 0x328   : > { %v3286_v9 = vmul.f32 %v3180_v13, %v2999_v7  ;;  %v2755_v58 = vadd.f32 %v5180_v60, %v2710_v63  ;;  %v3195_v63 = vpop.permute.xlu0 %3194 }
 0x329   : > { %v2079_v50 = vpop.f32.mrf.mxu2 }
 0x32a   : > { %v2363_v19 = vpop.f32.mrf.mxu3  ;;  %v3326_v46 = vadd.f32 %v3325_v42, %v3286_v9  ;;  %v2837_v26 = vmin.f32 %v2755_v58, 0.0  ;;  %v2143_v35 = vadd.f32 %v2079_v50, %v5196_v28  ;;  %v1813_v11 = vpop.f32.mrf.mxu1  ;;  %vm2796_vm12 = vcmp.gt.f32.partialorder %v2755_v58, 0.0 }
 0x32b   : > { %v5252_v33 = vadd.f32 %v1813_v11, %v4721_v32 }
 0x32c   : > { %v3813_v34 = vpop.eup %3812  ;;  %v2904_v36 = vmul.f32 1.442695, %v2837_v26  ;;  %v2427_v30 = vadd.f32 %v2363_v19, %v2143_v35  ;;  %v2650_v45 = vpop.f32.mrf.mxu0  ;;  %v3353_v26 = vld [vmem:[%s5356_s4 + $0x20] sm:$0xff] }
 0x32d   : > { %v3696_v22 = vadd.f32 -1.0, %v3813_v34  ;;  %3377 = vmatpush.msrb.mxu1 %v3353_v26 }
 0x32e   : > { %3814 = vpow2.f32 %v2904_v36  ;;  %v2711_v17 = vadd.f32 %v2647_v15, %v2427_v30 }
 0x32f   : > { %v3000_v5 = vsel %vm2795_vm11, %v2754_v48, %v3696_v22 }
 0x330   : > { %v3287_v0 = vmul.f32 %v3185_v44, %v3000_v5  ;;  %v2756_v12 = vadd.f32 %v5180_v60, %v2711_v17  ;;  %v3200_v17 = vpop.permute.xlu1 %3199 }
 0x331   : > { %v2082_v54 = vpop.f32.mrf.mxu2 }
 0x332   : > { %v2366_v14 = vpop.f32.mrf.mxu3  ;;  %v3327_v28 = vadd.f32 %v3326_v46, %v3287_v0  ;;  %v2838_v39 = vmin.f32 %v2756_v12, 0.0  ;;  %v2144_v32 = vadd.f32 %v2082_v54, %v5210_v59  ;;  %v1815_v4 = vpop.f32.mrf.mxu1  ;;  %vm2797_vm13 = vcmp.gt.f32.partialorder %v2756_v12, 0.0 }
 0x333   : > { %v5260_v20 = vadd.f32 %v1815_v4, %v4742_v38 }
 0x334   : > { %v3815_v21 = vpop.eup %3814  ;;  %v2906_v1 = vmul.f32 1.442695, %v2838_v39  ;;  %v2428_v2 = vadd.f32 %v2366_v14, %v2144_v32  ;;  %v2652_v51 = vpop.f32.mrf.mxu0 }
 0x335   : > { %v3697_v23 = vadd.f32 -1.0, %v3815_v21 }
 0x336   : > { %3816 = vpow2.f32 %v2906_v1  ;;  %v2712_v29 = vadd.f32 %v2650_v45, %v2428_v2 }
 0x337   : > { %v3001_v25 = vsel %vm2796_vm12, %v2755_v58, %v3697_v23 }
 0x338   : > { %v3288_v59 = vmul.f32 %v3190_v56, %v3001_v25  ;;  %v2757_v48 = vadd.f32 %v5180_v60, %v2712_v29 }
 0x339   : > { %v2084_v53 = vpop.f32.mrf.mxu2 }
 0x33a   : > { %v2368_v16 = vpop.f32.mrf.mxu3  ;;  %v3328_v10 = vadd.f32 %v3327_v28, %v3288_v59  ;;  %v2839_v49 = vmin.f32 %v2757_v48, 0.0  ;;  %v2145_v38 = vadd.f32 %v2084_v53, %v5218_v40  ;;  %v1818_v42 = vpop.f32.mrf.mxu1  ;;  %vm2798_vm14 = vcmp.gt.f32.partialorder %v2757_v48, 0.0 }
 0x33b   : > { %v5265_v37 = vadd.f32 %v1818_v42, %v4755_v18 }
 0x33c   : > { %v3817_v43 = vpop.eup %3816  ;;  %v2908_v24 = vmul.f32 1.442695, %v2839_v49  ;;  %v2429_v55 = vadd.f32 %v2368_v16, %v2145_v38  ;;  %v2655_v61 = vpop.f32.mrf.mxu0 }
 0x33d   : > { %v3698_v15 = vadd.f32 -1.0, %v3817_v43 }
 0x33e   : > { %3818 = vpow2.f32 %v2908_v24  ;;  %v2713_v6 = vadd.f32 %v2652_v51, %v2429_v55  ;;  %v3205_v51 = vpop.permute.xlu2 %3204  ;;  %v3210_v24 = vpop.permute.xlu0 %3209 }
 0x33f   : > { %v3002_v13 = vsel %vm2797_vm13, %v2756_v12, %v3698_v15 }
 0x340   : > { %v3289_v7 = vmul.f32 %v3195_v63, %v3002_v13  ;;  %v2758_v9 = vadd.f32 %v5180_v60, %v2713_v6 }
 0x341   : > { %v2087_v58 = vpop.f32.mrf.mxu2 }
 0x342   : > { %v2371_v50 = vpop.f32.mrf.mxu3  ;;  %v3329_v40 = vadd.f32 %v3328_v10, %v3289_v7  ;;  %v2840_v19 = vmin.f32 %v2758_v9, 0.0  ;;  %v2146_v18 = vadd.f32 %v2087_v58, %v5226_v27  ;;  %v1820_v46 = vpop.f32.mrf.mxu1  ;;  %vm2799_vm15 = vcmp.gt.f32.partialorder %v2758_v9, 0.0  ;;  %v3352_v58 = vld [vmem:[%s5356_s4 + $0x18] sm:$0xff] }
 0x343   : > { %v5273_v35 = vadd.f32 %v1820_v46, %v4776_v62  ;;  %3378 = vmatpush.msrb.mxu1 %v3352_v58 }
 0x344   : > { %v3819_v11 = vpop.eup %3818  ;;  %v2910_v34 = vmul.f32 1.442695, %v2840_v19  ;;  %v2430_v36 = vadd.f32 %v2371_v50, %v2146_v18  ;;  %v2657_v30 = vpop.f32.mrf.mxu0 }
 0x345   : > { %v3699_v45 = vadd.f32 -1.0, %v3819_v11  ;;  %v3215_v11 = vpop.permute.xlu1 %3214 }
 0x346   : > { %3820 = vpow2.f32 %v2910_v34  ;;  %v2714_v22 = vadd.f32 %v2655_v61, %v2430_v36 }
 0x347   : > { %v3003_v44 = vsel %vm2798_vm14, %v2757_v48, %v3699_v45 }
 0x348   : > { %v3290_v27 = vmul.f32 %v3200_v17, %v3003_v44  ;;  %v2759_v5 = vadd.f32 %v5180_v60, %v2714_v22 }
 0x349   : > { %v2089_v0 = vpop.f32.mrf.mxu2 }
 0x34a   : > { %v2373_v12 = vpop.f32.mrf.mxu3  ;;  %v3330_v54 = vadd.f32 %v3329_v40, %v3290_v27  ;;  %v2841_v14 = vmin.f32 %v2759_v5, 0.0  ;;  %v2147_v62 = vadd.f32 %v2089_v0, %v5234_v3  ;;  %v1823_v28 = vpop.f32.mrf.mxu1  ;;  %vm2800_vm0 = vcmp.gt.f32.partialorder %v2759_v5, 0.0 }
 0x34b   : > { %v5278_v39 = vadd.f32 %v1823_v28, %v4789_v57  ;;  %v3220_v28 = vpop.permute.xlu2 %3219 }
 0x34c   : > { %v3821_v32 = vpop.eup %3820  ;;  %v2912_v4 = vmul.f32 1.442695, %v2841_v14  ;;  %v2431_v47 = vadd.f32 %v2373_v12, %v2147_v62  ;;  %v2660_v21 = vpop.f32.mrf.mxu0 }
 0x34d   : > { %v3700_v1 = vadd.f32 -1.0, %v3821_v32 }
 0x34e   : > { %3822 = vpow2.f32 %v2912_v4  ;;  %v2715_v2 = vadd.f32 %v2657_v30, %v2431_v47 }
 0x34f   : > { %v3004_v23 = vsel %vm2799_vm15, %v2758_v9, %v3700_v1 }
 0x350   : > { %v3291_v29 = vmul.f32 %v3205_v51, %v3004_v23  ;;  %v2760_v56 = vadd.f32 %v5180_v60, %v2715_v2 }
 0x351   : > { %v2092_v25 = vpop.f32.mrf.mxu2 }
 0x352   : > { %v2376_v59 = vpop.f32.mrf.mxu3  ;;  %v3331_v3 = vadd.f32 %v3330_v54, %v3291_v29  ;;  %v2842_v48 = vmin.f32 %v2760_v56, 0.0  ;;  %v2148_v57 = vadd.f32 %v2092_v25, %v5242_v41  ;;  %v5282_v53 = vpop.f32.mrf.mxu1  ;;  %vm2801_vm2 = vcmp.gt.f32.partialorder %v2760_v56, 0.0 }
 0x354   : > { %v3823_v16 = vpop.eup %3822  ;;  %v2914_v10 = vmul.f32 1.442695, %v2842_v48  ;;  %v2432_v49 = vadd.f32 %v2376_v59, %v2148_v57  ;;  %v2662_v38 = vpop.f32.mrf.mxu0 }
 0x355   : > { %v3701_v42 = vadd.f32 -1.0, %v3823_v16  ;;  %v3225_v48 = vpop.permute.xlu0 %3224 }
 0x356   : > { %3824 = vpow2.f32 %v2914_v10  ;;  %v2716_v43 = vadd.f32 %v2660_v21, %v2432_v49 }
 0x357   : > { %v3005_v55 = vsel %vm2800_vm0, %v2759_v5, %v3701_v42 }
 0x358   : > { %v3292_v61 = vmul.f32 %v3210_v24, %v3005_v55  ;;  %v2761_v15 = vadd.f32 %v5180_v60, %v2716_v43 }
 0x359   : > { %v2094_v6 = vpop.f32.mrf.mxu2 }
 0x35a   : > { %v2378_v63 = vpop.f32.mrf.mxu3  ;;  %v3332_v13 = vadd.f32 %v3331_v3, %v3292_v61  ;;  %v2843_v7 = vmin.f32 %v2761_v15, 0.0  ;;  %v2149_v41 = vadd.f32 %v2094_v6, %v5247_v52  ;;  %v5286_v9 = vpop.f32.mrf.mxu1  ;;  %vm2802_vm3 = vcmp.gt.f32.partialorder %v2761_v15, 0.0 }
 0x35c   : > { %v3825_v50 = vpop.eup %3824  ;;  %v2916_v40 = vmul.f32 1.442695, %v2843_v7  ;;  %v2433_v19 = vadd.f32 %v2378_v63, %v2149_v41  ;;  %v2665_v18 = vpop.f32.mrf.mxu0 }
 0x35d   : > { %v3702_v46 = vadd.f32 -1.0, %v3825_v50  ;;  %v3230_v7 = vpop.permute.xlu1 %3229 }
 0x35e   : > { %3826 = vpow2.f32 %v2916_v40  ;;  %v2717_v26 = vadd.f32 %v2662_v38, %v2433_v19 }
 0x35f   : > { %v3006_v34 = vsel %vm2801_vm2, %v2760_v56, %v3702_v46 }
 0x360   : > { %v3293_v36 = vmul.f32 %v3215_v11, %v3006_v34  ;;  %v2762_v52 = vadd.f32 %v5180_v60, %v2717_v26 }
 0x361   : > { %v2097_v30 = vpop.f32.mrf.mxu2 }
 0x362   : > { %v2381_v45 = vpop.f32.mrf.mxu3  ;;  %v3333_v22 = vadd.f32 %v3332_v13, %v3293_v36  ;;  %v2844_v17 = vmin.f32 %v2762_v52, 0.0  ;;  %v2150_v44 = vadd.f32 %v2097_v30, %v5252_v33  ;;  %v1830_v27 = vpop.f32.mrf.mxu1  ;;  %vm2803_vm4 = vcmp.gt.f32.partialorder %v2762_v52, 0.0 }
 0x364   : > { %v3827_v5 = vpop.eup %3826  ;;  %v2918_v0 = vmul.f32 1.442695, %v2844_v17  ;;  %v2434_v12 = vadd.f32 %v2381_v45, %v2150_v44  ;;  %v2667_v54 = vpop.f32.mrf.mxu0 }
 0x365   : > { %v3703_v14 = vadd.f32 -1.0, %v3827_v5  ;;  %v3235_v45 = vpop.permute.xlu2 %3234 }
 0x366   : > { %3828 = vpow2.f32 %v2918_v0  ;;  %v2718_v62 = vadd.f32 %v2665_v18, %v2434_v12 }
 0x367   : > { %v3007_v32 = vsel %vm2802_vm3, %v2761_v15, %v3703_v14 }
 0x368   : > { %v3294_v4 = vmul.f32 %v3220_v28, %v3007_v32  ;;  %v2763_v47 = vadd.f32 %v5180_v60, %v2718_v62 }
 0x369   : > { %v2099_v21 = vpop.f32.mrf.mxu2 }
 0x36a   : > { %v2383_v1 = vpop.f32.mrf.mxu3  ;;  %v3334_v2 = vadd.f32 %v3333_v22, %v3294_v4  ;;  %v2845_v51 = vmin.f32 %v2763_v47, 0.0  ;;  %v2151_v33 = vadd.f32 %v2099_v21, %v5260_v20  ;;  %v3351_v20 = vld [vmem:[%s5356_s4 + $0x10] sm:$0xff]  ;;  %vm2804_vm5 = vcmp.gt.f32.partialorder %v2763_v47, 0.0  ;;  %v3240_v21 = vpop.permute.xlu0 %3239 }
 0x36b   : > { %3379 = vmatpush.msrb.mxu1 %v3351_v20 }
 0x36c   : > { %v3829_v23 = vpop.eup %3828  ;;  %v2920_v29 = vmul.f32 1.442695, %v2845_v51  ;;  %v2435_v56 = vadd.f32 %v2383_v1, %v2151_v33  ;;  %v2670_v25 = vpop.f32.mrf.mxu0 }
 0x36d   : > { %v3704_v59 = vadd.f32 -1.0, %v3829_v23 }
 0x36e   : > { %3830 = vpow2.f32 %v2920_v29  ;;  %v2719_v3 = vadd.f32 %v2667_v54, %v2435_v56 }
 0x36f   : > { %v3008_v57 = vsel %vm2803_vm4, %v2762_v52, %v3704_v59 }
 0x370   : > { %v3295_v16 = vmul.f32 %v3225_v48, %v3008_v57  ;;  %v2764_v10 = vadd.f32 %v5180_v60, %v2719_v3 }
 0x371   : > { %v2102_v49 = vpop.f32.mrf.mxu2 }
 0x372   : > { %v2386_v38 = vpop.f32.mrf.mxu3  ;;  %v3335_v42 = vadd.f32 %v3334_v2, %v3295_v16  ;;  %v2846_v43 = vmin.f32 %v2764_v10, 0.0  ;;  %v2152_v24 = vadd.f32 %v2102_v49, %v5265_v37  ;;  %vm2805_vm6 = vcmp.gt.f32.partialorder %v2764_v10, 0.0 }
 0x373   : > { %v1871_v2 = vadd.f32 %v5282_v53, %v4810_v31  ;;  %v3349_v31 = vld [vmem:[%s5356_s4] sm:$0xff]  ;;  %v3245_v53 = vpop.permute.xlu1 %3244 }
 0x374   : > { %v3831_v55 = vpop.eup %3830  ;;  %v2922_v61 = vmul.f32 1.442695, %v2846_v43  ;;  %v2436_v15 = vadd.f32 %v2386_v38, %v2152_v24  ;;  %v2672_v6 = vpop.f32.mrf.mxu0  ;;  %v1872_v38 = vadd.f32 %v5286_v9, %v4823_v8 }
 0x375   : > { %v3705_v63 = vadd.f32 -1.0, %v3831_v55 }
 0x376   : > { %3832 = vpow2.f32 %v2922_v61  ;;  %v2720_v13 = vadd.f32 %v2670_v25, %v2436_v15 }
 0x377   : > { %v3009_v41 = vsel %vm2804_vm5, %v2763_v47, %v3705_v63 }
 0x378   : > { %v3296_v58 = vmul.f32 %v3230_v7, %v3009_v41  ;;  %v2765_v50 = vadd.f32 %v5180_v60, %v2720_v13 }
 0x379   : > { %v2104_v40 = vpop.f32.mrf.mxu2 }
 0x37a   : > { %v2388_v37 = vpop.f32.mrf.mxu3  ;;  %v3336_v19 = vadd.f32 %v3335_v42, %v3296_v58  ;;  %v2847_v18 = vmin.f32 %v2765_v50, 0.0  ;;  %v2153_v46 = vadd.f32 %v2104_v40, %v5273_v35  ;;  %v3350_v35 = vld [vmem:[%s5356_s4 + $0x8] sm:$0xff]  ;;  %vm2806_vm7 = vcmp.gt.f32.partialorder %v2765_v50, 0.0 }
 0x37b   : > { %3380 = vmatpush.msrb.mxu1 %v3350_v35 }
 0x37c   : > { %v3833_v26 = vpop.eup %3832  ;;  %v2924_v11 = vmul.f32 1.442695, %v2847_v18  ;;  %v2437_v34 = vadd.f32 %v2388_v37, %v2153_v46  ;;  %v2675_v36 = vpop.f32.mrf.mxu0 }
 0x37d   : > { %v3706_v52 = vadd.f32 -1.0, %v3833_v26  ;;  %3381 = vmatpush.msrb.mxu1 %v3349_v31 }
 0x37e   : > { %3834 = vpow2.f32 %v2924_v11  ;;  %v2721_v30 = vadd.f32 %v2672_v6, %v2437_v34 }
 0x37f   : > { %v3010_v22 = vsel %vm2805_vm6, %v2764_v10, %v3706_v52 }
 0x380   : > { %v3297_v17 = vmul.f32 %v3235_v45, %v3010_v22  ;;  %v2766_v44 = vadd.f32 %v5180_v60, %v2721_v30 }
 0x381   : > { %v2107_v27 = vpop.f32.mrf.mxu2 }
 0x382   : > { %v2391_v5 = vpop.f32.mrf.mxu3  ;;  %v3337_v0 = vadd.f32 %v3336_v19, %v3297_v17  ;;  %v2848_v12 = vmin.f32 %v2766_v44, 0.0  ;;  %v2154_v54 = vadd.f32 %v2107_v27, %v5278_v39  ;;  %vm2807_vm8 = vcmp.gt.f32.partialorder %v2766_v44, 0.0 }
 0x384   : > { %v3835_v14 = vpop.eup %3834  ;;  %v2926_v62 = vmul.f32 1.442695, %v2848_v12  ;;  %v2438_v28 = vadd.f32 %v2391_v5, %v2154_v54  ;;  %v2677_v32 = vpop.f32.mrf.mxu0 }
 0x385   : > { %v3707_v4 = vadd.f32 -1.0, %v3835_v14 }
 0x386   : > { %3836 = vpow2.f32 %v2926_v62  ;;  %v2722_v47 = vadd.f32 %v2675_v36, %v2438_v28  ;;  %v3255_v36 = vpop.permute.xlu0 %3254  ;;  %v3365_v28 = vld [vmem:[%s5357_s5] sm:$0x1] }
 0x387   : > { %v3011_v1 = vsel %vm2806_vm7, %v2765_v50, %v3707_v4  ;;  %v3250_v50 = vpop.permute.xlu2 %3249 }
 0x388   : > { %v3298_v51 = vmul.f32 %v3240_v21, %v3011_v1  ;;  %v2767_v39 = vadd.f32 %v5180_v60, %v2722_v47 }
 0x389   : > { %v2109_v33 = vpop.f32.mrf.mxu2 }
 0x38a   : > { %v2393_v23 = vpop.f32.mrf.mxu3  ;;  %v3338_v29 = vadd.f32 %v3337_v0, %v3298_v51  ;;  %v2849_v56 = vmin.f32 %v2767_v39, 0.0  ;;  %v2155_v25 = vadd.f32 %v2109_v33, %v1871_v2  ;;  %vm2808_vm9 = vcmp.gt.f32.partialorder %v2767_v39, 0.0 }
 0x38c   : > { %v3837_v59 = vpop.eup %3836  ;;  %v2928_v3 = vmul.f32 1.442695, %v2849_v56  ;;  %v2439_v48 = vadd.f32 %v2393_v23, %v2155_v25  ;;  %v2680_v57 = vpop.f32.mrf.mxu0 }
 0x38d   : > { %v3708_v16 = vadd.f32 -1.0, %v3837_v59 }
 0x38e   : > { %3838 = vpow2.f32 %v2928_v3  ;;  %v2723_v10 = vadd.f32 %v2677_v32, %v2439_v48 }
 0x38f   : > { %v3012_v49 = vsel %vm2807_vm8, %v2766_v44, %v3708_v16  ;;  %v3260_v44 = vpop.permute.xlu1 %3259 }
 0x390   : > { %v3299_v42 = vmul.f32 %v3245_v53, %v3012_v49  ;;  %v2768_v43 = vadd.f32 %v5180_v60, %v2723_v10 }
 0x391   : > { %v2112_v24 = vpop.f32.mrf.mxu2 }
 0x392   : > { %v2396_v20 = vpop.f32.mrf.mxu3  ;;  %v3339_v55 = vadd.f32 %v3338_v29, %v3299_v42  ;;  %v2850_v61 = vmin.f32 %v2768_v43, 0.0  ;;  %v2156_v15 = vadd.f32 %v2112_v24, %v1872_v38  ;;  %vm2809_vm1 = vcmp.gt.f32.partialorder %v2768_v43, 0.0 }
 0x394   : > { %v3839_v6 = vpop.eup %3838  ;;  %v2930_v63 = vmul.f32 1.442695, %v2850_v61  ;;  %v2440_v13 = vadd.f32 %v2396_v20, %v2156_v15  ;;  %v2682_v7 = vpop.f32.mrf.mxu0 }
 0x395   : > { %v3709_v41 = vadd.f32 -1.0, %v3839_v6 }
 0x396   : > { %3840 = vpow2.f32 %v2930_v63  ;;  %v2724_v58 = vadd.f32 %v2680_v57, %v2440_v13 }
 0x397   : > { %v3013_v40 = vsel %vm2808_vm9, %v2767_v39, %v3709_v41 }
 0x398   : > { %v3300_v37 = vmul.f32 %v3250_v50, %v3013_v40  ;;  %v2769_v8 = vadd.f32 %v5180_v60, %v2724_v58 }
 0x399   : > { %v2114_v9 = vpop.f32.mrf.mxu2 }
 0x39a   : > { %v2398_v19 = vpop.f32.mrf.mxu3  ;;  %v3340_v18 = vadd.f32 %v3339_v55, %v3300_v37  ;;  %v2851_v46 = vmin.f32 %v2769_v8, 0.0  ;;  %vm2810_vm10 = vcmp.gt.f32.partialorder %v2769_v8, 0.0 }
 0x39c   : > { %v3841_v26 = vpop.eup %3840  ;;  %v2932_v11 = vmul.f32 1.442695, %v2851_v46 }
 0x39d   : > { %v3710_v34 = vadd.f32 -1.0, %v3841_v26 }
 0x39e   : > { %3842 = vpow2.f32 %v2932_v11 }
 0x39f   : > { %v3014_v52 = vsel %vm2809_vm1, %v2768_v43, %v3710_v34 }
 0x3a0   : > { %v3301_v30 = vmul.f32 %v3255_v36, %v3014_v52 }
 0x3a2   : > { %v3341_v45 = vadd.f32 %v3340_v18, %v3301_v30 }
 0x3a4   : > { %v3843_v22 = vpop.eup %3842 }
 0x3a5   : > { %v3711_v17 = vadd.f32 -1.0, %v3843_v22 }
 0x3a7   : > { %v3015_v27 = vsel %vm2810_vm10, %v2769_v8, %v3711_v17 }
 0x3a8   : > { %v3302_v5 = vmul.f32 %v3260_v44, %v3015_v27 }
 0x3aa   : > { %v3342_v60 = vadd.f32 %v3341_v45, %v3302_v5 }
 0x3ac   : > { %v3343_v0 = vrot.slane %v3342_v60, 4 }
 0x3ae   : > { %v3344_v12 = vadd.f32 %v3343_v0, %v3342_v60 }
 0x3b0   : > { %v3345_v54 = vrot.slane %v3344_v12, 2 }
 0x3b2   : > { %v3346_v35 = vadd.f32 %v3345_v54, %v3344_v12 }
 0x3b4   : > { %v3347_v14 = vrot.slane %v3346_v35, 1 }
 0x3b6   : > { %v3348_v62 = vadd.f32 %v3347_v14, %v3346_v35 }
 0x3b8   : > { %3382 = vmatmul.f32.vlgmr.msrb.gmra.mxu1 %v3348_v62 }
 0x435   : > { %v3383_v32 = vpop.f32.mrf.mxu1 }
 0x436   : > { %v3384_v4 = vadd.f32 %v3383_v32, %v3365_v28 }
 0x438   : > { %v3387_v47 = vmin.f32 %v3384_v4, 20.0  ;;  %vm3386_vm12 = vcmp.gt.f32.partialorder %v3384_v4, 20.0 }
 0x43a   : > { %v3388_v21 = vmul.f32 1.442695, %v3387_v47 }
 0x43c   : > { %3844 = vpow2.f32 %v3388_v21 }
 0x442   : > { %v3845_v1 = vpop.eup %3844 }
 0x443   : > { %v3390_v2 = vadd.f32 1.0, %v3845_v1  ;;  %v3393_v51 = vmul.f32 -0.5, %v3845_v1  ;;  %v3396_v33 = vand.u32 2147483647, %v3845_v1 }
 0x445   : > { %3846 = vlog2.f32 %v3390_v2  ;;  %v3394_v39 = vadd.f32 1.0, %v3393_v51  ;;  %vm3397_vm11 = vcmp.lt.f32.partialorder %v3396_v33, 0.0004427343 }
 0x447   : > { %v3395_v56 = vmul.f32 %v3845_v1, %v3394_v39 }
 0x44b   : > { %v3847_v23 = vpop.eup %3846 }
 0x44c   : > { %v3392_v29 = vmul.f32 0.6931472, %v3847_v23 }
 0x44e   : > { %v3398_v25 = vsel %vm3397_vm11, %v3395_v56, %v3392_v29 }
 0x44f   : > { %v3399_v59 = vsel %vm3386_vm12, %v3384_v4, %v3398_v25 }
 0x450   : > { %3400 = vst [vmem:[%s243_s13] sm:$0x1] %v3399_v59 }
 0x451   : > { %3876 = shalt.err (!%p3873_p3)
}
 0x452   : > { %3718 = dma.vmem_to_hbm [thread:$0]  (%p3987_p5), %s3413_s14, 16, %s3415_s15, %s3402_s16  }
 0x453 PF: > { %p3724_p4 = scmp.ge.s32.totalorder %s3911_s24, 2  ;;  %s3426_s26 = sand.u32 1, %s3899_s21  }
 0x454   : > { %s3427_s9 = scalar_lea.sflag [#allocation3], %s3426_s26 }
 0x455   : > { %p3721_p7 = pnand %p3724_p4, %p3991_p6 }
 0x457   : > { %p3722_p8 = pneg %p3721_p7 }
 0x459   : > { %3894 = dma.done.wait (%p3722_p8), %s3427_s9, 16  }
 0x45a   : > { %3896 = vsyncadd (%p3722_p8), %s3427_s9, 4294967280  ;;  %p16_p9 = scmp.ge.s32.totalorder %s3974_s27, 4   ;;  %s5371_s21 = smov %s3903_s22 }
 0x45b   : > { %s5372_s22 = smov %s3907_s23  ;;  %s5373_s23 = smov %s3985_s30 }
 0x45c   : > { %s5374_s24 = smov %s3974_s27  ;;  %18 = sbr.rel (!%p16_p9) target bundleno = 3 (0x3), region = 87 }
 0x461   :  { %3432 = vsyncpa [#allocation3], 1 }
 0x462   :  { %3434 = vsyncpa [#allocation3 + $0x1], 1 }

</bundles_post_ra>
